<compile_context>
chip_gen: v7x
topology: tpu7x:2x2x1
jax: 0.10.0
libtpu: 0.0.40
codegen_flags: <defaults>
</compile_context>

<pallas_src>
import numpy as np
import jax
import jax.numpy as jnp
from jax.experimental import pallas as pl
from jax.experimental.pallas import tpu as pltpu

EPS = 1e-5
KSIZE = 3
STRIDE = 2
NTAPS = KSIZE * KSIZE


def _out_hw(h, w):
    return (h - KSIZE) // STRIDE + 1, (w - KSIZE) // STRIDE + 1


# ----------------------------------------------------------------------------
# Fused Pallas kernel: conv1+IN+ReLU -> conv2+IN+ReLU -> conv3+IN+ReLU
# (one batch element per grid step, everything resident in VMEM)
# ----------------------------------------------------------------------------
def _in_relu(y):
    """InstanceNorm2d (affine=False, biased var) over spatial axis 0, then ReLU."""
    mean = jnp.mean(y, axis=0, keepdims=True)                 # (1, C)
    mean_sq = jnp.mean(y * y, axis=0, keepdims=True)          # one-pass variance
    var = jnp.maximum(mean_sq - mean * mean, 0.0)             # clamp rounding
    return jnp.maximum((y - mean) * jax.lax.rsqrt(var + EPS), 0.0)


def _conv_taps(x_bf16, sel_ref, w_ref):
    """Stride-2 3x3 conv as 9 tap matmuls:  sum_t (SEL[t] @ x) @ W[t].

    SEL[t] is a one-hot (P_out, P_in) gather matrix -> im2col on the MXU.
    Accumulation in f32."""
    acc = None
    for t in range(NTAPS):                                    # static unroll
        p_t = jnp.dot(sel_ref[t], x_bf16,
                      preferred_element_type=jnp.float32)     # gather rows
        c_t = jnp.dot(p_t.astype(jnp.bfloat16), w_ref[t],
                      preferred_element_type=jnp.float32)     # tap weight
        acc = c_t if acc is None else acc + c_t
    return acc


def _encoder_kernel(p1_ref, w1_ref, sel2_ref, w2_ref, sel3_ref, w3_ref, o_ref):
    # p1_ref  : (1, P1, K1)  bf16  layer-1 im2col patches for this batch elem
    # w1_ref  : (K1, 64)     bf16
    # sel2_ref: (9, P2, P1)  bf16  one-hot gather matrices (layer-2 im2col)
    # w2_ref  : (9, 64, 128) bf16  per-tap weights
    # sel3_ref: (9, P3, P2)  bf16
    # w3_ref  : (9, 128, 256) bf16
    # o_ref   : (1, P3, 256) f32
    y1 = jnp.dot(p1_ref[0], w1_ref[...],
                 preferred_element_type=jnp.float32)          # (P1, 64)
    y1 = _in_relu(y1)

    y2 = _in_relu(_conv_taps(y1.astype(jnp.bfloat16), sel2_ref, w2_ref))  # (P2,128)
    y3 = _in_relu(_conv_taps(y2.astype(jnp.bfloat16), sel3_ref, w3_ref))  # (P3,256)

    o_ref[0] = y3


def _encoder_pallas(patches1, w1, sel2, w2, sel3, w3):
    B, P1, K1 = patches1.shape
    C1 = w1.shape[1]
    _, P2, _ = sel2.shape
    C2 = w2.shape[2]
    _, P3, _ = sel3.shape
    C3 = w3.shape[2]

    return pl.pallas_call(
        _encoder_kernel,
        out_shape=jax.ShapeDtypeStruct((B, P3, C3), jnp.float32),
        grid_spec=pltpu.PrefetchScalarGridSpec(
            num_scalar_prefetch=0,
            grid=(B,),
            in_specs=[
                pl.BlockSpec((1, P1, K1), lambda b: (b, 0, 0)),
                pl.BlockSpec((K1, C1), lambda b: (0, 0)),
                pl.BlockSpec((NTAPS, P2, P1), lambda b: (0, 0, 0)),
                pl.BlockSpec((NTAPS, C1, C2), lambda b: (0, 0, 0)),
                pl.BlockSpec((NTAPS, P3, P2), lambda b: (0, 0, 0)),
                pl.BlockSpec((NTAPS, C2, C3), lambda b: (0, 0, 0)),
            ],
            out_specs=pl.BlockSpec((1, P3, C3), lambda b: (b, 0, 0)),
        ),
        compiler_params=pltpu.CompilerParams(
            dimension_semantics=("parallel",)),
    )(patches1, w1, sel2, w2, sel3, w3)


# ----------------------------------------------------------------------------
# One-time host-side parameter preparation (hoisted out of the forward path)
# ----------------------------------------------------------------------------
def _spectral_normalize(w_oihw):
    """PyTorch spectral_norm at convergence: divide by sigma_max of (Co, Ci*9)."""
    co = w_oihw.shape[0]
    w2d = np.asarray(w_oihw, dtype=np.float64).reshape(co, -1)
    sigma = np.linalg.svd(w2d, compute_uv=False)[0]
    return w_oihw / jnp.float32(sigma)


def _weight_to_im2col_mat(w_oihw):
    """(Co, Ci, kh, kw) -> (kh*kw*Ci, Co), K ordered (kh, kw, ci) to match im2col."""
    co, ci, kh, kw = w_oihw.shape
    return jnp.transpose(w_oihw, (2, 3, 1, 0)).reshape(kh * kw * ci, co)


def _weight_to_taps(w_oihw):
    """(Co, Ci, kh, kw) -> (kh*kw, Ci, Co), tap index = kh*3 + kw."""
    co, ci, kh, kw = w_oihw.shape
    return jnp.transpose(w_oihw, (2, 3, 1, 0)).reshape(kh * kw, ci, co)


def _make_sel(h_in, w_in):
    """One-hot gather matrices SEL[t, p_out, p_in] for a stride-2 3x3 conv."""
    oh, ow = _out_hw(h_in, w_in)
    sel = np.zeros((NTAPS, oh * ow, h_in * w_in), np.float32)
    for dh in range(KSIZE):
        for dw in range(KSIZE):
            t = dh * KSIZE + dw
            for i in range(oh):
                for j in range(ow):
                    sel[t, i * ow + j,
                        (STRIDE * i + dh) * w_in + (STRIDE * j + dw)] = 1.0
    return jnp.asarray(sel)


def prepare_encoder(params, in_hw):
    """Spectral-norm SVD, matmul layouts and gather matrices — computed once."""
    # Conv biases are intentionally ignored: InstanceNorm2d(affine=False)
    # subtracts the per-channel spatial mean right after, so they cancel exactly.
    (w1, _b1), (w2, _b2), (w3, _b3) = params
    H, W = in_hw
    oh1, ow1 = _out_hw(H, W)
    oh2, ow2 = _out_hw(oh1, ow1)

    prep = {
        "w1": _weight_to_im2col_mat(_spectral_normalize(w1)).astype(jnp.bfloat16),
        "w2": _weight_to_taps(_spectral_normalize(w2)).astype(jnp.bfloat16),
        "w3": _weight_to_taps(_spectral_normalize(w3)).astype(jnp.bfloat16),
        "sel2": _make_sel(oh1, ow1).astype(jnp.bfloat16),
        "sel3": _make_sel(oh2, ow2).astype(jnp.bfloat16),
    }
    return prep


# ----------------------------------------------------------------------------
# Forward pass
# ----------------------------------------------------------------------------
def _im2col(x_nhwc):
    """Layer-1 im2col: (B, H, W, C) -> (B, OH*OW, 9*C), K order (kh, kw, cin)."""
    B, H, W, C = x_nhwc.shape
    OH, OW = _out_hw(H, W)
    taps = []
    for dh in range(KSIZE):
        for dw in range(KSIZE):
            taps.append(x_nhwc[:, dh:dh + STRIDE * OH:STRIDE,
                               dw:dw + STRIDE * OW:STRIDE, :])
    p = jnp.stack(taps, axis=3)                       # (B, OH, OW, 9, C)
    return p.reshape(B, OH * OW, KSIZE * KSIZE * C)


@jax.jit
def encoder_forward(x_nchw, prep):
    """Reproduces Encoder.forward. Input/output: NCHW float32."""
    B, _, H, W = x_nchw.shape
    oh1, ow1 = _out_hw(H, W)
    oh2, ow2 = _out_hw(oh1, ow1)
    oh3, ow3 = _out_hw(oh2, ow2)

    x = jnp.transpose(x_nchw, (0, 2, 3, 1)).astype(jnp.float32)      # -> NHWC
    patches1 = _im2col(x).astype(jnp.bfloat16)                       # (B, P1, K1)

    out = _encoder_pallas(patches1, prep["w1"], prep["sel2"], prep["w2"],
                          prep["sel3"], prep["w3"])                  # (B, P3, 256)
    C3 = out.shape[-1]
    return jnp.transpose(out.reshape(B, oh3, ow3, C3), (0, 3, 1, 2))  # -> NCHW


# ----------------------------------------------------------------------------
def init_encoder_params(key, in_channels=5):
    """Deterministic synthetic parameters (same shapes as the PyTorch module)."""
    dims = [(64, in_channels), (128, 64), (256, 128)]
    params = []
    for i, (co, ci) in enumerate(dims):
        kw_key, kb_key = jax.random.split(jax.random.fold_in(key, i))
        w = jax.random.normal(kw_key, (co, ci, 3, 3), jnp.float32) * 0.1
        b = jax.random.normal(kb_key, (co,), jnp.float32) * 0.05  # cancels under IN
        params.append((w, b))
    return params


if __name__ == "__main__":
    key = jax.random.PRNGKey(0)
    in_channels = 5
    B, H, W = 2, 32, 32                     # 32 -> 15 -> 7 -> 3 spatial

    x = jax.random.normal(jax.random.fold_in(key, 123),
                          (B, in_channels, H, W), jnp.float32)
    params = init_encoder_params(jax.random.fold_in(key, 7), in_channels)
    prep = prepare_encoder(params, (H, W))   # hoisted: SVD + layout, done once

    out = encoder_forward(x, prep)
    out = jax.block_until_ready(out)

    assert out.shape == (B, 256, 3, 3), out.shape
    assert bool(jnp.all(jnp.isfinite(out)))
    assert bool(jnp.all(out >= 0.0))        # ReLU output is non-negative
    print("KERNEL_OK")
</pallas_src>

<mosaic_0001>
module attributes {stable_mosaic.version = 11 : i64} {
  func.func @_encoder_kernel(%arg0: i32, %arg1: memref<1x225x45xbf16, #tpu.memory_space<vmem>>, %arg2: memref<45x64xbf16, #tpu.memory_space<vmem>>, %arg3: memref<9x49x225xbf16, #tpu.memory_space<vmem>>, %arg4: memref<9x64x128xbf16, #tpu.memory_space<vmem>>, %arg5: memref<9x9x49xbf16, #tpu.memory_space<vmem>>, %arg6: memref<9x128x256xbf16, #tpu.memory_space<vmem>>, %arg7: memref<1x9x256xf32, #tpu.memory_space<vmem>>) attributes {dimension_semantics = [#tpu.dimension_semantics<parallel>], iteration_bounds = array<i64: 2>, scalar_prefetch = 0 : i64, scratch_operands = 0 : i64, tpu.core_type = #tpu.core_type<tc>, window_params = [{transform_indices = @transform_0, window_bounds = array<i64: 1, 225, 45>}, {pipeline_mode = #tpu.pipeline_mode<synchronous>, transform_indices = @transform_1, window_bounds = array<i64: 45, 64>}, {pipeline_mode = #tpu.pipeline_mode<synchronous>, transform_indices = @transform_2, window_bounds = array<i64: 9, 49, 225>}, {pipeline_mode = #tpu.pipeline_mode<synchronous>, transform_indices = @transform_3, window_bounds = array<i64: 9, 64, 128>}, {pipeline_mode = #tpu.pipeline_mode<synchronous>, transform_indices = @transform_4, window_bounds = array<i64: 9, 9, 49>}, {pipeline_mode = #tpu.pipeline_mode<synchronous>, transform_indices = @transform_5, window_bounds = array<i64: 9, 128, 256>}, {transform_indices = @transform_6, window_bounds = array<i64: 1, 9, 256>}]} {
    %c0 = arith.constant 0 : index
    %c0_0 = arith.constant 0 : index
    %c0_1 = arith.constant 0 : index
    %0 = vector.load %arg1[%c0, %c0_0, %c0_1] : memref<1x225x45xbf16, #tpu.memory_space<vmem>>, vector<1x225x45xbf16>
    %1 = vector.shape_cast %0 : vector<1x225x45xbf16> to vector<225x45xbf16>
    %c0_2 = arith.constant 0 : index
    %c0_3 = arith.constant 0 : index
    %2 = vector.load %arg2[%c0_2, %c0_3] : memref<45x64xbf16, #tpu.memory_space<vmem>>, vector<45x64xbf16>
    %cst = arith.constant dense<0.000000e+00> : vector<225x64xf32>
    %3 = tpu.matmul %1, %2, %cst {dimension_numbers = #tpu.dot_dimension_numbers<[1], [0], [0], [1], [0, 0, 1, 1], [], []>} : vector<225x45xbf16>, vector<45x64xbf16>, vector<225x64xf32> -> vector<225x64xf32>
    %cst_4 = arith.constant dense<0.000000e+00> : vector<64xf32>
    %4 = vector.multi_reduction <add>, %3, %cst_4 [0] : vector<225x64xf32> to vector<64xf32>
    %5 = vector.shape_cast %4 : vector<64xf32> to vector<1x64xf32>
    %cst_5 = arith.constant 2.250000e+02 : f32
    %6 = vector.broadcast %cst_5 : f32 to vector<1x64xf32>
    %7 = arith.divf %5, %6 : vector<1x64xf32>
    %8 = arith.mulf %3, %3 : vector<225x64xf32>
    %cst_6 = arith.constant dense<0.000000e+00> : vector<64xf32>
    %9 = vector.multi_reduction <add>, %8, %cst_6 [0] : vector<225x64xf32> to vector<64xf32>
    %10 = vector.shape_cast %9 : vector<64xf32> to vector<1x64xf32>
    %cst_7 = arith.constant 2.250000e+02 : f32
    %11 = vector.broadcast %cst_7 : f32 to vector<1x64xf32>
    %12 = arith.divf %10, %11 : vector<1x64xf32>
    %13 = arith.mulf %7, %7 : vector<1x64xf32>
    %14 = arith.subf %12, %13 : vector<1x64xf32>
    %cst_8 = arith.constant 0.000000e+00 : f32
    %15 = vector.broadcast %cst_8 : f32 to vector<1x64xf32>
    %16 = arith.maximumf %14, %15 : vector<1x64xf32>
    %17 = vector.broadcast %7 : vector<1x64xf32> to vector<225x64xf32>
    %18 = arith.subf %3, %17 : vector<225x64xf32>
    %cst_9 = arith.constant 9.99999974E-6 : f32
    %19 = vector.broadcast %cst_9 : f32 to vector<1x64xf32>
    %20 = arith.addf %16, %19 : vector<1x64xf32>
    %21 = math.rsqrt %20 : vector<1x64xf32>
    %22 = vector.broadcast %21 : vector<1x64xf32> to vector<225x64xf32>
    %23 = arith.mulf %18, %22 : vector<225x64xf32>
    %cst_10 = arith.constant 0.000000e+00 : f32
    %24 = vector.broadcast %cst_10 : f32 to vector<225x64xf32>
    %25 = arith.maximumf %23, %24 : vector<225x64xf32>
    %26 = arith.truncf %25 : vector<225x64xf32> to vector<225x64xbf16>
    %c0_11 = arith.constant 0 : index
    %c0_12 = arith.constant 0 : index
    %c0_13 = arith.constant 0 : index
    %27 = vector.load %arg3[%c0_11, %c0_12, %c0_13] : memref<9x49x225xbf16, #tpu.memory_space<vmem>>, vector<1x49x225xbf16>
    %28 = vector.shape_cast %27 : vector<1x49x225xbf16> to vector<49x225xbf16>
    %cst_14 = arith.constant dense<0.000000e+00> : vector<49x64xf32>
    %29 = tpu.matmul %28, %26, %cst_14 {dimension_numbers = #tpu.dot_dimension_numbers<[1], [0], [0], [1], [0, 0, 1, 1], [], []>} : vector<49x225xbf16>, vector<225x64xbf16>, vector<49x64xf32> -> vector<49x64xf32>
    %30 = arith.truncf %29 : vector<49x64xf32> to vector<49x64xbf16>
    %c0_15 = arith.constant 0 : index
    %c0_16 = arith.constant 0 : index
    %c0_17 = arith.constant 0 : index
    %31 = vector.load %arg4[%c0_15, %c0_16, %c0_17] : memref<9x64x128xbf16, #tpu.memory_space<vmem>>, vector<1x64x128xbf16>
    %32 = vector.shape_cast %31 : vector<1x64x128xbf16> to vector<64x128xbf16>
    %cst_18 = arith.constant dense<0.000000e+00> : vector<49x128xf32>
    %33 = tpu.matmul %30, %32, %cst_18 {dimension_numbers = #tpu.dot_dimension_numbers<[1], [0], [0], [1], [0, 0, 1, 1], [], []>} : vector<49x64xbf16>, vector<64x128xbf16>, vector<49x128xf32> -> vector<49x128xf32>
    %c1 = arith.constant 1 : index
    %c0_19 = arith.constant 0 : index
    %c0_20 = arith.constant 0 : index
    %34 = vector.load %arg3[%c1, %c0_19, %c0_20] : memref<9x49x225xbf16, #tpu.memory_space<vmem>>, vector<1x49x225xbf16>
    %35 = vector.shape_cast %34 : vector<1x49x225xbf16> to vector<49x225xbf16>
    %cst_21 = arith.constant dense<0.000000e+00> : vector<49x64xf32>
    %36 = tpu.matmul %35, %26, %cst_21 {dimension_numbers = #tpu.dot_dimension_numbers<[1], [0], [0], [1], [0, 0, 1, 1], [], []>} : vector<49x225xbf16>, vector<225x64xbf16>, vector<49x64xf32> -> vector<49x64xf32>
    %37 = arith.truncf %36 : vector<49x64xf32> to vector<49x64xbf16>
    %c1_22 = arith.constant 1 : index
    %c0_23 = arith.constant 0 : index
    %c0_24 = arith.constant 0 : index
    %38 = vector.load %arg4[%c1_22, %c0_23, %c0_24] : memref<9x64x128xbf16, #tpu.memory_space<vmem>>, vector<1x64x128xbf16>
    %39 = vector.shape_cast %38 : vector<1x64x128xbf16> to vector<64x128xbf16>
    %cst_25 = arith.constant dense<0.000000e+00> : vector<49x128xf32>
    %40 = tpu.matmul %37, %39, %cst_25 {dimension_numbers = #tpu.dot_dimension_numbers<[1], [0], [0], [1], [0, 0, 1, 1], [], []>} : vector<49x64xbf16>, vector<64x128xbf16>, vector<49x128xf32> -> vector<49x128xf32>
    %41 = arith.addf %33, %40 : vector<49x128xf32>
    %c2 = arith.constant 2 : index
    %c0_26 = arith.constant 0 : index
    %c0_27 = arith.constant 0 : index
    %42 = vector.load %arg3[%c2, %c0_26, %c0_27] : memref<9x49x225xbf16, #tpu.memory_space<vmem>>, vector<1x49x225xbf16>
    %43 = vector.shape_cast %42 : vector<1x49x225xbf16> to vector<49x225xbf16>
    %cst_28 = arith.constant dense<0.000000e+00> : vector<49x64xf32>
    %44 = tpu.matmul %43, %26, %cst_28 {dimension_numbers = #tpu.dot_dimension_numbers<[1], [0], [0], [1], [0, 0, 1, 1], [], []>} : vector<49x225xbf16>, vector<225x64xbf16>, vector<49x64xf32> -> vector<49x64xf32>
    %45 = arith.truncf %44 : vector<49x64xf32> to vector<49x64xbf16>
    %c2_29 = arith.constant 2 : index
    %c0_30 = arith.constant 0 : index
    %c0_31 = arith.constant 0 : index
    %46 = vector.load %arg4[%c2_29, %c0_30, %c0_31] : memref<9x64x128xbf16, #tpu.memory_space<vmem>>, vector<1x64x128xbf16>
    %47 = vector.shape_cast %46 : vector<1x64x128xbf16> to vector<64x128xbf16>
    %cst_32 = arith.constant dense<0.000000e+00> : vector<49x128xf32>
    %48 = tpu.matmul %45, %47, %cst_32 {dimension_numbers = #tpu.dot_dimension_numbers<[1], [0], [0], [1], [0, 0, 1, 1], [], []>} : vector<49x64xbf16>, vector<64x128xbf16>, vector<49x128xf32> -> vector<49x128xf32>
    %49 = arith.addf %41, %48 : vector<49x128xf32>
    %c3 = arith.constant 3 : index
    %c0_33 = arith.constant 0 : index
    %c0_34 = arith.constant 0 : index
    %50 = vector.load %arg3[%c3, %c0_33, %c0_34] : memref<9x49x225xbf16, #tpu.memory_space<vmem>>, vector<1x49x225xbf16>
    %51 = vector.shape_cast %50 : vector<1x49x225xbf16> to vector<49x225xbf16>
    %cst_35 = arith.constant dense<0.000000e+00> : vector<49x64xf32>
    %52 = tpu.matmul %51, %26, %cst_35 {dimension_numbers = #tpu.dot_dimension_numbers<[1], [0], [0], [1], [0, 0, 1, 1], [], []>} : vector<49x225xbf16>, vector<225x64xbf16>, vector<49x64xf32> -> vector<49x64xf32>
    %53 = arith.truncf %52 : vector<49x64xf32> to vector<49x64xbf16>
    %c3_36 = arith.constant 3 : index
    %c0_37 = arith.constant 0 : index
    %c0_38 = arith.constant 0 : index
    %54 = vector.load %arg4[%c3_36, %c0_37, %c0_38] : memref<9x64x128xbf16, #tpu.memory_space<vmem>>, vector<1x64x128xbf16>
    %55 = vector.shape_cast %54 : vector<1x64x128xbf16> to vector<64x128xbf16>
    %cst_39 = arith.constant dense<0.000000e+00> : vector<49x128xf32>
    %56 = tpu.matmul %53, %55, %cst_39 {dimension_numbers = #tpu.dot_dimension_numbers<[1], [0], [0], [1], [0, 0, 1, 1], [], []>} : vector<49x64xbf16>, vector<64x128xbf16>, vector<49x128xf32> -> vector<49x128xf32>
    %57 = arith.addf %49, %56 : vector<49x128xf32>
    %c4 = arith.constant 4 : index
    %c0_40 = arith.constant 0 : index
    %c0_41 = arith.constant 0 : index
    %58 = vector.load %arg3[%c4, %c0_40, %c0_41] : memref<9x49x225xbf16, #tpu.memory_space<vmem>>, vector<1x49x225xbf16>
    %59 = vector.shape_cast %58 : vector<1x49x225xbf16> to vector<49x225xbf16>
    %cst_42 = arith.constant dense<0.000000e+00> : vector<49x64xf32>
    %60 = tpu.matmul %59, %26, %cst_42 {dimension_numbers = #tpu.dot_dimension_numbers<[1], [0], [0], [1], [0, 0, 1, 1], [], []>} : vector<49x225xbf16>, vector<225x64xbf16>, vector<49x64xf32> -> vector<49x64xf32>
    %61 = arith.truncf %60 : vector<49x64xf32> to vector<49x64xbf16>
    %c4_43 = arith.constant 4 : index
    %c0_44 = arith.constant 0 : index
    %c0_45 = arith.constant 0 : index
    %62 = vector.load %arg4[%c4_43, %c0_44, %c0_45] : memref<9x64x128xbf16, #tpu.memory_space<vmem>>, vector<1x64x128xbf16>
    %63 = vector.shape_cast %62 : vector<1x64x128xbf16> to vector<64x128xbf16>
    %cst_46 = arith.constant dense<0.000000e+00> : vector<49x128xf32>
    %64 = tpu.matmul %61, %63, %cst_46 {dimension_numbers = #tpu.dot_dimension_numbers<[1], [0], [0], [1], [0, 0, 1, 1], [], []>} : vector<49x64xbf16>, vector<64x128xbf16>, vector<49x128xf32> -> vector<49x128xf32>
    %65 = arith.addf %57, %64 : vector<49x128xf32>
    %c5 = arith.constant 5 : index
    %c0_47 = arith.constant 0 : index
    %c0_48 = arith.constant 0 : index
    %66 = vector.load %arg3[%c5, %c0_47, %c0_48] : memref<9x49x225xbf16, #tpu.memory_space<vmem>>, vector<1x49x225xbf16>
    %67 = vector.shape_cast %66 : vector<1x49x225xbf16> to vector<49x225xbf16>
    %cst_49 = arith.constant dense<0.000000e+00> : vector<49x64xf32>
    %68 = tpu.matmul %67, %26, %cst_49 {dimension_numbers = #tpu.dot_dimension_numbers<[1], [0], [0], [1], [0, 0, 1, 1], [], []>} : vector<49x225xbf16>, vector<225x64xbf16>, vector<49x64xf32> -> vector<49x64xf32>
    %69 = arith.truncf %68 : vector<49x64xf32> to vector<49x64xbf16>
    %c5_50 = arith.constant 5 : index
    %c0_51 = arith.constant 0 : index
    %c0_52 = arith.constant 0 : index
    %70 = vector.load %arg4[%c5_50, %c0_51, %c0_52] : memref<9x64x128xbf16, #tpu.memory_space<vmem>>, vector<1x64x128xbf16>
    %71 = vector.shape_cast %70 : vector<1x64x128xbf16> to vector<64x128xbf16>
    %cst_53 = arith.constant dense<0.000000e+00> : vector<49x128xf32>
    %72 = tpu.matmul %69, %71, %cst_53 {dimension_numbers = #tpu.dot_dimension_numbers<[1], [0], [0], [1], [0, 0, 1, 1], [], []>} : vector<49x64xbf16>, vector<64x128xbf16>, vector<49x128xf32> -> vector<49x128xf32>
    %73 = arith.addf %65, %72 : vector<49x128xf32>
    %c6 = arith.constant 6 : index
    %c0_54 = arith.constant 0 : index
    %c0_55 = arith.constant 0 : index
    %74 = vector.load %arg3[%c6, %c0_54, %c0_55] : memref<9x49x225xbf16, #tpu.memory_space<vmem>>, vector<1x49x225xbf16>
    %75 = vector.shape_cast %74 : vector<1x49x225xbf16> to vector<49x225xbf16>
    %cst_56 = arith.constant dense<0.000000e+00> : vector<49x64xf32>
    %76 = tpu.matmul %75, %26, %cst_56 {dimension_numbers = #tpu.dot_dimension_numbers<[1], [0], [0], [1], [0, 0, 1, 1], [], []>} : vector<49x225xbf16>, vector<225x64xbf16>, vector<49x64xf32> -> vector<49x64xf32>
    %77 = arith.truncf %76 : vector<49x64xf32> to vector<49x64xbf16>
    %c6_57 = arith.constant 6 : index
    %c0_58 = arith.constant 0 : index
    %c0_59 = arith.constant 0 : index
    %78 = vector.load %arg4[%c6_57, %c0_58, %c0_59] : memref<9x64x128xbf16, #tpu.memory_space<vmem>>, vector<1x64x128xbf16>
    %79 = vector.shape_cast %78 : vector<1x64x128xbf16> to vector<64x128xbf16>
    %cst_60 = arith.constant dense<0.000000e+00> : vector<49x128xf32>
    %80 = tpu.matmul %77, %79, %cst_60 {dimension_numbers = #tpu.dot_dimension_numbers<[1], [0], [0], [1], [0, 0, 1, 1], [], []>} : vector<49x64xbf16>, vector<64x128xbf16>, vector<49x128xf32> -> vector<49x128xf32>
    %81 = arith.addf %73, %80 : vector<49x128xf32>
    %c7 = arith.constant 7 : index
    %c0_61 = arith.constant 0 : index
    %c0_62 = arith.constant 0 : index
    %82 = vector.load %arg3[%c7, %c0_61, %c0_62] : memref<9x49x225xbf16, #tpu.memory_space<vmem>>, vector<1x49x225xbf16>
    %83 = vector.shape_cast %82 : vector<1x49x225xbf16> to vector<49x225xbf16>
    %cst_63 = arith.constant dense<0.000000e+00> : vector<49x64xf32>
    %84 = tpu.matmul %83, %26, %cst_63 {dimension_numbers = #tpu.dot_dimension_numbers<[1], [0], [0], [1], [0, 0, 1, 1], [], []>} : vector<49x225xbf16>, vector<225x64xbf16>, vector<49x64xf32> -> vector<49x64xf32>
    %85 = arith.truncf %84 : vector<49x64xf32> to vector<49x64xbf16>
    %c7_64 = arith.constant 7 : index
    %c0_65 = arith.constant 0 : index
    %c0_66 = arith.constant 0 : index
    %86 = vector.load %arg4[%c7_64, %c0_65, %c0_66] : memref<9x64x128xbf16, #tpu.memory_space<vmem>>, vector<1x64x128xbf16>
    %87 = vector.shape_cast %86 : vector<1x64x128xbf16> to vector<64x128xbf16>
    %cst_67 = arith.constant dense<0.000000e+00> : vector<49x128xf32>
    %88 = tpu.matmul %85, %87, %cst_67 {dimension_numbers = #tpu.dot_dimension_numbers<[1], [0], [0], [1], [0, 0, 1, 1], [], []>} : vector<49x64xbf16>, vector<64x128xbf16>, vector<49x128xf32> -> vector<49x128xf32>
    %89 = arith.addf %81, %88 : vector<49x128xf32>
    %c8 = arith.constant 8 : index
    %c0_68 = arith.constant 0 : index
    %c0_69 = arith.constant 0 : index
    %90 = vector.load %arg3[%c8, %c0_68, %c0_69] : memref<9x49x225xbf16, #tpu.memory_space<vmem>>, vector<1x49x225xbf16>
    %91 = vector.shape_cast %90 : vector<1x49x225xbf16> to vector<49x225xbf16>
    %cst_70 = arith.constant dense<0.000000e+00> : vector<49x64xf32>
    %92 = tpu.matmul %91, %26, %cst_70 {dimension_numbers = #tpu.dot_dimension_numbers<[1], [0], [0], [1], [0, 0, 1, 1], [], []>} : vector<49x225xbf16>, vector<225x64xbf16>, vector<49x64xf32> -> vector<49x64xf32>
    %93 = arith.truncf %92 : vector<49x64xf32> to vector<49x64xbf16>
    %c8_71 = arith.constant 8 : index
    %c0_72 = arith.constant 0 : index
    %c0_73 = arith.constant 0 : index
    %94 = vector.load %arg4[%c8_71, %c0_72, %c0_73] : memref<9x64x128xbf16, #tpu.memory_space<vmem>>, vector<1x64x128xbf16>
    %95 = vector.shape_cast %94 : vector<1x64x128xbf16> to vector<64x128xbf16>
    %cst_74 = arith.constant dense<0.000000e+00> : vector<49x128xf32>
    %96 = tpu.matmul %93, %95, %cst_74 {dimension_numbers = #tpu.dot_dimension_numbers<[1], [0], [0], [1], [0, 0, 1, 1], [], []>} : vector<49x64xbf16>, vector<64x128xbf16>, vector<49x128xf32> -> vector<49x128xf32>
    %97 = arith.addf %89, %96 : vector<49x128xf32>
    %cst_75 = arith.constant dense<0.000000e+00> : vector<128xf32>
    %98 = vector.multi_reduction <add>, %97, %cst_75 [0] : vector<49x128xf32> to vector<128xf32>
    %99 = vector.shape_cast %98 : vector<128xf32> to vector<1x128xf32>
    %cst_76 = arith.constant 4.900000e+01 : f32
    %100 = vector.broadcast %cst_76 : f32 to vector<1x128xf32>
    %101 = arith.divf %99, %100 : vector<1x128xf32>
    %102 = arith.mulf %97, %97 : vector<49x128xf32>
    %cst_77 = arith.constant dense<0.000000e+00> : vector<128xf32>
    %103 = vector.multi_reduction <add>, %102, %cst_77 [0] : vector<49x128xf32> to vector<128xf32>
    %104 = vector.shape_cast %103 : vector<128xf32> to vector<1x128xf32>
    %cst_78 = arith.constant 4.900000e+01 : f32
    %105 = vector.broadcast %cst_78 : f32 to vector<1x128xf32>
    %106 = arith.divf %104, %105 : vector<1x128xf32>
    %107 = arith.mulf %101, %101 : vector<1x128xf32>
    %108 = arith.subf %106, %107 : vector<1x128xf32>
    %cst_79 = arith.constant 0.000000e+00 : f32
    %109 = vector.broadcast %cst_79 : f32 to vector<1x128xf32>
    %110 = arith.maximumf %108, %109 : vector<1x128xf32>
    %111 = vector.broadcast %101 : vector<1x128xf32> to vector<49x128xf32>
    %112 = arith.subf %97, %111 : vector<49x128xf32>
    %cst_80 = arith.constant 9.99999974E-6 : f32
    %113 = vector.broadcast %cst_80 : f32 to vector<1x128xf32>
    %114 = arith.addf %110, %113 : vector<1x128xf32>
    %115 = math.rsqrt %114 : vector<1x128xf32>
    %116 = vector.broadcast %115 : vector<1x128xf32> to vector<49x128xf32>
    %117 = arith.mulf %112, %116 : vector<49x128xf32>
    %cst_81 = arith.constant 0.000000e+00 : f32
    %118 = vector.broadcast %cst_81 : f32 to vector<49x128xf32>
    %119 = arith.maximumf %117, %118 : vector<49x128xf32>
    %120 = arith.truncf %119 : vector<49x128xf32> to vector<49x128xbf16>
    %c0_82 = arith.constant 0 : index
    %c0_83 = arith.constant 0 : index
    %c0_84 = arith.constant 0 : index
    %121 = vector.load %arg5[%c0_82, %c0_83, %c0_84] : memref<9x9x49xbf16, #tpu.memory_space<vmem>>, vector<1x9x49xbf16>
    %122 = vector.shape_cast %121 : vector<1x9x49xbf16> to vector<9x49xbf16>
    %cst_85 = arith.constant dense<0.000000e+00> : vector<9x128xf32>
    %123 = tpu.matmul %122, %120, %cst_85 {dimension_numbers = #tpu.dot_dimension_numbers<[1], [0], [0], [1], [0, 0, 1, 1], [], []>} : vector<9x49xbf16>, vector<49x128xbf16>, vector<9x128xf32> -> vector<9x128xf32>
    %124 = arith.truncf %123 : vector<9x128xf32> to vector<9x128xbf16>
    %c0_86 = arith.constant 0 : index
    %c0_87 = arith.constant 0 : index
    %c0_88 = arith.constant 0 : index
    %125 = vector.load %arg6[%c0_86, %c0_87, %c0_88] : memref<9x128x256xbf16, #tpu.memory_space<vmem>>, vector<1x128x256xbf16>
    %126 = vector.shape_cast %125 : vector<1x128x256xbf16> to vector<128x256xbf16>
    %cst_89 = arith.constant dense<0.000000e+00> : vector<9x256xf32>
    %127 = tpu.matmul %124, %126, %cst_89 {dimension_numbers = #tpu.dot_dimension_numbers<[1], [0], [0], [1], [0, 0, 1, 1], [], []>} : vector<9x128xbf16>, vector<128x256xbf16>, vector<9x256xf32> -> vector<9x256xf32>
    %c1_90 = arith.constant 1 : index
    %c0_91 = arith.constant 0 : index
    %c0_92 = arith.constant 0 : index
    %128 = vector.load %arg5[%c1_90, %c0_91, %c0_92] : memref<9x9x49xbf16, #tpu.memory_space<vmem>>, vector<1x9x49xbf16>
    %129 = vector.shape_cast %128 : vector<1x9x49xbf16> to vector<9x49xbf16>
    %cst_93 = arith.constant dense<0.000000e+00> : vector<9x128xf32>
    %130 = tpu.matmul %129, %120, %cst_93 {dimension_numbers = #tpu.dot_dimension_numbers<[1], [0], [0], [1], [0, 0, 1, 1], [], []>} : vector<9x49xbf16>, vector<49x128xbf16>, vector<9x128xf32> -> vector<9x128xf32>
    %131 = arith.truncf %130 : vector<9x128xf32> to vector<9x128xbf16>
    %c1_94 = arith.constant 1 : index
    %c0_95 = arith.constant 0 : index
    %c0_96 = arith.constant 0 : index
    %132 = vector.load %arg6[%c1_94, %c0_95, %c0_96] : memref<9x128x256xbf16, #tpu.memory_space<vmem>>, vector<1x128x256xbf16>
    %133 = vector.shape_cast %132 : vector<1x128x256xbf16> to vector<128x256xbf16>
    %cst_97 = arith.constant dense<0.000000e+00> : vector<9x256xf32>
    %134 = tpu.matmul %131, %133, %cst_97 {dimension_numbers = #tpu.dot_dimension_numbers<[1], [0], [0], [1], [0, 0, 1, 1], [], []>} : vector<9x128xbf16>, vector<128x256xbf16>, vector<9x256xf32> -> vector<9x256xf32>
    %135 = arith.addf %127, %134 : vector<9x256xf32>
    %c2_98 = arith.constant 2 : index
    %c0_99 = arith.constant 0 : index
    %c0_100 = arith.constant 0 : index
    %136 = vector.load %arg5[%c2_98, %c0_99, %c0_100] : memref<9x9x49xbf16, #tpu.memory_space<vmem>>, vector<1x9x49xbf16>
    %137 = vector.shape_cast %136 : vector<1x9x49xbf16> to vector<9x49xbf16>
    %cst_101 = arith.constant dense<0.000000e+00> : vector<9x128xf32>
    %138 = tpu.matmul %137, %120, %cst_101 {dimension_numbers = #tpu.dot_dimension_numbers<[1], [0], [0], [1], [0, 0, 1, 1], [], []>} : vector<9x49xbf16>, vector<49x128xbf16>, vector<9x128xf32> -> vector<9x128xf32>
    %139 = arith.truncf %138 : vector<9x128xf32> to vector<9x128xbf16>
    %c2_102 = arith.constant 2 : index
    %c0_103 = arith.constant 0 : index
    %c0_104 = arith.constant 0 : index
    %140 = vector.load %arg6[%c2_102, %c0_103, %c0_104] : memref<9x128x256xbf16, #tpu.memory_space<vmem>>, vector<1x128x256xbf16>
    %141 = vector.shape_cast %140 : vector<1x128x256xbf16> to vector<128x256xbf16>
    %cst_105 = arith.constant dense<0.000000e+00> : vector<9x256xf32>
    %142 = tpu.matmul %139, %141, %cst_105 {dimension_numbers = #tpu.dot_dimension_numbers<[1], [0], [0], [1], [0, 0, 1, 1], [], []>} : vector<9x128xbf16>, vector<128x256xbf16>, vector<9x256xf32> -> vector<9x256xf32>
    %143 = arith.addf %135, %142 : vector<9x256xf32>
    %c3_106 = arith.constant 3 : index
    %c0_107 = arith.constant 0 : index
    %c0_108 = arith.constant 0 : index
    %144 = vector.load %arg5[%c3_106, %c0_107, %c0_108] : memref<9x9x49xbf16, #tpu.memory_space<vmem>>, vector<1x9x49xbf16>
    %145 = vector.shape_cast %144 : vector<1x9x49xbf16> to vector<9x49xbf16>
    %cst_109 = arith.constant dense<0.000000e+00> : vector<9x128xf32>
    %146 = tpu.matmul %145, %120, %cst_109 {dimension_numbers = #tpu.dot_dimension_numbers<[1], [0], [0], [1], [0, 0, 1, 1], [], []>} : vector<9x49xbf16>, vector<49x128xbf16>, vector<9x128xf32> -> vector<9x128xf32>
    %147 = arith.truncf %146 : vector<9x128xf32> to vector<9x128xbf16>
    %c3_110 = arith.constant 3 : index
    %c0_111 = arith.constant 0 : index
    %c0_112 = arith.constant 0 : index
    %148 = vector.load %arg6[%c3_110, %c0_111, %c0_112] : memref<9x128x256xbf16, #tpu.memory_space<vmem>>, vector<1x128x256xbf16>
    %149 = vector.shape_cast %148 : vector<1x128x256xbf16> to vector<128x256xbf16>
    %cst_113 = arith.constant dense<0.000000e+00> : vector<9x256xf32>
    %150 = tpu.matmul %147, %149, %cst_113 {dimension_numbers = #tpu.dot_dimension_numbers<[1], [0], [0], [1], [0, 0, 1, 1], [], []>} : vector<9x128xbf16>, vector<128x256xbf16>, vector<9x256xf32> -> vector<9x256xf32>
    %151 = arith.addf %143, %150 : vector<9x256xf32>
    %c4_114 = arith.constant 4 : index
    %c0_115 = arith.constant 0 : index
    %c0_116 = arith.constant 0 : index
    %152 = vector.load %arg5[%c4_114, %c0_115, %c0_116] : memref<9x9x49xbf16, #tpu.memory_space<vmem>>, vector<1x9x49xbf16>
    %153 = vector.shape_cast %152 : vector<1x9x49xbf16> to vector<9x49xbf16>
    %cst_117 = arith.constant dense<0.000000e+00> : vector<9x128xf32>
    %154 = tpu.matmul %153, %120, %cst_117 {dimension_numbers = #tpu.dot_dimension_numbers<[1], [0], [0], [1], [0, 0, 1, 1], [], []>} : vector<9x49xbf16>, vector<49x128xbf16>, vector<9x128xf32> -> vector<9x128xf32>
    %155 = arith.truncf %154 : vector<9x128xf32> to vector<9x128xbf16>
    %c4_118 = arith.constant 4 : index
    %c0_119 = arith.constant 0 : index
    %c0_120 = arith.constant 0 : index
    %156 = vector.load %arg6[%c4_118, %c0_119, %c0_120] : memref<9x128x256xbf16, #tpu.memory_space<vmem>>, vector<1x128x256xbf16>
    %157 = vector.shape_cast %156 : vector<1x128x256xbf16> to vector<128x256xbf16>
    %cst_121 = arith.constant dense<0.000000e+00> : vector<9x256xf32>
    %158 = tpu.matmul %155, %157, %cst_121 {dimension_numbers = #tpu.dot_dimension_numbers<[1], [0], [0], [1], [0, 0, 1, 1], [], []>} : vector<9x128xbf16>, vector<128x256xbf16>, vector<9x256xf32> -> vector<9x256xf32>
    %159 = arith.addf %151, %158 : vector<9x256xf32>
    %c5_122 = arith.constant 5 : index
    %c0_123 = arith.constant 0 : index
    %c0_124 = arith.constant 0 : index
    %160 = vector.load %arg5[%c5_122, %c0_123, %c0_124] : memref<9x9x49xbf16, #tpu.memory_space<vmem>>, vector<1x9x49xbf16>
    %161 = vector.shape_cast %160 : vector<1x9x49xbf16> to vector<9x49xbf16>
    %cst_125 = arith.constant dense<0.000000e+00> : vector<9x128xf32>
    %162 = tpu.matmul %161, %120, %cst_125 {dimension_numbers = #tpu.dot_dimension_numbers<[1], [0], [0], [1], [0, 0, 1, 1], [], []>} : vector<9x49xbf16>, vector<49x128xbf16>, vector<9x128xf32> -> vector<9x128xf32>
    %163 = arith.truncf %162 : vector<9x128xf32> to vector<9x128xbf16>
    %c5_126 = arith.constant 5 : index
    %c0_127 = arith.constant 0 : index
    %c0_128 = arith.constant 0 : index
    %164 = vector.load %arg6[%c5_126, %c0_127, %c0_128] : memref<9x128x256xbf16, #tpu.memory_space<vmem>>, vector<1x128x256xbf16>
    %165 = vector.shape_cast %164 : vector<1x128x256xbf16> to vector<128x256xbf16>
    %cst_129 = arith.constant dense<0.000000e+00> : vector<9x256xf32>
    %166 = tpu.matmul %163, %165, %cst_129 {dimension_numbers = #tpu.dot_dimension_numbers<[1], [0], [0], [1], [0, 0, 1, 1], [], []>} : vector<9x128xbf16>, vector<128x256xbf16>, vector<9x256xf32> -> vector<9x256xf32>
    %167 = arith.addf %159, %166 : vector<9x256xf32>
    %c6_130 = arith.constant 6 : index
    %c0_131 = arith.constant 0 : index
    %c0_132 = arith.constant 0 : index
    %168 = vector.load %arg5[%c6_130, %c0_131, %c0_132] : memref<9x9x49xbf16, #tpu.memory_space<vmem>>, vector<1x9x49xbf16>
    %169 = vector.shape_cast %168 : vector<1x9x49xbf16> to vector<9x49xbf16>
    %cst_133 = arith.constant dense<0.000000e+00> : vector<9x128xf32>
    %170 = tpu.matmul %169, %120, %cst_133 {dimension_numbers = #tpu.dot_dimension_numbers<[1], [0], [0], [1], [0, 0, 1, 1], [], []>} : vector<9x49xbf16>, vector<49x128xbf16>, vector<9x128xf32> -> vector<9x128xf32>
    %171 = arith.truncf %170 : vector<9x128xf32> to vector<9x128xbf16>
    %c6_134 = arith.constant 6 : index
    %c0_135 = arith.constant 0 : index
    %c0_136 = arith.constant 0 : index
    %172 = vector.load %arg6[%c6_134, %c0_135, %c0_136] : memref<9x128x256xbf16, #tpu.memory_space<vmem>>, vector<1x128x256xbf16>
    %173 = vector.shape_cast %172 : vector<1x128x256xbf16> to vector<128x256xbf16>
    %cst_137 = arith.constant dense<0.000000e+00> : vector<9x256xf32>
    %174 = tpu.matmul %171, %173, %cst_137 {dimension_numbers = #tpu.dot_dimension_numbers<[1], [0], [0], [1], [0, 0, 1, 1], [], []>} : vector<9x128xbf16>, vector<128x256xbf16>, vector<9x256xf32> -> vector<9x256xf32>
    %175 = arith.addf %167, %174 : vector<9x256xf32>
    %c7_138 = arith.constant 7 : index
    %c0_139 = arith.constant 0 : index
    %c0_140 = arith.constant 0 : index
    %176 = vector.load %arg5[%c7_138, %c0_139, %c0_140] : memref<9x9x49xbf16, #tpu.memory_space<vmem>>, vector<1x9x49xbf16>
    %177 = vector.shape_cast %176 : vector<1x9x49xbf16> to vector<9x49xbf16>
    %cst_141 = arith.constant dense<0.000000e+00> : vector<9x128xf32>
    %178 = tpu.matmul %177, %120, %cst_141 {dimension_numbers = #tpu.dot_dimension_numbers<[1], [0], [0], [1], [0, 0, 1, 1], [], []>} : vector<9x49xbf16>, vector<49x128xbf16>, vector<9x128xf32> -> vector<9x128xf32>
    %179 = arith.truncf %178 : vector<9x128xf32> to vector<9x128xbf16>
    %c7_142 = arith.constant 7 : index
    %c0_143 = arith.constant 0 : index
    %c0_144 = arith.constant 0 : index
    %180 = vector.load %arg6[%c7_142, %c0_143, %c0_144] : memref<9x128x256xbf16, #tpu.memory_space<vmem>>, vector<1x128x256xbf16>
    %181 = vector.shape_cast %180 : vector<1x128x256xbf16> to vector<128x256xbf16>
    %cst_145 = arith.constant dense<0.000000e+00> : vector<9x256xf32>
    %182 = tpu.matmul %179, %181, %cst_145 {dimension_numbers = #tpu.dot_dimension_numbers<[1], [0], [0], [1], [0, 0, 1, 1], [], []>} : vector<9x128xbf16>, vector<128x256xbf16>, vector<9x256xf32> -> vector<9x256xf32>
    %183 = arith.addf %175, %182 : vector<9x256xf32>
    %c8_146 = arith.constant 8 : index
    %c0_147 = arith.constant 0 : index
    %c0_148 = arith.constant 0 : index
    %184 = vector.load %arg5[%c8_146, %c0_147, %c0_148] : memref<9x9x49xbf16, #tpu.memory_space<vmem>>, vector<1x9x49xbf16>
    %185 = vector.shape_cast %184 : vector<1x9x49xbf16> to vector<9x49xbf16>
    %cst_149 = arith.constant dense<0.000000e+00> : vector<9x128xf32>
    %186 = tpu.matmul %185, %120, %cst_149 {dimension_numbers = #tpu.dot_dimension_numbers<[1], [0], [0], [1], [0, 0, 1, 1], [], []>} : vector<9x49xbf16>, vector<49x128xbf16>, vector<9x128xf32> -> vector<9x128xf32>
    %187 = arith.truncf %186 : vector<9x128xf32> to vector<9x128xbf16>
    %c8_150 = arith.constant 8 : index
    %c0_151 = arith.constant 0 : index
    %c0_152 = arith.constant 0 : index
    %188 = vector.load %arg6[%c8_150, %c0_151, %c0_152] : memref<9x128x256xbf16, #tpu.memory_space<vmem>>, vector<1x128x256xbf16>
    %189 = vector.shape_cast %188 : vector<1x128x256xbf16> to vector<128x256xbf16>
    %cst_153 = arith.constant dense<0.000000e+00> : vector<9x256xf32>
    %190 = tpu.matmul %187, %189, %cst_153 {dimension_numbers = #tpu.dot_dimension_numbers<[1], [0], [0], [1], [0, 0, 1, 1], [], []>} : vector<9x128xbf16>, vector<128x256xbf16>, vector<9x256xf32> -> vector<9x256xf32>
    %191 = arith.addf %183, %190 : vector<9x256xf32>
    %cst_154 = arith.constant dense<0.000000e+00> : vector<256xf32>
    %192 = vector.multi_reduction <add>, %191, %cst_154 [0] : vector<9x256xf32> to vector<256xf32>
    %193 = vector.shape_cast %192 : vector<256xf32> to vector<1x256xf32>
    %cst_155 = arith.constant 9.000000e+00 : f32
    %194 = vector.broadcast %cst_155 : f32 to vector<1x256xf32>
    %195 = arith.divf %193, %194 : vector<1x256xf32>
    %196 = arith.mulf %191, %191 : vector<9x256xf32>
    %cst_156 = arith.constant dense<0.000000e+00> : vector<256xf32>
    %197 = vector.multi_reduction <add>, %196, %cst_156 [0] : vector<9x256xf32> to vector<256xf32>
    %198 = vector.shape_cast %197 : vector<256xf32> to vector<1x256xf32>
    %cst_157 = arith.constant 9.000000e+00 : f32
    %199 = vector.broadcast %cst_157 : f32 to vector<1x256xf32>
    %200 = arith.divf %198, %199 : vector<1x256xf32>
    %201 = arith.mulf %195, %195 : vector<1x256xf32>
    %202 = arith.subf %200, %201 : vector<1x256xf32>
    %cst_158 = arith.constant 0.000000e+00 : f32
    %203 = vector.broadcast %cst_158 : f32 to vector<1x256xf32>
    %204 = arith.maximumf %202, %203 : vector<1x256xf32>
    %205 = vector.broadcast %195 : vector<1x256xf32> to vector<9x256xf32>
    %206 = arith.subf %191, %205 : vector<9x256xf32>
    %cst_159 = arith.constant 9.99999974E-6 : f32
    %207 = vector.broadcast %cst_159 : f32 to vector<1x256xf32>
    %208 = arith.addf %204, %207 : vector<1x256xf32>
    %209 = math.rsqrt %208 : vector<1x256xf32>
    %210 = vector.broadcast %209 : vector<1x256xf32> to vector<9x256xf32>
    %211 = arith.mulf %206, %210 : vector<9x256xf32>
    %cst_160 = arith.constant 0.000000e+00 : f32
    %212 = vector.broadcast %cst_160 : f32 to vector<9x256xf32>
    %213 = arith.maximumf %211, %212 : vector<9x256xf32>
    %c0_161 = arith.constant 0 : index
    %c0_162 = arith.constant 0 : index
    %c0_163 = arith.constant 0 : index
    %214 = vector.load %arg7[%c0_161, %c0_162, %c0_163] : memref<1x9x256xf32, #tpu.memory_space<vmem>>, vector<1x9x256xf32>
    %215 = vector.shape_cast %214 : vector<1x9x256xf32> to vector<9x256xf32>
    %216 = vector.shape_cast %213 : vector<9x256xf32> to vector<1x9x256xf32>
    tpu.vector_store %arg7[%c0_161, %c0_162, %c0_163], %216 {strides = array<i32>} : memref<1x9x256xf32, #tpu.memory_space<vmem>>, vector<1x9x256xf32>,
    return
  }
  func.func @transform_0(%arg0: i32) -> (i32, i32, i32) {
    %c0_i32 = arith.constant 0 : i32
    %c0_i32_0 = arith.constant 0 : i32
    %c0_i32_1 = arith.constant 0 : i32
    return %arg0, %c0_i32, %c0_i32_0 : i32, i32, i32
  }
  func.func @transform_1(%arg0: i32) -> (i32, i32) {
    %c0_i32 = arith.constant 0 : i32
    %c0_i32_0 = arith.constant 0 : i32
    %c0_i32_1 = arith.constant 0 : i32
    return %c0_i32, %c0_i32_0 : i32, i32
  }
  func.func @transform_2(%arg0: i32) -> (i32, i32, i32) {
    %c0_i32 = arith.constant 0 : i32
    %c0_i32_0 = arith.constant 0 : i32
    %c0_i32_1 = arith.constant 0 : i32
    %c0_i32_2 = arith.constant 0 : i32
    return %c0_i32, %c0_i32_0, %c0_i32_1 : i32, i32, i32
  }
  func.func @transform_3(%arg0: i32) -> (i32, i32, i32) {
    %c0_i32 = arith.constant 0 : i32
    %c0_i32_0 = arith.constant 0 : i32
    %c0_i32_1 = arith.constant 0 : i32
    %c0_i32_2 = arith.constant 0 : i32
    return %c0_i32, %c0_i32_0, %c0_i32_1 : i32, i32, i32
  }
  func.func @transform_4(%arg0: i32) -> (i32, i32, i32) {
    %c0_i32 = arith.constant 0 : i32
    %c0_i32_0 = arith.constant 0 : i32
    %c0_i32_1 = arith.constant 0 : i32
    %c0_i32_2 = arith.constant 0 : i32
    return %c0_i32, %c0_i32_0, %c0_i32_1 : i32, i32, i32
  }
  func.func @transform_5(%arg0: i32) -> (i32, i32, i32) {
    %c0_i32 = arith.constant 0 : i32
    %c0_i32_0 = arith.constant 0 : i32
    %c0_i32_1 = arith.constant 0 : i32
    %c0_i32_2 = arith.constant 0 : i32
    return %c0_i32, %c0_i32_0, %c0_i32_1 : i32, i32, i32
  }
  func.func @transform_6(%arg0: i32) -> (i32, i32, i32) {
    %c0_i32 = arith.constant 0 : i32
    %c0_i32_0 = arith.constant 0 : i32
    %c0_i32_1 = arith.constant 0 : i32
    return %arg0, %c0_i32, %c0_i32_0 : i32, i32, i32
  }
}

</mosaic_0001>

<bundles_post_ra>
// kernel: encoder_forward.1
= control target key start
LH: loop header
LB: loop body
LE: loop exit
PB: predicated region body
PF: predicated region fallthrough
CT: control target
= control target key end

     0   :  { %s6574_s21 = smov 0   ;;  %s8440_s0 = inlined_call_operand.vmem [shape: bf16[2,225,45], index: 0, kind: input, shape index: {}]   ;;  %s8441_s1 = inlined_call_operand.vmem [shape: bf16[45,64], index: 1, kind: input, shape index: {}]   ;;  %s8442_s2 = inlined_call_operand.vmem [shape: bf16[9,49,225], index: 2, kind: input, shape index: {}]   ;;  %s8443_s3 = inlined_call_operand.vmem [shape: bf16[9,64,128], index: 3, kind: input, shape index: {}]   ;;  %s8444_s4 = inlined_call_operand.vmem [shape: bf16[9,9,49], index: 4, kind: input, shape index: {}]   ;;  %s8445_s5 = inlined_call_operand.vmem [shape: bf16[9,128,256], index: 5, kind: input, shape index: {}]   ;;  %s8446_s6 = inlined_call_operand.vmem [shape: f32[2,9,256], index: 6, kind: output, shape index: {}]  }
   0x1 LB: > { %s4929_s22 = sadd.s32 4294967295, %s6533_s21   ;;  %p4933_p0 = scmp.ge.s32.totalorder %s6533_s21, 1  ;;  %s6533_s21 = sphi %s6574_s21, %s16_s21  }
   0x2   : > { %p212_p1 = scmp.lt.s32.totalorder %s6533_s21, 3 }
   0x4   : > { %p213_p2 = pnand %p4933_p0, %p212_p1 }
   0x5   : > { %v6141_v0 = vld [vmem:[%s8441_s1] sm:$0xff] (!%p213_p2)   ;;  %v6535_v1 = vmov (!%p213_p2), 0.0   ;;  %v6142_v2 = vld [vmem:[%s8441_s1 + $0x8] sm:$0xff] (!%p213_p2)   ;;  %vm424_vm0 = vcmask (!%p213_p2), 1045504   ;;  %v6143_v3 = vld [vmem:[%s8441_s1 + $0x10] sm:$0x7f] (!%p213_p2)  }
   0x6   : > { %216 = sbr.rel (%p213_p2) target bundleno = 2566 (0xa06), region = 44  ;;  %5714 = vmatprep.subr.bf16.mxu0 (!%p213_p2), %v6535_v1  ;;  %vm425_vm1 = vcmask (!%p213_p2), 1046528   ;;  %p242_p3 = scmp.lt.s32.totalorder (!%p213_p2), %s4929_s22, 1  ;;  %v6536_v4 = vmov (!%p213_p2), 65535   ;;  %vm6537_vm2 = vmmov (!%p213_p2), 0   ;;  %vm378_vm3 = vcmask (!%p213_p2), 367616  }
   0x7   : > { %5715 = vmatpush3.bf16.msra.mxu0 (!%p213_p2), %v6141_v0  ;;  %v426_v5 = vsel (!%p213_p2), %vm424_vm0, 4294967295, %v6536_v4  ;;  %5720 = vmatprep.mubr.msk.bf16.mxu0 (!%p213_p2), %vm6537_vm2, %v6535_v1  ;;  %vm583_vm4 = vcmask (!%p213_p2), 523264   ;;  %vm890_vm5 = vcmask (!%p213_p2), 793600   ;;  %vm639_vm6 = vcmask (!%p213_p2), 516096  }
   0x8   : > { %5716 = vmatprep.subr.bf16.mxu0 (!%p213_p2), %v6535_v1  ;;  %v427_v6 = vsel (!%p213_p2), %vm425_vm1, %v426_v5, 0  ;;  %vm903_vm7 = vcmask (!%p213_p2), 1040384   ;;  %vm3047_vm8 = vcmask (!%p213_p2), 400384  }
   0x9   : > { %v429_v7 = vand.u32 (!%p213_p2), %v6143_v3, %v427_v6  ;;  %v6538_v6 = vmov (!%p213_p2), 0  }
   0xa   : > { %1038 = vmatprep.subr.bf16.mxu1 (!%p213_p2), %v6538_v6 }
   0xb   : > { %5717 = vmatpush3.bf16.msra.mxu0 (!%p213_p2), %v6142_v2 }
   0xc   : > { %5718 = vmatprep.subr.bf16.mxu0 (!%p213_p2), %v6535_v1 }
   0xd   : > { %s8448_s22 = smov (!%p242_p3, %s4929_s22), 1 }
   0xe   : > { %s6128_s29 = smul.u32 116, %s8448_s22  ;;  %s5578_s7 = sshll.u32 %s8448_s22, 5 }
   0xf   : > { %5719 = vmatpush3.bf16.msra.mxu0 %v429_v7  ;;  %s251_s10 = scalar_lea.vmem %s8446_s6, %s5578_s7 }
  0x10   : > { %s6602_s8 = scalar_lea.vmem %s8440_s0, %s6128_s29  ;;  %909 = vmatprep.subr.bf16.mxu0 %v6538_v6 }
  0x11   : > { %v6144_v8 = vld [vmem:[%s6602_s8] sm:$0xff]   ;;  %v6145_v9 = vld [vmem:[%s6602_s8 + $0x8] sm:$0xff]   ;;  %v6146_v10 = vld [vmem:[%s6602_s8 + $0x10] sm:$0xff]  }
  0x12   : > { %5721 = vmatmul.mubr.msk.bf16.vlgmr.msra.gmra.mrb[0].mxu0 %vm378_vm3, %v6144_v8  ;;  %v6147_v11 = vld [vmem:[%s6602_s8 + $0x18] sm:$0xff]   ;;  %v6148_v12 = vld [vmem:[%s6602_s8 + $0x20] sm:$0xff]   ;;  %v6149_v13 = vld [vmem:[%s6602_s8 + $0x28] sm:$0xff]  }
  0x13   : > { %5724 = vmatprep.mubr.msk.bf16.mxu0 %vm6537_vm2, %v6535_v1  ;;  %v6150_v14 = vld [vmem:[%s6602_s8 + $0x30] sm:$0xff]   ;;  %v6151_v15 = vld [vmem:[%s6602_s8 + $0x38] sm:$0xff]   ;;  %v6152_v16 = vld [vmem:[%s6602_s8 + $0x40] sm:$0xff]  }
  0x14   : > { %v6153_v17 = vld [vmem:[%s6602_s8 + $0x48] sm:$0xff]   ;;  %v6154_v18 = vld [vmem:[%s6602_s8 + $0x50] sm:$0xff]   ;;  %v6155_v19 = vld [vmem:[%s6602_s8 + $0x58] sm:$0xff]  }
  0x15   : > { %v6156_v20 = vld [vmem:[%s6602_s8 + $0x60] sm:$0xff]   ;;  %v6157_v21 = vld [vmem:[%s6602_s8 + $0x68] sm:$0xff]   ;;  %v6158_v22 = vld [vmem:[%s6602_s8 + $0x70] ss:$0 sps:$4 sm:$0x11]  }
  0x1a   : > { %5725 = vmatmul.mubr.msk.bf16.gmra.mrb[4].mxu0 %vm378_vm3, %v6145_v9 }
  0x1b   : > { %5728 = vmatprep.mubr.msk.bf16.mxu0 %vm6537_vm2, %v6535_v1 }
  0x22   : > { %5729 = vmatmul.mubr.msk.bf16.gmra.mrb[8].mxu0 %vm378_vm3, %v6146_v10 }
  0x23   : > { %5732 = vmatprep.mubr.msk.bf16.mxu0 %vm6537_vm2, %v6535_v1 }
  0x2a   : > { %5733 = vmatmul.mubr.msk.bf16.gmra.mrb[12].mxu0 %vm378_vm3, %v6147_v11 }
  0x2b   : > { %5736 = vmatprep.mubr.msk.bf16.mxu0 %vm6537_vm2, %v6535_v1 }
  0x32   : > { %5737 = vmatmul.mubr.msk.bf16.gmra.mrb[16].mxu0 %vm378_vm3, %v6148_v12 }
  0x33   : > { %5740 = vmatprep.mubr.msk.bf16.mxu0 %vm6537_vm2, %v6535_v1 }
  0x3a   : > { %5741 = vmatmul.mubr.msk.bf16.gmra.mrb[20].mxu0 %vm378_vm3, %v6149_v13 }
  0x3b   : > { %5744 = vmatprep.mubr.msk.bf16.mxu0 %vm6537_vm2, %v6535_v1 }
  0x42   : > { %5745 = vmatmul.mubr.msk.bf16.gmra.mrb[24].mxu0 %vm378_vm3, %v6150_v14 }
  0x43   : > { %5748 = vmatprep.mubr.msk.bf16.mxu0 %vm6537_vm2, %v6535_v1 }
  0x4a   : > { %5749 = vmatmul.mubr.msk.bf16.gmra.mrb[28].mxu0 %vm378_vm3, %v6151_v15 }
  0x4b   : > { %5752 = vmatprep.mubr.msk.bf16.mxu0 %vm6537_vm2, %v6535_v1 }
  0x52   : > { %5753 = vmatmul.mubr.msk.bf16.gmra.mrb[32].mxu0 %vm378_vm3, %v6152_v16 }
  0x53   : > { %5756 = vmatprep.mubr.msk.bf16.mxu0 %vm6537_vm2, %v6535_v1 }
  0x5a   : > { %5757 = vmatmul.mubr.msk.bf16.gmra.mrb[36].mxu0 %vm378_vm3, %v6153_v17 }
  0x5b   : > { %5760 = vmatprep.mubr.msk.bf16.mxu0 %vm6537_vm2, %v6535_v1 }
  0x62   : > { %5761 = vmatmul.mubr.msk.bf16.gmra.mrb[40].mxu0 %vm378_vm3, %v6154_v18 }
  0x63   : > { %5764 = vmatprep.mubr.msk.bf16.mxu0 %vm6537_vm2, %v6535_v1 }
  0x6a   : > { %5765 = vmatmul.mubr.msk.bf16.gmra.mrb[44].mxu0 %vm378_vm3, %v6155_v19 }
  0x6b   : > { %5768 = vmatprep.mubr.msk.bf16.mxu0 %vm6537_vm2, %v6535_v1 }
  0x72   : > { %5769 = vmatmul.mubr.msk.bf16.gmra.mrb[48].mxu0 %vm378_vm3, %v6156_v20 }
  0x73   : > { %5772 = vmatprep.mubr.msk.bf16.mxu0 %vm6537_vm2, %v6535_v1 }
  0x7a   : > { %5773 = vmatmul.mubr.msk.bf16.gmra.mrb[52].mxu0 %vm378_vm3, %v6157_v21 }
  0x7b   : > { %5776 = vmatprep.mubr.msk.bf16.mxu0 %vm6537_vm2, %v6535_v1 }
  0x82   : > { %5777 = vmatmul.mubr.msk.bf16.gmra.mrb[56].mxu0 %vm378_vm3, %v6158_v22 }
  0xe5   : > { %v6662_v23 = vpop.f32.mrb[0].mxu0 }
  0xe6   : > { %v650_v24 = vmul.f32 %v6662_v23, %v6662_v23  ;;  %v5722_v25 = vpop.f32.mrb[1].mxu0  ;;  %v584_v27 = vsel %vm583_vm4, %v6662_v23, 0.0 }
  0xe7   : > { %v6666_v26 = vpop.f32.mrb[2].mxu0 }
  0xe8   : > { %v585_v28 = vsel %vm583_vm4, %v6666_v26, 0.0  ;;  %v651_v29 = vmul.f32 %v6666_v26, %v6666_v26  ;;  %v5723_v30 = vpop.f32.mrb[3].mxu0  ;;  %v679_v32 = vsel %vm583_vm4, %v650_v24, 0.0 }
  0xe9   : > { %v586_v31 = vadd.f32 %v585_v28, %v584_v27 }
  0xea   : > { %v680_v33 = vsel %vm583_vm4, %v651_v29, 0.0 }
  0xeb   : > { %v681_v34 = vadd.f32 %v680_v33, %v679_v32 }
  0xed   : > { %v6676_v35 = vpop.f32.mrb[4].mxu0 }
  0xee   : > { %v587_v36 = vsel %vm583_vm4, %v6676_v35, 0.0  ;;  %v652_v37 = vmul.f32 %v6676_v35, %v6676_v35  ;;  %v5726_v38 = vpop.f32.mrb[5].mxu0 }
  0xef   : > { %v588_v39 = vadd.f32 %v587_v36, %v586_v31  ;;  %v6682_v40 = vpop.f32.mrb[6].mxu0 }
  0xf0   : > { %v682_v41 = vsel %vm583_vm4, %v652_v37, 0.0  ;;  %v589_v42 = vsel %vm583_vm4, %v6682_v40, 0.0  ;;  %v653_v43 = vmul.f32 %v6682_v40, %v6682_v40  ;;  %v5727_v44 = vpop.f32.mrb[7].mxu0 }
  0xf1   : > { %v683_v45 = vadd.f32 %v682_v41, %v681_v34  ;;  %v590_v46 = vadd.f32 %v589_v42, %v588_v39 }
  0xf2   : > { %v684_v47 = vsel %vm583_vm4, %v653_v43, 0.0 }
  0xf3   : > { %v685_v48 = vadd.f32 %v684_v47, %v683_v45 }
  0xf5   : > { %v6690_v49 = vpop.f32.mrb[8].mxu0 }
  0xf6   : > { %v591_v50 = vsel %vm583_vm4, %v6690_v49, 0.0  ;;  %v654_v51 = vmul.f32 %v6690_v49, %v6690_v49  ;;  %v5730_v52 = vpop.f32.mrb[9].mxu0 }
  0xf7   : > { %v592_v53 = vadd.f32 %v591_v50, %v590_v46  ;;  %v6696_v54 = vpop.f32.mrb[10].mxu0 }
  0xf8   : > { %v686_v55 = vsel %vm583_vm4, %v654_v51, 0.0  ;;  %v593_v56 = vsel %vm583_vm4, %v6696_v54, 0.0  ;;  %v655_v57 = vmul.f32 %v6696_v54, %v6696_v54  ;;  %v5731_v58 = vpop.f32.mrb[11].mxu0 }
  0xf9   : > { %v687_v59 = vadd.f32 %v686_v55, %v685_v48  ;;  %v594_v60 = vadd.f32 %v593_v56, %v592_v53 }
  0xfa   : > { %v688_v61 = vsel %vm583_vm4, %v655_v57, 0.0 }
  0xfb   : > { %v689_v62 = vadd.f32 %v688_v61, %v687_v59 }
  0xfd   : > { %v6704_v63 = vpop.f32.mrb[12].mxu0 }
  0xfe   : > { %v595_v0 = vsel %vm583_vm4, %v6704_v63, 0.0  ;;  %v656_v2 = vmul.f32 %v6704_v63, %v6704_v63  ;;  %v5734_v3 = vpop.f32.mrb[13].mxu0 }
  0xff   : > { %v596_v4 = vadd.f32 %v595_v0, %v594_v60  ;;  %v6710_v5 = vpop.f32.mrb[14].mxu0 }
 0x100   : > { %v690_v7 = vsel %vm583_vm4, %v656_v2, 0.0  ;;  %v597_v8 = vsel %vm583_vm4, %v6710_v5, 0.0  ;;  %v657_v9 = vmul.f32 %v6710_v5, %v6710_v5  ;;  %v5735_v10 = vpop.f32.mrb[15].mxu0 }
 0x101   : > { %v691_v11 = vadd.f32 %v690_v7, %v689_v62  ;;  %v598_v12 = vadd.f32 %v597_v8, %v596_v4 }
 0x102   : > { %v692_v13 = vsel %vm583_vm4, %v657_v9, 0.0 }
 0x103   : > { %v693_v14 = vadd.f32 %v692_v13, %v691_v11 }
 0x105   : > { %v6720_v15 = vpop.f32.mrb[16].mxu0 }
 0x106   : > { %v599_v16 = vsel %vm583_vm4, %v6720_v15, 0.0  ;;  %v658_v17 = vmul.f32 %v6720_v15, %v6720_v15  ;;  %v5738_v18 = vpop.f32.mrb[17].mxu0 }
 0x107   : > { %v600_v19 = vadd.f32 %v599_v16, %v598_v12  ;;  %v6726_v20 = vpop.f32.mrb[18].mxu0 }
 0x108   : > { %v694_v21 = vsel %vm583_vm4, %v658_v17, 0.0  ;;  %v601_v22 = vsel %vm583_vm4, %v6726_v20, 0.0  ;;  %v659_v24 = vmul.f32 %v6726_v20, %v6726_v20  ;;  %v5739_v25 = vpop.f32.mrb[19].mxu0 }
 0x109   : > { %v695_v27 = vadd.f32 %v694_v21, %v693_v14  ;;  %v602_v28 = vadd.f32 %v601_v22, %v600_v19 }
 0x10a   : > { %v696_v29 = vsel %vm583_vm4, %v659_v24, 0.0 }
 0x10b   : > { %v697_v30 = vadd.f32 %v696_v29, %v695_v27 }
 0x10d   : > { %v6734_v31 = vpop.f32.mrb[20].mxu0 }
 0x10e   : > { %v603_v32 = vsel %vm583_vm4, %v6734_v31, 0.0  ;;  %v660_v33 = vmul.f32 %v6734_v31, %v6734_v31  ;;  %v5742_v34 = vpop.f32.mrb[21].mxu0 }
 0x10f   : > { %v604_v36 = vadd.f32 %v603_v32, %v602_v28  ;;  %v6740_v37 = vpop.f32.mrb[22].mxu0 }
 0x110   : > { %v698_v38 = vsel %vm583_vm4, %v660_v33, 0.0  ;;  %v605_v39 = vsel %vm583_vm4, %v6740_v37, 0.0  ;;  %v661_v41 = vmul.f32 %v6740_v37, %v6740_v37  ;;  %v5743_v42 = vpop.f32.mrb[23].mxu0 }
 0x111   : > { %v699_v43 = vadd.f32 %v698_v38, %v697_v30  ;;  %v606_v44 = vadd.f32 %v605_v39, %v604_v36 }
 0x112   : > { %v700_v45 = vsel %vm583_vm4, %v661_v41, 0.0 }
 0x113   : > { %v701_v46 = vadd.f32 %v700_v45, %v699_v43 }
 0x115   : > { %v6748_v47 = vpop.f32.mrb[24].mxu0 }
 0x116   : > { %v607_v48 = vsel %vm583_vm4, %v6748_v47, 0.0  ;;  %v662_v50 = vmul.f32 %v6748_v47, %v6748_v47  ;;  %v5746_v51 = vpop.f32.mrb[25].mxu0 }
 0x117   : > { %v608_v52 = vadd.f32 %v607_v48, %v606_v44  ;;  %v6754_v53 = vpop.f32.mrb[26].mxu0 }
 0x118   : > { %v702_v55 = vsel %vm583_vm4, %v662_v50, 0.0  ;;  %v609_v56 = vsel %vm583_vm4, %v6754_v53, 0.0  ;;  %v663_v57 = vmul.f32 %v6754_v53, %v6754_v53  ;;  %v5747_v58 = vpop.f32.mrb[27].mxu0 }
 0x119   : > { %v703_v59 = vadd.f32 %v702_v55, %v701_v46  ;;  %v610_v60 = vadd.f32 %v609_v56, %v608_v52 }
 0x11a   : > { %v704_v61 = vsel %vm583_vm4, %v663_v57, 0.0 }
 0x11b   : > { %v705_v62 = vadd.f32 %v704_v61, %v703_v59 }
 0x11d   : > { %v6762_v0 = vpop.f32.mrb[28].mxu0 }
 0x11e   : > { %v611_v2 = vsel %vm583_vm4, %v6762_v0, 0.0  ;;  %v664_v3 = vmul.f32 %v6762_v0, %v6762_v0  ;;  %v5750_v4 = vpop.f32.mrb[29].mxu0 }
 0x11f   : > { %v612_v7 = vadd.f32 %v611_v2, %v610_v60  ;;  %v6768_v8 = vpop.f32.mrb[30].mxu0 }
 0x120   : > { %v706_v9 = vsel %vm583_vm4, %v664_v3, 0.0  ;;  %v613_v10 = vsel %vm583_vm4, %v6768_v8, 0.0  ;;  %v665_v11 = vmul.f32 %v6768_v8, %v6768_v8  ;;  %v5751_v12 = vpop.f32.mrb[31].mxu0 }
 0x121   : > { %v707_v13 = vadd.f32 %v706_v9, %v705_v62  ;;  %v614_v14 = vadd.f32 %v613_v10, %v612_v7 }
 0x122   : > { %v708_v16 = vsel %vm583_vm4, %v665_v11, 0.0  ;;  %v6161_v11 = vld [vmem:[%s8442_s2 + $0x3c] ss:$8 sps:$4 sm:$0xff]  }
 0x123   : > { %v709_v17 = vadd.f32 %v708_v16, %v707_v13  ;;  %4997 = vmatprep.mubr.msk.bf16.mxu1 %vm890_vm5, %v6161_v11 }
 0x125   : > { %v6776_v18 = vpop.f32.mrb[32].mxu0 }
 0x126   : > { %v615_v19 = vsel %vm583_vm4, %v6776_v18, 0.0  ;;  %v666_v21 = vmul.f32 %v6776_v18, %v6776_v18  ;;  %v5754_v22 = vpop.f32.mrb[33].mxu0 }
 0x127   : > { %v616_v24 = vadd.f32 %v615_v19, %v614_v14  ;;  %v6782_v25 = vpop.f32.mrb[34].mxu0 }
 0x128   : > { %v710_v27 = vsel %vm583_vm4, %v666_v21, 0.0  ;;  %v617_v28 = vsel %vm583_vm4, %v6782_v25, 0.0  ;;  %v667_v29 = vmul.f32 %v6782_v25, %v6782_v25  ;;  %v5755_v30 = vpop.f32.mrb[35].mxu0 }
 0x129   : > { %v711_v32 = vadd.f32 %v710_v27, %v709_v17  ;;  %v618_v33 = vadd.f32 %v617_v28, %v616_v24 }
 0x12a   : > { %v712_v34 = vsel %vm583_vm4, %v667_v29, 0.0 }
 0x12b   : > { %v713_v36 = vadd.f32 %v712_v34, %v711_v32 }
 0x12d   : > { %v6790_v38 = vpop.f32.mrb[36].mxu0 }
 0x12e   : > { %v619_v39 = vsel %vm583_vm4, %v6790_v38, 0.0  ;;  %v668_v41 = vmul.f32 %v6790_v38, %v6790_v38  ;;  %v5758_v42 = vpop.f32.mrb[37].mxu0 }
 0x12f   : > { %v620_v43 = vadd.f32 %v619_v39, %v618_v33  ;;  %v6796_v44 = vpop.f32.mrb[38].mxu0 }
 0x130   : > { %v714_v45 = vsel %vm583_vm4, %v668_v41, 0.0  ;;  %v621_v46 = vsel %vm583_vm4, %v6796_v44, 0.0  ;;  %v669_v48 = vmul.f32 %v6796_v44, %v6796_v44  ;;  %v5759_v50 = vpop.f32.mrb[39].mxu0 }
 0x131   : > { %v715_v51 = vadd.f32 %v714_v45, %v713_v36  ;;  %v622_v52 = vadd.f32 %v621_v46, %v620_v43 }
 0x132   : > { %v716_v55 = vsel %vm583_vm4, %v669_v48, 0.0 }
 0x133   : > { %v717_v56 = vadd.f32 %v716_v55, %v715_v51 }
 0x135   : > { %v6804_v57 = vpop.f32.mrb[40].mxu0 }
 0x136   : > { %v623_v58 = vsel %vm583_vm4, %v6804_v57, 0.0  ;;  %v670_v59 = vmul.f32 %v6804_v57, %v6804_v57  ;;  %v5762_v60 = vpop.f32.mrb[41].mxu0 }
 0x137   : > { %v624_v61 = vadd.f32 %v623_v58, %v622_v52  ;;  %v6810_v62 = vpop.f32.mrb[42].mxu0 }
 0x138   : > { %v718_v2 = vsel %vm583_vm4, %v670_v59, 0.0  ;;  %v625_v3 = vsel %vm583_vm4, %v6810_v62, 0.0  ;;  %v671_v4 = vmul.f32 %v6810_v62, %v6810_v62  ;;  %v5763_v7 = vpop.f32.mrb[43].mxu0 }
 0x139   : > { %v719_v9 = vadd.f32 %v718_v2, %v717_v56  ;;  %v626_v10 = vadd.f32 %v625_v3, %v624_v61 }
 0x13a   : > { %v720_v12 = vsel %vm583_vm4, %v671_v4, 0.0 }
 0x13b   : > { %v721_v13 = vadd.f32 %v720_v12, %v719_v9 }
 0x13d   : > { %v6822_v14 = vpop.f32.mrb[44].mxu0 }
 0x13e   : > { %v627_v16 = vsel %vm583_vm4, %v6822_v14, 0.0  ;;  %v672_v17 = vmul.f32 %v6822_v14, %v6822_v14  ;;  %v5766_v19 = vpop.f32.mrb[45].mxu0 }
 0x13f   : > { %v628_v21 = vadd.f32 %v627_v16, %v626_v10  ;;  %v6828_v22 = vpop.f32.mrb[46].mxu0 }
 0x140   : > { %v722_v24 = vsel %vm583_vm4, %v672_v17, 0.0  ;;  %v629_v27 = vsel %vm583_vm4, %v6828_v22, 0.0  ;;  %v673_v28 = vmul.f32 %v6828_v22, %v6828_v22  ;;  %v5767_v29 = vpop.f32.mrb[47].mxu0 }
 0x141   : > { %v723_v30 = vadd.f32 %v722_v24, %v721_v13  ;;  %v630_v32 = vadd.f32 %v629_v27, %v628_v21 }
 0x142   : > { %v724_v33 = vsel %vm583_vm4, %v673_v28, 0.0 }
 0x143   : > { %v725_v34 = vadd.f32 %v724_v33, %v723_v30 }
 0x145   : > { %v6836_v36 = vpop.f32.mrb[48].mxu0 }
 0x146   : > { %v631_v39 = vsel %vm583_vm4, %v6836_v36, 0.0  ;;  %v674_v41 = vmul.f32 %v6836_v36, %v6836_v36  ;;  %v5770_v42 = vpop.f32.mrb[49].mxu0 }
 0x147   : > { %v632_v43 = vadd.f32 %v631_v39, %v630_v32  ;;  %v6842_v45 = vpop.f32.mrb[50].mxu0 }
 0x148   : > { %v726_v46 = vsel %vm583_vm4, %v674_v41, 0.0  ;;  %v633_v48 = vsel %vm583_vm4, %v6842_v45, 0.0  ;;  %v675_v50 = vmul.f32 %v6842_v45, %v6842_v45  ;;  %v5771_v51 = vpop.f32.mrb[51].mxu0 }
 0x149   : > { %v727_v52 = vadd.f32 %v726_v46, %v725_v34  ;;  %v634_v55 = vadd.f32 %v633_v48, %v632_v43  ;;  %v6167_v46 = vld [vmem:[%s8442_s2 + $0x4] ss:$8 sps:$4 sm:$0xff]  }
 0x14a   : > { %v728_v56 = vsel %vm583_vm4, %v675_v50, 0.0  ;;  %4978 = vmatprep.mubr.msk.bf16.mxu0 %vm890_vm5, %v6167_v46 }
 0x14b   : > { %v729_v58 = vadd.f32 %v728_v56, %v727_v52 }
 0x14d   : > { %v6850_v59 = vpop.f32.mrb[52].mxu0 }
 0x14e   : > { %v635_v60 = vsel %vm583_vm4, %v6850_v59, 0.0  ;;  %v676_v61 = vmul.f32 %v6850_v59, %v6850_v59  ;;  %v5774_v2 = vpop.f32.mrb[53].mxu0 }
 0x14f   : > { %v636_v3 = vadd.f32 %v635_v60, %v634_v55  ;;  %v6856_v4 = vpop.f32.mrb[54].mxu0 }
 0x150   : > { %v730_v7 = vsel %vm583_vm4, %v676_v61, 0.0  ;;  %v637_v9 = vsel %vm583_vm4, %v6856_v4, 0.0  ;;  %v677_v10 = vmul.f32 %v6856_v4, %v6856_v4  ;;  %v5775_v11 = vpop.f32.mrb[55].mxu0 }
 0x151   : > { %v731_v12 = vadd.f32 %v730_v7, %v729_v58  ;;  %v638_v13 = vadd.f32 %v637_v9, %v636_v3 }
 0x152   : > { %v732_v16 = vsel %vm583_vm4, %v677_v10, 0.0 }
 0x153   : > { %v733_v17 = vadd.f32 %v732_v16, %v731_v12 }
 0x155   : > { %v577_v19 = vpop.f32.mrb[56].mxu0 }
 0x156   : > { %v640_v21 = vsel %vm639_vm6, %v577_v19, 0.0  ;;  %v678_v24 = vmul.f32 %v577_v19, %v577_v19  ;;  %v5778_v27 = vpop.f32.mrb[57].mxu0 }
 0x157   : > { %v641_v28 = vadd.f32 %v640_v21, %v638_v13  ;;  %v580_v29 = vpop.f32.mrb[58].mxu0 }
 0x158   : > { %v734_v30 = vsel %vm639_vm6, %v678_v24, 0.0  ;;  %v5779_v32 = vpop.f32.mrb[59].mxu0 }
 0x159   : > { %v642_v33 = vrot.slane %v641_v28, 4  ;;  %v735_v34 = vadd.f32 %v734_v30, %v733_v17 }
 0x15b   : > { %v643_v39 = vadd.f32 %v642_v33, %v641_v28  ;;  %v736_v41 = vrot.slane %v735_v34, 4 }
 0x15d   : > { %v644_v42 = vrot.slane %v643_v39, 2  ;;  %v737_v43 = vadd.f32 %v736_v41, %v735_v34 }
 0x15f   : > { %v645_v48 = vadd.f32 %v644_v42, %v643_v39  ;;  %v738_v50 = vrot.slane %v737_v43, 2 }
 0x161   : > { %v646_v51 = vrot.slane %v645_v48, 1  ;;  %v739_v52 = vadd.f32 %v738_v50, %v737_v43 }
 0x163   : > { %v647_v55 = vadd.f32 %v646_v51, %v645_v48  ;;  %v740_v56 = vrot.slane %v739_v52, 1 }
 0x165   : > { %v6868_v58 = vmul.f32 0.0044444446, %v647_v55  ;;  %v741_v60 = vadd.f32 %v740_v56, %v739_v52 }
 0x167   : > { %v742_v61 = vmul.f32 0.0044444446, %v741_v60  ;;  %v743_v2 = vmul.f32 %v6868_v58, %v6868_v58  ;;  %v774_v3 = vsub.f32 %v577_v19, %v6868_v58  ;;  %v746_v7 = vsub.f32 %v6662_v23, %v6868_v58 }
 0x168   : > { %v747_v9 = vsub.f32 %v6666_v26, %v6868_v58  ;;  %v748_v10 = vsub.f32 %v6676_v35, %v6868_v58  ;;  %v749_v11 = vsub.f32 %v6682_v40, %v6868_v58  ;;  %v750_v12 = vsub.f32 %v6690_v49, %v6868_v58 }
 0x169   : > { %v744_v13 = vsub.f32 %v742_v61, %v743_v2  ;;  %v751_v16 = vsub.f32 %v6696_v54, %v6868_v58  ;;  %v752_v17 = vsub.f32 %v6704_v63, %v6868_v58  ;;  %v753_v23 = vsub.f32 %v6710_v5, %v6868_v58 }
 0x16a   : > { %v754_v26 = vsub.f32 %v6720_v15, %v6868_v58  ;;  %v755_v35 = vsub.f32 %v6726_v20, %v6868_v58  ;;  %v756_v40 = vsub.f32 %v6734_v31, %v6868_v58  ;;  %v757_v49 = vsub.f32 %v6740_v37, %v6868_v58 }
 0x16b   : > { %v745_v19 = vmax.f32 %v744_v13, 0.0  ;;  %v758_v54 = vsub.f32 %v6748_v47, %v6868_v58  ;;  %v759_v63 = vsub.f32 %v6754_v53, %v6868_v58  ;;  %v760_v5 = vsub.f32 %v6762_v0, %v6868_v58 }
 0x16c   : > { %v761_v15 = vsub.f32 %v6768_v8, %v6868_v58  ;;  %v762_v20 = vsub.f32 %v6776_v18, %v6868_v58  ;;  %v763_v31 = vsub.f32 %v6782_v25, %v6868_v58  ;;  %v764_v37 = vsub.f32 %v6790_v38, %v6868_v58 }
 0x16d   : > { %v775_v21 = vadd.f32 1e-05, %v745_v19  ;;  %v765_v47 = vsub.f32 %v6796_v44, %v6868_v58  ;;  %v766_v53 = vsub.f32 %v6804_v57, %v6868_v58  ;;  %v767_v0 = vsub.f32 %v6810_v62, %v6868_v58 }
 0x16e   : > { %v768_v8 = vsub.f32 %v6822_v14, %v6868_v58  ;;  %v769_v18 = vsub.f32 %v6828_v22, %v6868_v58  ;;  %v770_v25 = vsub.f32 %v6836_v36, %v6868_v58  ;;  %v771_v24 = vsub.f32 %v6842_v45, %v6868_v58 }
 0x16f   : > { %6519 = vrsqrt.f32 %v775_v21  ;;  %v772_v27 = vsub.f32 %v6850_v59, %v6868_v58  ;;  %v773_v28 = vsub.f32 %v6856_v4, %v6868_v58 }
 0x179   : > { %v6929_v29 = vpop.eup %6519 }
 0x17a   : > { %v6932_v30 = vmul.f32 %v6929_v29, %v774_v3  ;;  %v777_v32 = vmul.f32 %v6929_v29, %v746_v7  ;;  %v778_v33 = vmul.f32 %v6929_v29, %v747_v9  ;;  %v779_v34 = vmul.f32 %v6929_v29, %v748_v10 }
 0x17b   : > { %v780_v39 = vmul.f32 %v6929_v29, %v749_v11  ;;  %v781_v41 = vmul.f32 %v6929_v29, %v750_v12  ;;  %v782_v42 = vmul.f32 %v6929_v29, %v751_v16  ;;  %v783_v43 = vmul.f32 %v6929_v29, %v752_v17 }
 0x17c   : > { %v806_v46 = vmax.f32 %v777_v32, 0.0  ;;  %v807_v48 = vmax.f32 %v778_v33, 0.0  ;;  %v808_v50 = vmax.f32 %v779_v34, 0.0  ;;  %v784_v56 = vmul.f32 %v6929_v29, %v753_v23 }
 0x17d   : > { %v809_v51 = vmax.f32 %v780_v39, 0.0  ;;  %v810_v52 = vmax.f32 %v781_v41, 0.0  ;;  %v811_v55 = vmax.f32 %v782_v42, 0.0  ;;  %v812_v61 = vmax.f32 %v783_v43, 0.0 }
 0x17e   : > { %v6942_v60 = vpack.c.bf16 %v807_v48, %v806_v46  ;;  %v785_v2 = vmul.f32 %v6929_v29, %v754_v26  ;;  %v813_v9 = vmax.f32 %v784_v56, 0.0  ;;  %v786_v10 = vmul.f32 %v6929_v29, %v755_v35  ;;  %v6165_v56 = vld [vmem:[%s8442_s2] ss:$8 sps:$4 sm:$0xff]  }
 0x17f   : > { %v6945_v3 = vpack.c.bf16 %v809_v51, %v808_v50  ;;  %v6947_v7 = vpack.c.bf16 %v811_v55, %v810_v52  ;;  %v787_v12 = vmul.f32 %v6929_v29, %v756_v40  ;;  %v788_v13 = vmul.f32 %v6929_v29, %v757_v49 }
 0x180   : > { %910 = vmatpush1.bf16.msra.mxu0 %v6942_v60  ;;  %1039 = vmatpush1.bf16.msra.mxu1 %v6942_v60  ;;  %v814_v11 = vmax.f32 %v785_v2, 0.0  ;;  %v6956_v16 = vpack.c.bf16 %v813_v9, %v812_v61  ;;  %v815_v17 = vmax.f32 %v786_v10, 0.0  ;;  %v789_v23 = vmul.f32 %v6929_v29, %v758_v54  ;;  %v6162_v61 = vld [vmem:[%s8442_s2 + $0x4c] ss:$8 sps:$4 sm:$0xff]   ;;  %v6164_v9 = vld [vmem:[%s8442_s2 + $0x48] ss:$8 sps:$4 sm:$0xff]  }
 0x181   : > { %911 = vmatprep.subr.bf16.mxu0 %v6538_v6  ;;  %1040 = vmatprep.subr.bf16.mxu1 %v6538_v6  ;;  %v790_v26 = vmul.f32 %v6929_v29, %v759_v63  ;;  %v816_v35 = vmax.f32 %v787_v12, 0.0  ;;  %v817_v19 = vmax.f32 %v788_v13, 0.0  ;;  %v791_v21 = vmul.f32 %v6929_v29, %v760_v5  ;;  %v6171_v2 = vld [vmem:[%s8442_s2 + $0x14] ss:$8 sps:$4 sm:$0xff]   ;;  %v6174_v10 = vld [vmem:[%s8442_s2 + $0x10] ss:$8 sps:$4 sm:$0xff]  }
 0x182   : > { %v792_v32 = vmul.f32 %v6929_v29, %v761_v15  ;;  %v6962_v40 = vpack.c.bf16 %v815_v17, %v814_v11  ;;  %v818_v49 = vmax.f32 %v789_v23, 0.0  ;;  %v793_v34 = vmul.f32 %v6929_v29, %v762_v20  ;;  %v6168_v11 = vld [vmem:[%s8442_s2 + $0x5c] ss:$8 sps:$4 sm:$0xff]   ;;  %v4988_v13 = vld [vmem:[%s8442_s2 + $0x68] sm:$0x11] }
 0x183   : > { %v819_v33 = vmax.f32 %v790_v26, 0.0  ;;  %v6967_v39 = vpack.c.bf16 %v817_v19, %v816_v35  ;;  %v820_v54 = vmax.f32 %v791_v21, 0.0  ;;  %v794_v41 = vmul.f32 %v6929_v29, %v763_v31  ;;  %v6176_v12 = vld [vmem:[%s8442_s2 + $0x24] ss:$8 sps:$4 sm:$0xff]   ;;  %v856_v17 = vld [vmem:[%s8442_s2 + $0x30] sm:$0x11] }
 0x184   : > { %912 = vmatpush1.bf16.msra.mxu0 %v6945_v3  ;;  %1041 = vmatpush1.bf16.msra.mxu1 %v6945_v3  ;;  %v821_v63 = vmax.f32 %v792_v32, 0.0  ;;  %v822_v15 = vmax.f32 %v793_v34, 0.0  ;;  %v795_v20 = vmul.f32 %v6929_v29, %v764_v37  ;;  %v796_v42 = vmul.f32 %v6929_v29, %v765_v47  ;;  %v6170_v23 = vld [vmem:[%s8442_s2 + $0x58] ss:$8 sps:$4 sm:$0xff]   ;;  %v6184_v34 = vld [vmem:[%s8442_s2 + $0x84] ss:$8 sps:$4 sm:$0xff]  }
 0x185   : > { %913 = vmatprep.subr.bf16.mxu0 %v6538_v6  ;;  %1042 = vmatprep.subr.bf16.mxu1 %v6538_v6  ;;  %v6972_v5 = vpack.c.bf16 %v819_v33, %v818_v49  ;;  %v823_v31 = vmax.f32 %v794_v41, 0.0  ;;  %v797_v46 = vmul.f32 %v6929_v29, %v766_v53  ;;  %v798_v38 = vmul.f32 %v6929_v29, %v767_v0  ;;  %v6178_v26 = vld [vmem:[%s8442_s2 + $0x20] ss:$8 sps:$4 sm:$0xff]   ;;  %v6181_v49 = vld [vmem:[%s8442_s2 + $0x74] ss:$8 sps:$4 sm:$0xff]  }
 0x186   : > { %v6982_v43 = vpack.c.bf16 %v821_v63, %v820_v54  ;;  %v824_v48 = vmax.f32 %v795_v20, 0.0  ;;  %v825_v37 = vmax.f32 %v796_v42, 0.0  ;;  %v799_v44 = vmul.f32 %v6929_v29, %v768_v8  ;;  %v6179_v33 = vld [vmem:[%s8442_s2 + $0x70] ss:$8 sps:$4 sm:$0xff]   ;;  %v6186_v54 = vld [vmem:[%s8442_s2 + $0x80] ss:$8 sps:$4 sm:$0xff]  }
 0x187   : > { %v800_v47 = vmul.f32 %v6929_v29, %v769_v18  ;;  %v7002_v57 = vpack.c.bf16 %v823_v31, %v822_v15  ;;  %v826_v62 = vmax.f32 %v797_v46, 0.0  ;;  %v827_v53 = vmax.f32 %v798_v38, 0.0  ;;  %v6187_v63 = vld [vmem:[%s8442_s2 + $0x94] ss:$8 sps:$4 sm:$0xff]   ;;  %v5031_v41 = vld [vmem:[%s8442_s2 + $0xa0] sm:$0x11] }
 0x188   : > { %914 = vmatpush1.bf16.msra.mxu0 %v6947_v7  ;;  %1043 = vmatpush1.bf16.msra.mxu1 %v6947_v7  ;;  %v801_v14 = vmul.f32 %v6929_v29, %v770_v25  ;;  %v7010_v22 = vpack.c.bf16 %v825_v37, %v824_v48  ;;  %v828_v0 = vmax.f32 %v799_v44, 0.0  ;;  %v802_v18 = vmul.f32 %v6929_v29, %v771_v24  ;;  %v6189_v15 = vld [vmem:[%s8442_s2 + $0x90] ss:$8 sps:$4 sm:$0xff]   ;;  %v6194_v31 = vld [vmem:[%s8442_s2 + $0xe4] ss:$8 sps:$4 sm:$0xff]  }
 0x189   : > { %915 = vmatprep.subr.bf16.mxu0 %v6538_v6  ;;  %1044 = vmatprep.subr.bf16.mxu1 %v6538_v6  ;;  %v829_v8 = vmax.f32 %v800_v47, 0.0  ;;  %v7016_v50 = vpack.c.bf16 %v827_v53, %v826_v62  ;;  %v803_v36 = vmul.f32 %v6929_v29, %v772_v27  ;;  %v804_v25 = vmul.f32 %v6929_v29, %v773_v28  ;;  %v6214_v46 = vld [vmem:[%s8443_s3 + $0x20] sm:$0xff]   ;;  %v6215_v38 = vld [vmem:[%s8443_s3 + $0x28] sm:$0xff]   ;;  %v6219_v48 = vld [vmem:[%s8443_s3 + $0x30] sm:$0xff]  }
 0x18a   : > { %v830_v51 = vmax.f32 %v801_v14, 0.0  ;;  %v831_v55 = vmax.f32 %v802_v18, 0.0  ;;  %v834_v4 = vmax.f32 %v6932_v30, 0.0  ;;  %v7075_v28 = vsel %vm903_vm7, 65535, %v6538_v6  ;;  %v6159_v30 = vld [vmem:[%s8442_s2 + $0x38] ss:$8 sps:$4 sm:$0xff]  }
 0x18b   : > { %v7026_v52 = vpack.c.bf16 %v829_v8, %v828_v0  ;;  %v832_v45 = vmax.f32 %v803_v36, 0.0  ;;  %v833_v24 = vmax.f32 %v804_v25, 0.0  ;;  %v4996_v35 = vcombine.high %v4988_v13, %v4988_v13  ;;  %v6192_v37 = vld [vmem:[%s8442_s2 + $0xe0] ss:$8 sps:$4 sm:$0xff]   ;;  %v6195_v44 = vld [vmem:[%s8442_s2 + $0xf4] ss:$8 sps:$4 sm:$0xff]  }
 0x18c   : > { %916 = vmatpush1.bf16.msra.mxu0 %v6956_v16  ;;  %1045 = vmatpush1.bf16.msra.mxu1 %v6956_v16  ;;  %v7032_v59 = vpack.c.bf16 %v831_v55, %v830_v51  ;;  %v849_v58 = vpack.c.bf16 %v834_v4, %v834_v4  ;;  %v4977_v19 = vcombine.high %v856_v17, %v856_v17  ;;  %v6220_v47 = vld [vmem:[%s8443_s3 + $0x38] sm:$0xff]   ;;  %v7241_v62 = vld [vmem:[%s8443_s3] sm:$0xff]   ;;  %v5101_v0 = vld [vmem:[%s8442_s2 + $0x110] sm:$0x11] }
 0x18d   : > { %917 = vmatprep.subr.bf16.mxu0 %v6538_v6  ;;  %1046 = vmatprep.subr.bf16.mxu1 %v6538_v6  ;;  %v7034_v27 = vpack.c.bf16 %v833_v24, %v832_v45  ;;  %v4995_v21 = vcombine.low %v4988_v13, %v4988_v13  ;;  %v4976_v32 = vcombine.low %v856_v17, %v856_v17  ;;  %v6197_v53 = vld [vmem:[%s8442_s2 + $0xf0] ss:$8 sps:$4 sm:$0xff]   ;;  %v6198_v14 = vld [vmem:[%s8442_s2 + $0x104] ss:$8 sps:$4 sm:$0xff]   ;;  %v6200_v8 = vld [vmem:[%s8442_s2 + $0x100] ss:$8 sps:$4 sm:$0xff]  }
 0x18e   : > { %v7082_v29 = vand.u32 %v7075_v28, %v849_v58  ;;  %v5039_v20 = vcombine.high %v5031_v41, %v5031_v41  ;;  %v5038_v42 = vcombine.low %v5031_v41, %v5031_v41  ;;  %v5109_v18 = vcombine.high %v5101_v0, %v5101_v0  ;;  %v6205_v36 = vld [vmem:[%s8442_s2 + $0x11c] ss:$8 sps:$4 sm:$0xff]   ;;  %v6203_v25 = vld [vmem:[%s8442_s2 + $0x118] ss:$8 sps:$4 sm:$0xff]   ;;  %v6206_v55 = vld [vmem:[%s8442_s2 + $0x12c] ss:$8 sps:$4 sm:$0xff]  }
 0x18f   : > { %v5108_v51 = vcombine.low %v5101_v0, %v5101_v0  ;;  %v6208_v45 = vld [vmem:[%s8442_s2 + $0x128] ss:$8 sps:$4 sm:$0xff]   ;;  %v6209_v24 = vld [vmem:[%s8442_s2 + $0x13c] ss:$8 sps:$4 sm:$0xff]   ;;  %v6211_v58 = vld [vmem:[%s8442_s2 + $0x138] ss:$8 sps:$4 sm:$0xff]  }
 0x190   : > { %918 = vmatpush1.bf16.msra.mxu0 %v6962_v40  ;;  %1047 = vmatpush1.bf16.msra.mxu1 %v6962_v40  ;;  %v5136_v4 = vld [vmem:[%s8442_s2 + $0x148] sm:$0x11] }
 0x191   : > { %919 = vmatprep.subr.bf16.mxu0 %v6538_v6  ;;  %1048 = vmatprep.subr.bf16.mxu1 %v6538_v6  ;;  %v6222_v41 = vld [vmem:[%s8443_s3 + $0x8] sm:$0xff]  }
 0x194   : > { %920 = vmatpush1.bf16.msra.mxu0 %v6967_v39  ;;  %1049 = vmatpush1.bf16.msra.mxu1 %v6967_v39 }
 0x195   : > { %921 = vmatprep.subr.bf16.mxu0 %v6538_v6  ;;  %1050 = vmatprep.subr.bf16.mxu1 %v6538_v6 }
 0x198   : > { %922 = vmatpush1.bf16.msra.mxu0 %v6972_v5  ;;  %1051 = vmatpush1.bf16.msra.mxu1 %v6972_v5 }
 0x199   : > { %923 = vmatprep.subr.bf16.mxu0 %v6538_v6  ;;  %1052 = vmatprep.subr.bf16.mxu1 %v6538_v6 }
 0x19c   : > { %924 = vmatpush1.bf16.msra.mxu0 %v6982_v43  ;;  %1053 = vmatpush1.bf16.msra.mxu1 %v6982_v43 }
 0x19d   : > { %925 = vmatprep.subr.bf16.mxu0 %v6538_v6  ;;  %1054 = vmatprep.subr.bf16.mxu1 %v6538_v6 }
 0x1a0   : > { %926 = vmatpush1.bf16.msra.mxu0 %v7002_v57  ;;  %1055 = vmatpush1.bf16.msra.mxu1 %v7002_v57 }
 0x1a1   : > { %927 = vmatprep.subr.bf16.mxu0 %v6538_v6  ;;  %1056 = vmatprep.subr.bf16.mxu1 %v6538_v6 }
 0x1a4   : > { %928 = vmatpush1.bf16.msra.mxu0 %v7010_v22  ;;  %1057 = vmatpush1.bf16.msra.mxu1 %v7010_v22 }
 0x1a5   : > { %929 = vmatprep.subr.bf16.mxu0 %v6538_v6  ;;  %1058 = vmatprep.subr.bf16.mxu1 %v6538_v6 }
 0x1a8   : > { %930 = vmatpush1.bf16.msra.mxu0 %v7016_v50  ;;  %1059 = vmatpush1.bf16.msra.mxu1 %v7016_v50 }
 0x1a9   : > { %931 = vmatprep.subr.bf16.mxu0 %v6538_v6  ;;  %1060 = vmatprep.subr.bf16.mxu1 %v6538_v6 }
 0x1ac   : > { %932 = vmatpush1.bf16.msra.mxu0 %v7026_v52  ;;  %1061 = vmatpush1.bf16.msra.mxu1 %v7026_v52 }
 0x1ad   : > { %933 = vmatprep.subr.bf16.mxu0 %v6538_v6  ;;  %1062 = vmatprep.subr.bf16.mxu1 %v6538_v6 }
 0x1b0   : > { %934 = vmatpush1.bf16.msra.mxu0 %v7032_v59  ;;  %1063 = vmatpush1.bf16.msra.mxu1 %v7032_v59 }
 0x1b1   : > { %935 = vmatprep.subr.bf16.mxu0 %v6538_v6  ;;  %1064 = vmatprep.subr.bf16.mxu1 %v6538_v6 }
 0x1b4   : > { %936 = vmatpush1.bf16.msra.mxu0 %v7034_v27  ;;  %1065 = vmatpush1.bf16.msra.mxu1 %v7034_v27 }
 0x1b5   : > { %937 = vmatprep.subr.bf16.mxu0 %v6538_v6  ;;  %1066 = vmatprep.subr.bf16.mxu1 %v6538_v6 }
 0x1b8   : > { %938 = vmatpush1.bf16.msra.mxu0 %v7082_v29  ;;  %1067 = vmatpush1.bf16.msra.mxu1 %v7082_v29 }
 0x1b9   : > { %1368 = vmatprep.subr.bf16.mxu1 %v6538_v6  ;;  %5780 = vmatprep.subr.bf16.mxu0 %v6214_v46 }
 0x1bb   : > { %1071 = vmatmul.mubr.bf16.vlgmr.msra.gmra.mrb[0].mxu1 %v6159_v30  ;;  %942 = vmatmul.mubr.bf16.vlgmr.msra.gmra.mrb[60].mxu0 %v6165_v56  ;;  %v5144_v30 = vcombine.high %v5136_v4, %v5136_v4  ;;  %v5143_v56 = vcombine.low %v5136_v4, %v5136_v4 }
 0x1bc   : > { %1369 = vmatpush1.bf16.msra.mxu1 %v6942_v60  ;;  %4998 = vmatprep.mubr.msk.bf16.mxu1 %vm890_vm5, %v6162_v61  ;;  %v6218_v61 = vld [vmem:[%s8442_s2 + $0x18c] ss:$8 sps:$4 sm:$0xff]  }
 0x1bd   : > { %1370 = vmatprep.subr.bf16.mxu1 %v6538_v6  ;;  %4979 = vmatprep.mubr.msk.bf16.mxu0 %vm890_vm5, %v6171_v2 }
 0x1be   : > { %5781 = vmatpush3.bf16.msra.mxu0 %v6214_v46 }
 0x1bf   : > { %5782 = vmatprep.subr.bf16.mxu0 %v6215_v38 }
 0x1c0   : > { %1371 = vmatpush1.bf16.msra.mxu1 %v6945_v3 }
 0x1c1   : > { %1372 = vmatprep.subr.bf16.mxu1 %v6538_v6 }
 0x1c2   : > { %5783 = vmatpush3.bf16.msra.mxu0 %v6215_v38 }
 0x1c3   : > { %1079 = vmatmul.mubr.bf16.gmra.mrb[4].mxu1 %v6164_v9  ;;  %950 = vmatmul.mubr.bf16.gmra.mrb[64].mxu0 %v6174_v10 }
 0x1c4   : > { %1373 = vmatpush1.bf16.msra.mxu1 %v6947_v7  ;;  %4999 = vmatprep.mubr.msk.bf16.mxu1 %vm890_vm5, %v6168_v11 }
 0x1c5   : > { %1374 = vmatprep.subr.bf16.mxu1 %v6538_v6  ;;  %4980 = vmatprep.mubr.msk.bf16.mxu0 %vm890_vm5, %v6176_v12 }
 0x1c6   : > { %5784 = vmatprep.subr.bf16.mxu0 %v6219_v48 }
 0x1c7   : > { %5785 = vmatpush3.bf16.msra.mxu0 %v6219_v48 }
 0x1c8   : > { %1375 = vmatpush1.bf16.msra.mxu1 %v6956_v16  ;;  %5786 = vmatprep.subr.bf16.mxu0 %v6220_v47 }
 0x1c9   : > { %1376 = vmatprep.subr.bf16.mxu1 %v6538_v6 }
 0x1cb   : > { %1087 = vmatmul.mubr.bf16.gmra.mrb[8].mxu1 %v6170_v23  ;;  %958 = vmatmul.mubr.bf16.gmra.mrb[68].mxu0 %v6178_v26 }
 0x1cc   : > { %1377 = vmatpush1.bf16.msra.mxu1 %v6962_v40  ;;  %5000 = vmatprep.mubr.msk.bf16.mxu1 %vm890_vm5, %v4996_v35 }
 0x1cd   : > { %1378 = vmatprep.subr.bf16.mxu1 %v6538_v6  ;;  %4981 = vmatprep.mubr.msk.bf16.mxu0 %vm890_vm5, %v4977_v19 }
 0x1ce   : > { %5787 = vmatpush3.bf16.msra.mxu0 %v6220_v47 }
 0x1cf   : > { %5796 = vmatprep.subr.bf16.mxu0 %v7241_v62 }
 0x1d0   : > { %1379 = vmatpush1.bf16.msra.mxu1 %v6967_v39 }
 0x1d1   : > { %1380 = vmatprep.subr.bf16.mxu1 %v6538_v6 }
 0x1d3   : > { %1095 = vmatmul.mubr.bf16.gmra.mrb[12].mxu1 %v4995_v21  ;;  %966 = vmatmul.mubr.bf16.gmra.mrb[72].mxu0 %v4976_v32 }
 0x1d4   : > { %1381 = vmatpush1.bf16.msra.mxu1 %v6972_v5  ;;  %5040 = vmatprep.mubr.msk.bf16.mxu1 %vm890_vm5, %v6181_v49 }
 0x1d5   : > { %1382 = vmatprep.subr.bf16.mxu1 %v6538_v6 }
 0x1d8   : > { %1383 = vmatpush1.bf16.msra.mxu1 %v6982_v43 }
 0x1d9   : > { %1384 = vmatprep.subr.bf16.mxu1 %v6538_v6 }
 0x1dc   : > { %1385 = vmatpush1.bf16.msra.mxu1 %v7002_v57 }
 0x1dd   : > { %1386 = vmatprep.subr.bf16.mxu1 %v6538_v6 }
 0x1e0   : > { %1387 = vmatpush1.bf16.msra.mxu1 %v7010_v22 }
 0x1e1   : > { %1388 = vmatprep.subr.bf16.mxu1 %v6538_v6 }
 0x1e4   : > { %1389 = vmatpush1.bf16.msra.mxu1 %v7016_v50 }
 0x1e5   : > { %1390 = vmatprep.subr.bf16.mxu1 %v6538_v6 }
 0x1e8   : > { %1391 = vmatpush1.bf16.msra.mxu1 %v7026_v52 }
 0x1e9   : > { %1392 = vmatprep.subr.bf16.mxu1 %v6538_v6 }
 0x1ec   : > { %1393 = vmatpush1.bf16.msra.mxu1 %v7032_v59 }
 0x1ed   : > { %1394 = vmatprep.subr.bf16.mxu1 %v6538_v6 }
 0x1f0   : > { %1395 = vmatpush1.bf16.msra.mxu1 %v7034_v27 }
 0x1f1   : > { %1396 = vmatprep.subr.bf16.mxu1 %v6538_v6 }
 0x1f4   : > { %1397 = vmatpush1.bf16.msra.mxu1 %v7082_v29 }
 0x1f5   : > { %1842 = vmatprep.subr.bf16.mxu1 %v6538_v6 }
 0x1f7   : > { %1401 = vmatmul.mubr.bf16.vlgmr.msra.gmra.mrb[16].mxu1 %v6179_v33 }
 0x1f8   : > { %1843 = vmatpush1.bf16.msra.mxu1 %v6942_v60  ;;  %5041 = vmatprep.mubr.msk.bf16.mxu1 %vm890_vm5, %v6184_v34 }
 0x1f9   : > { %1844 = vmatprep.subr.bf16.mxu1 %v6538_v6 }
 0x1fc   : > { %1845 = vmatpush1.bf16.msra.mxu1 %v6945_v3 }
 0x1fd   : > { %1846 = vmatprep.subr.bf16.mxu1 %v6538_v6 }
 0x1ff   : > { %1409 = vmatmul.mubr.bf16.gmra.mrb[20].mxu1 %v6186_v54 }
 0x200   : > { %1847 = vmatpush1.bf16.msra.mxu1 %v6947_v7  ;;  %5042 = vmatprep.mubr.msk.bf16.mxu1 %vm890_vm5, %v6187_v63 }
 0x201   : > { %1848 = vmatprep.subr.bf16.mxu1 %v6538_v6 }
 0x204   : > { %1849 = vmatpush1.bf16.msra.mxu1 %v6956_v16 }
 0x205   : > { %1850 = vmatprep.subr.bf16.mxu1 %v6538_v6 }
 0x207   : > { %1417 = vmatmul.mubr.bf16.gmra.mrb[24].mxu1 %v6189_v15 }
 0x208   : > { %1851 = vmatpush1.bf16.msra.mxu1 %v6962_v40  ;;  %5043 = vmatprep.mubr.msk.bf16.mxu1 %vm890_vm5, %v5039_v20 }
 0x209   : > { %1852 = vmatprep.subr.bf16.mxu1 %v6538_v6 }
 0x20c   : > { %1853 = vmatpush1.bf16.msra.mxu1 %v6967_v39 }
 0x20d   : > { %1854 = vmatprep.subr.bf16.mxu1 %v6538_v6 }
 0x20f   : > { %1425 = vmatmul.mubr.bf16.gmra.mrb[28].mxu1 %v5038_v42  ;;  %v6223_v42 = vld [vmem:[%s8443_s3 + $0x10] sm:$0xff]  }
 0x210   : > { %1855 = vmatpush1.bf16.msra.mxu1 %v6972_v5  ;;  %5110 = vmatprep.mubr.msk.bf16.mxu1 %vm890_vm5, %v6194_v31 }
 0x211   : > { %1856 = vmatprep.subr.bf16.mxu1 %v6538_v6 }
 0x214   : > { %1857 = vmatpush1.bf16.msra.mxu1 %v6982_v43 }
 0x215   : > { %1858 = vmatprep.subr.bf16.mxu1 %v6538_v6 }
 0x218   : > { %1859 = vmatpush1.bf16.msra.mxu1 %v7002_v57 }
 0x219   : > { %1860 = vmatprep.subr.bf16.mxu1 %v6538_v6 }
 0x21c   : > { %1861 = vmatpush1.bf16.msra.mxu1 %v7010_v22 }
 0x21d   : > { %1862 = vmatprep.subr.bf16.mxu1 %v6538_v6 }
 0x220   : > { %1863 = vmatpush1.bf16.msra.mxu1 %v7016_v50 }
 0x221   : > { %1864 = vmatprep.subr.bf16.mxu1 %v6538_v6 }
 0x224   : > { %1865 = vmatpush1.bf16.msra.mxu1 %v7026_v52 }
 0x225   : > { %1866 = vmatprep.subr.bf16.mxu1 %v6538_v6 }
 0x228   : > { %1867 = vmatpush1.bf16.msra.mxu1 %v7032_v59 }
 0x229   : > { %1868 = vmatprep.subr.bf16.mxu1 %v6538_v6 }
 0x22c   : > { %1869 = vmatpush1.bf16.msra.mxu1 %v7034_v27 }
 0x22d   : > { %1870 = vmatprep.subr.bf16.mxu1 %v6538_v6 }
 0x230   : > { %1871 = vmatpush1.bf16.msra.mxu1 %v7082_v29 }
 0x231   : > { %2079 = vmatprep.subr.bf16.mxu1 %v6538_v6 }
 0x233   : > { %1875 = vmatmul.mubr.bf16.vlgmr.msra.gmra.mrb[32].mxu1 %v6192_v37 }
 0x234   : > { %2080 = vmatpush1.bf16.msra.mxu1 %v6942_v60  ;;  %5111 = vmatprep.mubr.msk.bf16.mxu1 %vm890_vm5, %v6195_v44 }
 0x235   : > { %2081 = vmatprep.subr.bf16.mxu1 %v6538_v6 }
 0x238   : > { %2082 = vmatpush1.bf16.msra.mxu1 %v6945_v3 }
 0x239   : > { %2083 = vmatprep.subr.bf16.mxu1 %v6538_v6 }
 0x23b   : > { %1883 = vmatmul.mubr.bf16.gmra.mrb[36].mxu1 %v6197_v53  ;;  %v6224_v53 = vld [vmem:[%s8443_s3 + $0x18] sm:$0xff]  }
 0x23c   : > { %2084 = vmatpush1.bf16.msra.mxu1 %v6947_v7  ;;  %5112 = vmatprep.mubr.msk.bf16.mxu1 %vm890_vm5, %v6198_v14 }
 0x23d   : > { %2085 = vmatprep.subr.bf16.mxu1 %v6538_v6 }
 0x240   : > { %2086 = vmatpush1.bf16.msra.mxu1 %v6956_v16 }
 0x241   : > { %2087 = vmatprep.subr.bf16.mxu1 %v6538_v6 }
 0x243   : > { %1891 = vmatmul.mubr.bf16.gmra.mrb[40].mxu1 %v6200_v8 }
 0x244   : > { %2088 = vmatpush1.bf16.msra.mxu1 %v6962_v40  ;;  %5113 = vmatprep.mubr.msk.bf16.mxu1 %vm890_vm5, %v5109_v18  ;;  %v6225_v18 = vld [vmem:[%s8443_s3 + $0x40] sm:$0xff]  }
 0x245   : > { %2089 = vmatprep.subr.bf16.mxu1 %v6538_v6 }
 0x248   : > { %2090 = vmatpush1.bf16.msra.mxu1 %v6967_v39 }
 0x249   : > { %2091 = vmatprep.subr.bf16.mxu1 %v6538_v6 }
 0x24b   : > { %1899 = vmatmul.mubr.bf16.gmra.mrb[44].mxu1 %v5108_v51 }
 0x24c   : > { %2092 = vmatpush1.bf16.msra.mxu1 %v6972_v5  ;;  %5145 = vmatprep.mubr.msk.bf16.mxu1 %vm890_vm5, %v6205_v36  ;;  %v6216_v36 = vld [vmem:[%s8442_s2 + $0x188] ss:$8 sps:$4 sm:$0xff]  }
 0x24d   : > { %2093 = vmatprep.subr.bf16.mxu1 %v6538_v6 }
 0x250   : > { %2094 = vmatpush1.bf16.msra.mxu1 %v6982_v43 }
 0x251   : > { %2095 = vmatprep.subr.bf16.mxu1 %v6538_v6 }
 0x254   : > { %2096 = vmatpush1.bf16.msra.mxu1 %v7002_v57 }
 0x255   : > { %2097 = vmatprep.subr.bf16.mxu1 %v6538_v6 }
 0x258   : > { %2098 = vmatpush1.bf16.msra.mxu1 %v7010_v22 }
 0x259   : > { %2099 = vmatprep.subr.bf16.mxu1 %v6538_v6 }
 0x25c   : > { %2100 = vmatpush1.bf16.msra.mxu1 %v7016_v50 }
 0x25d   : > { %2101 = vmatprep.subr.bf16.mxu1 %v6538_v6 }
 0x260   : > { %2102 = vmatpush1.bf16.msra.mxu1 %v7026_v52 }
 0x261   : > { %2103 = vmatprep.subr.bf16.mxu1 %v6538_v6 }
 0x264   : > { %2104 = vmatpush1.bf16.msra.mxu1 %v7032_v59 }
 0x265   : > { %2105 = vmatprep.subr.bf16.mxu1 %v6538_v6 }
 0x268   : > { %2106 = vmatpush1.bf16.msra.mxu1 %v7034_v27 }
 0x269   : > { %2107 = vmatprep.subr.bf16.mxu1 %v6538_v6 }
 0x26c   : > { %2108 = vmatpush1.bf16.msra.mxu1 %v7082_v29 }
 0x26d   : > { %2553 = vmatprep.subr.bf16.mxu1 %v6538_v6 }
 0x26f   : > { %2112 = vmatmul.mubr.bf16.vlgmr.msra.gmra.mrb[48].mxu1 %v6203_v25 }
 0x270   : > { %2554 = vmatpush1.bf16.msra.mxu1 %v6942_v60  ;;  %5146 = vmatprep.mubr.msk.bf16.mxu1 %vm890_vm5, %v6206_v55 }
 0x271   : > { %2555 = vmatprep.subr.bf16.mxu1 %v6538_v6 }
 0x274   : > { %2556 = vmatpush1.bf16.msra.mxu1 %v6945_v3 }
 0x275   : > { %2557 = vmatprep.subr.bf16.mxu1 %v6538_v6 }
 0x277   : > { %2120 = vmatmul.mubr.bf16.gmra.mrb[52].mxu1 %v6208_v45 }
 0x278   : > { %2558 = vmatpush1.bf16.msra.mxu1 %v6947_v7  ;;  %5147 = vmatprep.mubr.msk.bf16.mxu1 %vm890_vm5, %v6209_v24 }
 0x279   : > { %2559 = vmatprep.subr.bf16.mxu1 %v6538_v6 }
 0x27c   : > { %2560 = vmatpush1.bf16.msra.mxu1 %v6956_v16 }
 0x27d   : > { %2561 = vmatprep.subr.bf16.mxu1 %v6538_v6 }
 0x27f   : > { %2128 = vmatmul.mubr.bf16.gmra.mrb[56].mxu1 %v6211_v58 }
 0x280   : > { %2562 = vmatpush1.bf16.msra.mxu1 %v6962_v40  ;;  %5148 = vmatprep.mubr.msk.bf16.mxu1 %vm890_vm5, %v5144_v30 }
 0x281   : > { %2563 = vmatprep.subr.bf16.mxu1 %v6538_v6 }
 0x284   : > { %2564 = vmatpush1.bf16.msra.mxu1 %v6967_v39 }
 0x285   : > { %2565 = vmatprep.subr.bf16.mxu1 %v6538_v6 }
 0x287   : > { %2136 = vmatmul.mubr.bf16.gmra.mrb[60].mxu1 %v5143_v56  ;;  %v6226_v56 = vld [vmem:[%s8443_s3 + $0x48] sm:$0xff]  }
 0x288   : > { %2566 = vmatpush1.bf16.msra.mxu1 %v6972_v5  ;;  %5215 = vmatprep.mubr.msk.bf16.mxu1 %vm890_vm5, %v6218_v61  ;;  %v6227_v61 = vld [vmem:[%s8443_s3 + $0x50] sm:$0xff]  }
 0x289   : > { %2567 = vmatprep.subr.bf16.mxu1 %v6538_v6 }
 0x28c   : > { %2568 = vmatpush1.bf16.msra.mxu1 %v6982_v43 }
 0x28d   : > { %2569 = vmatprep.subr.bf16.mxu1 %v6538_v6 }
 0x28e   : > { %v1072_v2 = vpop.f32.mrb[0].mxu1  ;;  %v7332_v9 = vpop.f32.mrb[60].mxu0 }
 0x28f   : > { %v1074_v10 = vpop.f32.mrb[1].mxu1  ;;  %v945_v11 = vpop.f32.mrb[61].mxu0 }
 0x290   : > { %2570 = vmatpush1.bf16.msra.mxu1 %v7002_v57  ;;  %v1075_v12 = vpop.f32.mrb[2].mxu1  ;;  %v7335_v13 = vpop.f32.mrb[62].mxu0 }
 0x291   : > { %2571 = vmatprep.subr.bf16.mxu1 %v6538_v6  ;;  %v1102_v17 = vpack.c.bf16 %v1075_v12, %v1072_v2  ;;  %v1077_v23 = vpop.f32.mrb[3].mxu1  ;;  %v973_v26 = vpack.c.bf16 %v7335_v13, %v7332_v9  ;;  %v948_v35 = vpop.f32.mrb[63].mxu0  ;;  %v6228_v9 = vld [vmem:[%s8443_s3 + $0x58] sm:$0xff]  }
 0x293   : > { %5788 = vmatprep.mubr.msk.bf16.mxu0 %vm583_vm4, %v1102_v17 }
 0x294   : > { %2572 = vmatpush1.bf16.msra.mxu1 %v7010_v22 }
 0x295   : > { %2573 = vmatprep.subr.bf16.mxu1 %v6538_v6 }
 0x296   : > { %v1080_v19 = vpop.f32.mrb[4].mxu1  ;;  %v951_v21 = vpop.f32.mrb[64].mxu0 }
 0x297   : > { %v1082_v32 = vpop.f32.mrb[5].mxu1  ;;  %v953_v49 = vpop.f32.mrb[65].mxu0 }
 0x298   : > { %2574 = vmatpush1.bf16.msra.mxu1 %v7016_v50  ;;  %v1083_v33 = vpop.f32.mrb[6].mxu1  ;;  %v954_v34 = vpop.f32.mrb[66].mxu0 }
 0x299   : > { %2575 = vmatprep.subr.bf16.mxu1 %v6538_v6  ;;  %v1103_v54 = vpack.c.bf16 %v1083_v33, %v1080_v19  ;;  %v1085_v63 = vpop.f32.mrb[7].mxu1  ;;  %v974_v15 = vpack.c.bf16 %v954_v34, %v951_v21  ;;  %v956_v20 = vpop.f32.mrb[67].mxu0 }
 0x29b   : > { %5789 = vmatmul.mubr.msk.bf16.vlgmr.msra.gmra.mrb[76].mxu0 %vm583_vm4, %v1103_v54 }
 0x29c   : > { %2576 = vmatpush1.bf16.msra.mxu1 %v7026_v52  ;;  %5797 = vmatpush3.bf16.msra.mxu0 %v7241_v62 }
 0x29d   : > { %2577 = vmatprep.subr.bf16.mxu1 %v6538_v6  ;;  %5798 = vmatprep.subr.bf16.mxu0 %v6222_v41 }
 0x29e   : > { %v1088_v31 = vpop.f32.mrb[8].mxu1  ;;  %v959_v46 = vpop.f32.mrb[68].mxu0 }
 0x29f   : > { %v1090_v38 = vpop.f32.mrb[9].mxu1  ;;  %v961_v48 = vpop.f32.mrb[69].mxu0 }
 0x2a0   : > { %2578 = vmatpush1.bf16.msra.mxu1 %v7032_v59  ;;  %v1091_v37 = vpop.f32.mrb[10].mxu1  ;;  %5799 = vmatpush3.bf16.msra.mxu0 %v6222_v41  ;;  %v962_v44 = vpop.f32.mrb[70].mxu0  ;;  %v6231_v41 = vld [vmem:[%s8442_s2 + $0xac] ss:$8 sps:$4 sm:$0xff]  }
 0x2a1   : > { %2579 = vmatprep.subr.bf16.mxu1 %v6538_v6  ;;  %v1104_v47 = vpack.c.bf16 %v1091_v37, %v1088_v31  ;;  %v1093_v62 = vpop.f32.mrb[11].mxu1  ;;  %5800 = vmatprep.subr.bf16.mxu0 %v6223_v42  ;;  %v975_v14 = vpack.c.bf16 %v962_v44, %v959_v46  ;;  %v964_v0 = vpop.f32.mrb[71].mxu0 }
 0x2a2   : > { %v6229_v62 = vld [vmem:[%s8442_s2 + $0xa8] ss:$8 sps:$4 sm:$0xff]   ;;  %v6234_v0 = vld [vmem:[%s8442_s2 + $0xb8] ss:$8 sps:$4 sm:$0xff]  }
 0x2a3   : > { %5792 = vmatprep.mubr.msk.bf16.mxu0 %vm583_vm4, %v1104_v47  ;;  %v6240_v47 = vld [vmem:[%s8443_s3 + $0x60] sm:$0xff]  }
 0x2a4   : > { %2580 = vmatpush1.bf16.msra.mxu1 %v7034_v27  ;;  %5801 = vmatpush3.bf16.msra.mxu0 %v6223_v42 }
 0x2a5   : > { %2581 = vmatprep.subr.bf16.mxu1 %v6538_v6  ;;  %5802 = vmatprep.subr.bf16.mxu0 %v6224_v53 }
 0x2a6   : > { %v1096_v8 = vpop.f32.mrb[12].mxu1  ;;  %v967_v51 = vpop.f32.mrb[72].mxu0 }
 0x2a7   : > { %v1105_v25 = vpack.c.bf16 %v1096_v8, %v1096_v8  ;;  %v1098_v55 = vpop.f32.mrb[13].mxu1  ;;  %v969_v45 = vpop.f32.mrb[73].mxu0  ;;  %v976_v2 = vpack.c.bf16 %v967_v51, %v967_v51  ;;  %v6235_v8 = vld [vmem:[%s8442_s2 + $0xcc] ss:$8 sps:$4 sm:$0xff]   ;;  %v6237_v51 = vld [vmem:[%s8442_s2 + $0xc8] ss:$8 sps:$4 sm:$0xff]  }
 0x2a8   : > { %2582 = vmatpush1.bf16.msra.mxu1 %v7082_v29  ;;  %5803 = vmatpush3.bf16.msra.mxu0 %v6224_v53  ;;  %v1099_v24 = vpop.f32.mrb[14].mxu1  ;;  %v970_v4 = vpop.f32.mrb[74].mxu0  ;;  %v6232_v53 = vld [vmem:[%s8442_s2 + $0xbc] ss:$8 sps:$4 sm:$0xff]   ;;  %v6242_v55 = vld [vmem:[%s8443_s3 + $0x70] sm:$0xff]  }
 0x2a9   : > { %2790 = vmatprep.subr.bf16.mxu1 %v6538_v6  ;;  %5793 = vmatmul.mubr.msk.bf16.gmra.mrb[80].mxu0 %vm583_vm4, %v1105_v25  ;;  %v1100_v58 = vpop.f32.mrb[15].mxu1  ;;  %v971_v30 = vpop.f32.mrb[75].mxu0  ;;  %v6243_v45 = vld [vmem:[%s8443_s3 + $0x78] sm:$0xff]   ;;  %v7494_v24 = vld [vmem:[%s8443_s3 + $0x80] sm:$0xff]  }
 0x2aa   : > { %5804 = vmatprep.mubr.msk.bf16.mxu0 %vm583_vm4, %v973_v26  ;;  %5812 = vmatprep.subr.bf16.mxu0 %v6225_v18 }
 0x2ab   : > { %2586 = vmatmul.mubr.bf16.vlgmr.msra.gmra.mrb[64].mxu1 %v6216_v36 }
 0x2ac   : > { %2791 = vmatpush1.bf16.msra.mxu1 %v6942_v60 }
 0x2ad   : > { %2792 = vmatprep.subr.bf16.mxu1 %v6538_v6 }
 0x2b0   : > { %2793 = vmatpush1.bf16.msra.mxu1 %v6945_v3 }
 0x2b1   : > { %2794 = vmatprep.subr.bf16.mxu1 %v6538_v6  ;;  %5805 = vmatmul.mubr.msk.bf16.vlgmr.msra.gmra.mrb[76].mxu0 %vm583_vm4, %v974_v15 }
 0x2b2   : > { %5813 = vmatpush3.bf16.msra.mxu0 %v6225_v18  ;;  %5808 = vmatprep.mubr.msk.bf16.mxu0 %vm583_vm4, %v975_v14  ;;  %v6241_v14 = vld [vmem:[%s8443_s3 + $0x68] sm:$0xff]   ;;  %v5066_v18 = vld [vmem:[%s8442_s2 + $0xd8] sm:$0x11] }
 0x2b3   : > { %5814 = vmatprep.subr.bf16.mxu0 %v6226_v56  ;;  %v5074_v36 = vcombine.high %v5066_v18, %v5066_v18  ;;  %v5073_v25 = vcombine.low %v5066_v18, %v5066_v18  ;;  %v6266_v18 = vld [vmem:[%s8442_s2 + $0x1a8] ss:$8 sps:$4 sm:$0xff]  }
 0x2b4   : > { %2795 = vmatpush1.bf16.msra.mxu1 %v6947_v7 }
 0x2b5   : > { %2796 = vmatprep.subr.bf16.mxu1 %v6538_v6 }
 0x2b6   : > { %5815 = vmatpush3.bf16.msra.mxu0 %v6226_v56 }
 0x2b7   : > { %5816 = vmatprep.subr.bf16.mxu0 %v6227_v61 }
 0x2b8   : > { %2797 = vmatpush1.bf16.msra.mxu1 %v6956_v16 }
 0x2b9   : > { %2798 = vmatprep.subr.bf16.mxu1 %v6538_v6  ;;  %5809 = vmatmul.mubr.msk.bf16.gmra.mrb[80].mxu0 %vm583_vm4, %v976_v2 }
 0x2ba   : > { %5817 = vmatpush3.bf16.msra.mxu0 %v6227_v61 }
 0x2bb   : > { %5818 = vmatprep.subr.bf16.mxu0 %v6228_v9 }
 0x2bc   : > { %2799 = vmatpush1.bf16.msra.mxu1 %v6962_v40 }
 0x2bd   : > { %2800 = vmatprep.subr.bf16.mxu1 %v6538_v6 }
 0x2be   : > { %5819 = vmatpush3.bf16.msra.mxu0 %v6228_v9 }
 0x2bf   : > { %1605 = vmatprep.subr.bf16.mxu0 %v6538_v6 }
 0x2c0   : > { %2801 = vmatpush1.bf16.msra.mxu1 %v6967_v39 }
 0x2c1   : > { %2802 = vmatprep.subr.bf16.mxu1 %v6538_v6 }
 0x2c4   : > { %2803 = vmatpush1.bf16.msra.mxu1 %v6972_v5 }
 0x2c5   : > { %2804 = vmatprep.subr.bf16.mxu1 %v6538_v6 }
 0x2c8   : > { %2805 = vmatpush1.bf16.msra.mxu1 %v6982_v43 }
 0x2c9   : > { %2806 = vmatprep.subr.bf16.mxu1 %v6538_v6 }
 0x2ca   : > { %v1402_v10 = vpop.f32.mrb[16].mxu1 }
 0x2cb   : > { %v1404_v11 = vpop.f32.mrb[17].mxu1 }
 0x2cc   : > { %2807 = vmatpush1.bf16.msra.mxu1 %v7002_v57  ;;  %v1405_v12 = vpop.f32.mrb[18].mxu1 }
 0x2cd   : > { %2808 = vmatprep.subr.bf16.mxu1 %v6538_v6  ;;  %v1432_v13 = vpack.c.bf16 %v1405_v12, %v1402_v10  ;;  %v1407_v17 = vpop.f32.mrb[19].mxu1 }
 0x2cf   : > { %5820 = vmatprep.mubr.msk.bf16.mxu0 %vm583_vm4, %v1432_v13 }
 0x2d0   : > { %2809 = vmatpush1.bf16.msra.mxu1 %v7010_v22 }
 0x2d1   : > { %2810 = vmatprep.subr.bf16.mxu1 %v6538_v6 }
 0x2d2   : > { %v1410_v23 = vpop.f32.mrb[20].mxu1 }
 0x2d3   : > { %v1412_v26 = vpop.f32.mrb[21].mxu1 }
 0x2d4   : > { %v1413_v35 = vpop.f32.mrb[22].mxu1  ;;  %2811 = vmatpush1.bf16.msra.mxu1 %v7016_v50 }
 0x2d5   : > { %v1433_v19 = vpack.c.bf16 %v1413_v35, %v1410_v23  ;;  %2812 = vmatprep.subr.bf16.mxu1 %v6538_v6  ;;  %v1415_v21 = vpop.f32.mrb[23].mxu1 }
 0x2d7   : > { %5821 = vmatmul.mubr.msk.bf16.vlgmr.msra.gmra.mrb[76].mxu0 %vm583_vm4, %v1433_v19 }
 0x2d8   : > { %1606 = vmatpush1.bf16.msra.mxu0 %v6942_v60  ;;  %2813 = vmatpush1.bf16.msra.mxu1 %v7026_v52 }
 0x2d9   : > { %1607 = vmatprep.subr.bf16.mxu0 %v6538_v6  ;;  %2814 = vmatprep.subr.bf16.mxu1 %v6538_v6 }
 0x2da   : > { %v1418_v32 = vpop.f32.mrb[24].mxu1 }
 0x2db   : > { %v1420_v49 = vpop.f32.mrb[25].mxu1 }
 0x2dc   : > { %1608 = vmatpush1.bf16.msra.mxu0 %v6945_v3  ;;  %2815 = vmatpush1.bf16.msra.mxu1 %v7032_v59  ;;  %v1421_v33 = vpop.f32.mrb[26].mxu1 }
 0x2dd   : > { %1609 = vmatprep.subr.bf16.mxu0 %v6538_v6  ;;  %2816 = vmatprep.subr.bf16.mxu1 %v6538_v6  ;;  %v1434_v34 = vpack.c.bf16 %v1421_v33, %v1418_v32  ;;  %v1423_v54 = vpop.f32.mrb[27].mxu1 }
 0x2df   : > { %5824 = vmatprep.mubr.msk.bf16.mxu0 %vm583_vm4, %v1434_v34 }
 0x2e0   : > { %1610 = vmatpush1.bf16.msra.mxu0 %v6947_v7  ;;  %2817 = vmatpush1.bf16.msra.mxu1 %v7034_v27 }
 0x2e1   : > { %1611 = vmatprep.subr.bf16.mxu0 %v6538_v6  ;;  %2818 = vmatprep.subr.bf16.mxu1 %v6538_v6 }
 0x2e2   : > { %v1426_v63 = vpop.f32.mrb[28].mxu1 }
 0x2e3   : > { %v1435_v15 = vpack.c.bf16 %v1426_v63, %v1426_v63  ;;  %v1428_v20 = vpop.f32.mrb[29].mxu1 }
 0x2e4   : > { %1612 = vmatpush1.bf16.msra.mxu0 %v6956_v16  ;;  %2819 = vmatpush1.bf16.msra.mxu1 %v7082_v29  ;;  %v1429_v42 = vpop.f32.mrb[30].mxu1 }
 0x2e5   : > { %1613 = vmatprep.subr.bf16.mxu0 %v6538_v6  ;;  %5825 = vmatmul.mubr.msk.bf16.gmra.mrb[80].mxu0 %vm583_vm4, %v1435_v15  ;;  %v1430_v31 = vpop.f32.mrb[31].mxu1 }
 0x2e6   : > { %5075 = vmatprep.mubr.msk.bf16.mxu0 %vm890_vm5, %v6231_v41 }
 0x2e8   : > { %1614 = vmatpush1.bf16.msra.mxu0 %v6962_v40 }
 0x2e9   : > { %1615 = vmatprep.subr.bf16.mxu0 %v6538_v6 }
 0x2ec   : > { %1616 = vmatpush1.bf16.msra.mxu0 %v6967_v39 }
 0x2ed   : > { %1617 = vmatprep.subr.bf16.mxu0 %v6538_v6 }
 0x2f0   : > { %1618 = vmatpush1.bf16.msra.mxu0 %v6972_v5 }
 0x2f1   : > { %1619 = vmatprep.subr.bf16.mxu0 %v6538_v6 }
 0x2f4   : > { %1620 = vmatpush1.bf16.msra.mxu0 %v6982_v43 }
 0x2f5   : > { %1621 = vmatprep.subr.bf16.mxu0 %v6538_v6 }
 0x2f8   : > { %1622 = vmatpush1.bf16.msra.mxu0 %v7002_v57 }
 0x2f9   : > { %1623 = vmatprep.subr.bf16.mxu0 %v6538_v6 }
 0x2fc   : > { %1624 = vmatpush1.bf16.msra.mxu0 %v7010_v22 }
 0x2fd   : > { %1625 = vmatprep.subr.bf16.mxu0 %v6538_v6 }
 0x300   : > { %1626 = vmatpush1.bf16.msra.mxu0 %v7016_v50 }
 0x301   : > { %1627 = vmatprep.subr.bf16.mxu0 %v6538_v6 }
 0x304   : > { %1628 = vmatpush1.bf16.msra.mxu0 %v7026_v52 }
 0x305   : > { %1629 = vmatprep.subr.bf16.mxu0 %v6538_v6 }
 0x306   : > { %v7447_v46 = vpop.f32.mrb[32].mxu1 }
 0x307   : > { %v1878_v38 = vpop.f32.mrb[33].mxu1 }
 0x308   : > { %1630 = vmatpush1.bf16.msra.mxu0 %v7032_v59  ;;  %v7450_v48 = vpop.f32.mrb[34].mxu1 }
 0x309   : > { %1631 = vmatprep.subr.bf16.mxu0 %v6538_v6  ;;  %v1906_v37 = vpack.c.bf16 %v7450_v48, %v7447_v46  ;;  %v1881_v44 = vpop.f32.mrb[35].mxu1  ;;  %v6250_v46 = vld [vmem:[%s8443_s3 + $0xb0] sm:$0xff]  }
 0x30c   : > { %1632 = vmatpush1.bf16.msra.mxu0 %v7034_v27 }
 0x30d   : > { %1633 = vmatprep.subr.bf16.mxu0 %v6538_v6 }
 0x30e   : > { %v7497_v4 = vpop.f32.mrb[36].mxu1 }
 0x30f   : > { %v1886_v58 = vpop.f32.mrb[37].mxu1 }
 0x310   : > { %1634 = vmatpush1.bf16.msra.mxu0 %v7082_v29  ;;  %v7499_v30 = vpop.f32.mrb[38].mxu1 }
 0x311   : > { %5828 = vmatprep.subr.bf16.mxu0 %v6240_v47  ;;  %v1907_v56 = vpack.c.bf16 %v7499_v30, %v7497_v4  ;;  %v1889_v61 = vpop.f32.mrb[39].mxu1  ;;  %v6251_v4 = vld [vmem:[%s8443_s3 + $0xb8] sm:$0xff]  }
 0x313   : > { %1638 = vmatmul.mubr.bf16.vlgmr.msra.gmra.mrb[84].mxu0 %v6229_v62 }
 0x314   : > { %5076 = vmatprep.mubr.msk.bf16.mxu0 %vm890_vm5, %v6232_v53  ;;  %5829 = vmatpush3.bf16.msra.mxu0 %v6240_v47 }
 0x315   : > { %5830 = vmatprep.subr.bf16.mxu0 %v6241_v14 }
 0x316   : > { %v7503_v2 = vpop.f32.mrb[40].mxu1 }
 0x317   : > { %v1894_v9 = vpop.f32.mrb[41].mxu1 }
 0x318   : > { %5831 = vmatpush3.bf16.msra.mxu0 %v6241_v14  ;;  %v7505_v10 = vpop.f32.mrb[42].mxu1  ;;  %v6257_v14 = vld [vmem:[%s8442_s2 + $0x19c] ss:$8 sps:$4 sm:$0xff]  }
 0x319   : > { %5832 = vmatprep.subr.bf16.mxu0 %v6242_v55  ;;  %v1908_v11 = vpack.c.bf16 %v7505_v10, %v7503_v2  ;;  %v1897_v12 = vpop.f32.mrb[43].mxu1  ;;  %5216 = vmatprep.mubr.msk.bf16.mxu1 %vm890_vm5, %v6257_v14  ;;  %v6274_v14 = vld [vmem:[%s8442_s2 + $0x1d4] ss:$8 sps:$4 sm:$0xff]  }
 0x31a   : > { %v6273_v12 = vld [vmem:[%s8442_s2 + $0x1c4] ss:$8 sps:$4 sm:$0xff]  }
 0x31b   : > { %1646 = vmatmul.mubr.bf16.gmra.mrb[88].mxu0 %v6234_v0  ;;  %v6260_v0 = vld [vmem:[%s8442_s2 + $0x198] ss:$8 sps:$4 sm:$0xff]  }
 0x31c   : > { %5077 = vmatprep.mubr.msk.bf16.mxu0 %vm890_vm5, %v6235_v8  ;;  %5833 = vmatpush3.bf16.msra.mxu0 %v6242_v55  ;;  %v6263_v8 = vld [vmem:[%s8442_s2 + $0x1ac] ss:$8 sps:$4 sm:$0xff]  }
 0x31d   : > { %5834 = vmatprep.subr.bf16.mxu0 %v6243_v45  ;;  %2594 = vmatmul.mubr.bf16.gmra.mrb[68].mxu1 %v6260_v0  ;;  %v6246_v0 = vld [vmem:[%s8443_s3 + $0x90] sm:$0xff]  }
 0x31e   : > { %v7509_v13 = vpop.f32.mrb[44].mxu1  ;;  %5217 = vmatprep.mubr.msk.bf16.mxu1 %vm890_vm5, %v6263_v8 }
 0x31f   : > { %v1902_v17 = vpop.f32.mrb[45].mxu1 }
 0x320   : > { %5835 = vmatpush3.bf16.msra.mxu0 %v6243_v45  ;;  %v1903_v23 = vpop.f32.mrb[46].mxu1 }
 0x321   : > { %5844 = vmatprep.subr.bf16.mxu0 %v7494_v24  ;;  %v1904_v26 = vpop.f32.mrb[47].mxu1 }
 0x323   : > { %1654 = vmatmul.mubr.bf16.gmra.mrb[92].mxu0 %v6237_v51 }
 0x324   : > { %5078 = vmatprep.mubr.msk.bf16.mxu0 %vm890_vm5, %v5074_v36  ;;  %v5206_v36 = vld [vmem:[%s8442_s2 + $0x1b8] sm:$0x11] }
 0x325   : > { %2602 = vmatmul.mubr.bf16.gmra.mrb[72].mxu1 %v6266_v18  ;;  %v5214_v55 = vcombine.high %v5206_v36, %v5206_v36  ;;  %v5213_v9 = vcombine.low %v5206_v36, %v5206_v36 }
 0x327   : > { %5218 = vmatprep.mubr.msk.bf16.mxu1 %vm890_vm5, %v5214_v55  ;;  %v6276_v55 = vld [vmem:[%s8442_s2 + $0x1d0] ss:$8 sps:$4 sm:$0xff]  }
 0x32b   : > { %1662 = vmatmul.mubr.bf16.gmra.mrb[96].mxu0 %v5073_v25 }
 0x32d   : > { %2610 = vmatmul.mubr.bf16.gmra.mrb[76].mxu1 %v5213_v9 }
 0x32e   : > { %5250 = vmatprep.mubr.msk.bf16.mxu1 %vm890_vm5, %v6273_v12 }
 0x342   : > { %v7511_v35 = vpop.f32.mrb[48].mxu1 }
 0x343   : > { %v2115_v19 = vpop.f32.mrb[49].mxu1 }
 0x344   : > { %v7513_v21 = vpop.f32.mrb[50].mxu1 }
 0x345   : > { %v2143_v32 = vpack.c.bf16 %v7513_v21, %v7511_v35  ;;  %v2118_v49 = vpop.f32.mrb[51].mxu1 }
 0x34a   : > { %v7517_v33 = vpop.f32.mrb[52].mxu1 }
 0x34b   : > { %v2123_v34 = vpop.f32.mrb[53].mxu1 }
 0x34c   : > { %v7519_v54 = vpop.f32.mrb[54].mxu1 }
 0x34d   : > { %v2144_v63 = vpack.c.bf16 %v7519_v54, %v7517_v33  ;;  %v2126_v41 = vpop.f32.mrb[55].mxu1 }
 0x352   : > { %v7523_v15 = vpop.f32.mrb[56].mxu1 }
 0x353   : > { %v2131_v20 = vpop.f32.mrb[57].mxu1 }
 0x354   : > { %v7525_v42 = vpop.f32.mrb[58].mxu1 }
 0x355   : > { %v2145_v31 = vpack.c.bf16 %v7525_v42, %v7523_v15  ;;  %v2134_v38 = vpop.f32.mrb[59].mxu1 }
 0x356   : > { %v6245_v38 = vld [vmem:[%s8443_s3 + $0x88] sm:$0xff]  }
 0x35a   : > { %v7529_v44 = vpop.f32.mrb[60].mxu1 }
 0x35b   : > { %v2139_v47 = vpop.f32.mrb[61].mxu1  ;;  %v2146_v30 = vpack.c.bf16 %v7529_v44, %v7529_v44 }
 0x35c   : > { %v2140_v62 = vpop.f32.mrb[62].mxu1 }
 0x35d   : > { %v2141_v53 = vpop.f32.mrb[63].mxu1 }
 0x35e   : > { %v6271_v53 = vld [vmem:[%s8442_s2 + $0x1c0] ss:$8 sps:$4 sm:$0xff]  }
 0x35f   : > { %2823 = vmatmul.mubr.bf16.vlgmr.msra.gmra.mrb[80].mxu1 %v6271_v53 }
 0x360   : > { %5251 = vmatprep.mubr.msk.bf16.mxu1 %vm890_vm5, %v6274_v14 }
 0x367   : > { %2831 = vmatmul.mubr.bf16.gmra.mrb[84].mxu1 %v6276_v55 }
 0x37e   : > { %v7553_v23 = vpop.f32.mrb[64].mxu1 }
 0x37f   : > { %v2589_v19 = vpop.f32.mrb[65].mxu1 }
 0x380   : > { %v7556_v34 = vpop.f32.mrb[66].mxu1  ;;  %v5241_v19 = vld [vmem:[%s8442_s2 + $0x1f0] sm:$0x11] }
 0x381   : > { %v2617_v47 = vpack.c.bf16 %v7556_v34, %v7553_v23  ;;  %v2592_v62 = vpop.f32.mrb[67].mxu1  ;;  %v5248_v48 = vcombine.low %v5241_v19, %v5241_v19  ;;  %v6292_v23 = vld [vmem:[%s8443_s3 + $0x110] sm:$0xff]  }
 0x3e6   : > { %v1639_v51 = vpop.f32.mrb[84].mxu0 }
 0x3e7   : > { %v1641_v25 = vpop.f32.mrb[85].mxu0 }
 0x3e8   : > { %v1642_v45 = vpop.f32.mrb[86].mxu0 }
 0x3e9   : > { %v1669_v58 = vpack.c.bf16 %v1642_v45, %v1639_v51  ;;  %v1644_v61 = vpop.f32.mrb[87].mxu0  ;;  %v6277_v45 = vld [vmem:[%s8442_s2 + $0x1e4] ss:$8 sps:$4 sm:$0xff]  }
 0x3ea   : > { %5252 = vmatprep.mubr.msk.bf16.mxu1 %vm890_vm5, %v6277_v45 }
 0x3eb   : > { %5836 = vmatprep.mubr.msk.bf16.mxu0 %vm583_vm4, %v1669_v58  ;;  %v6248_v58 = vld [vmem:[%s8443_s3 + $0xa0] sm:$0xff]  }
 0x3ee   : > { %v1647_v17 = vpop.f32.mrb[88].mxu0 }
 0x3ef   : > { %v1649_v26 = vpop.f32.mrb[89].mxu0 }
 0x3f0   : > { %v1650_v49 = vpop.f32.mrb[90].mxu0 }
 0x3f1   : > { %v1670_v41 = vpack.c.bf16 %v1650_v49, %v1647_v17  ;;  %v1652_v20 = vpop.f32.mrb[91].mxu0  ;;  %v6279_v49 = vld [vmem:[%s8442_s2 + $0x1e0] ss:$8 sps:$4 sm:$0xff]  }
 0x3f2   : > { %v6249_v20 = vld [vmem:[%s8443_s3 + $0xa8] sm:$0xff]   ;;  %2839 = vmatmul.mubr.bf16.gmra.mrb[88].mxu1 %v6279_v49 }
 0x3f3   : > { %5837 = vmatmul.mubr.msk.bf16.vlgmr.msra.gmra.mrb[76].mxu0 %vm583_vm4, %v1670_v41  ;;  %v5249_v41 = vcombine.high %v5241_v19, %v5241_v19 }
 0x3f4   : > { %5845 = vmatpush3.bf16.msra.mxu0 %v7494_v24  ;;  %v6247_v24 = vld [vmem:[%s8443_s3 + $0x98] sm:$0xff]  }
 0x3f5   : > { %5846 = vmatprep.subr.bf16.mxu0 %v6245_v38  ;;  %5253 = vmatprep.mubr.msk.bf16.mxu1 %vm890_vm5, %v5249_v41 }
 0x3f6   : > { %v1655_v8 = vpop.f32.mrb[92].mxu0 }
 0x3f7   : > { %v1657_v18 = vpop.f32.mrb[93].mxu0 }
 0x3f8   : > { %v1658_v51 = vpop.f32.mrb[94].mxu0  ;;  %5847 = vmatpush3.bf16.msra.mxu0 %v6245_v38 }
 0x3f9   : > { %v1671_v36 = vpack.c.bf16 %v1658_v51, %v1655_v8  ;;  %v1660_v25 = vpop.f32.mrb[95].mxu0  ;;  %5848 = vmatprep.subr.bf16.mxu0 %v6246_v0 }
 0x3fa   : > { %2847 = vmatmul.mubr.bf16.gmra.mrb[92].mxu1 %v5248_v48 }
 0x3fb   : > { %5840 = vmatprep.mubr.msk.bf16.mxu0 %vm583_vm4, %v1671_v36  ;;  %3417 = vmatprep.mubr.bf16.mxu1 %v6538_v6 }
 0x3fc   : > { %5849 = vmatpush3.bf16.msra.mxu0 %v6246_v0 }
 0x3fd   : > { %5850 = vmatprep.subr.bf16.mxu0 %v6247_v24 }
 0x3fe   : > { %v1663_v61 = vpop.f32.mrb[96].mxu0 }
 0x3ff   : > { %v1672_v9 = vpack.c.bf16 %v1663_v61, %v1663_v61  ;;  %v1665_v12 = vpop.f32.mrb[97].mxu0 }
 0x400   : > { %5851 = vmatpush3.bf16.msra.mxu0 %v6247_v24  ;;  %v1666_v17 = vpop.f32.mrb[98].mxu0 }
 0x401   : > { %5841 = vmatmul.mubr.msk.bf16.gmra.mrb[80].mxu0 %vm583_vm4, %v1672_v9  ;;  %5860 = vmatprep.subr.bf16.mxu0 %v6248_v58  ;;  %v1667_v26 = vpop.f32.mrb[99].mxu0 }
 0x402   : > { %5852 = vmatprep.mubr.msk.bf16.mxu0 %vm583_vm4, %v1906_v37  ;;  %v1909_v37 = vpack.c.bf16 %v7509_v13, %v7509_v13 }
 0x409   : > { %5853 = vmatmul.mubr.msk.bf16.vlgmr.msra.gmra.mrb[76].mxu0 %vm583_vm4, %v1907_v56  ;;  %v6254_v56 = vld [vmem:[%s8442_s2 + $0x154] ss:$8 sps:$4 sm:$0xff]  }
 0x40a   : > { %5861 = vmatpush3.bf16.msra.mxu0 %v6248_v58  ;;  %5856 = vmatprep.mubr.msk.bf16.mxu0 %vm583_vm4, %v1908_v11 }
 0x40b   : > { %5862 = vmatprep.subr.bf16.mxu0 %v6249_v20 }
 0x40e   : > { %5863 = vmatpush3.bf16.msra.mxu0 %v6249_v20 }
 0x40f   : > { %5864 = vmatprep.subr.bf16.mxu0 %v6250_v46 }
 0x411   : > { %5857 = vmatmul.mubr.msk.bf16.gmra.mrb[80].mxu0 %vm583_vm4, %v1909_v37 }
 0x412   : > { %5865 = vmatpush3.bf16.msra.mxu0 %v6250_v46  ;;  %5868 = vmatprep.mubr.msk.bf16.mxu0 %vm583_vm4, %v2143_v32 }
 0x413   : > { %5866 = vmatprep.subr.bf16.mxu0 %v6251_v4 }
 0x416   : > { %5867 = vmatpush3.bf16.msra.mxu0 %v6251_v4 }
 0x417   : > { %2316 = vmatprep.subr.bf16.mxu0 %v6538_v6 }
 0x419   : > { %5869 = vmatmul.mubr.msk.bf16.vlgmr.msra.gmra.mrb[76].mxu0 %vm583_vm4, %v2144_v63 }
 0x41a   : > { %2317 = vmatpush1.bf16.msra.mxu0 %v6942_v60  ;;  %5872 = vmatprep.mubr.msk.bf16.mxu0 %vm583_vm4, %v2145_v31  ;;  %v6282_v60 = vld [vmem:[%s8443_s3 + $0xc0] sm:$0xff]  }
 0x41b   : > { %2318 = vmatprep.subr.bf16.mxu0 %v6538_v6 }
 0x41e   : > { %2319 = vmatpush1.bf16.msra.mxu0 %v6945_v3  ;;  %v6252_v3 = vld [vmem:[%s8442_s2 + $0x150] ss:$8 sps:$4 sm:$0xff]  }
 0x41f   : > { %2320 = vmatprep.subr.bf16.mxu0 %v6538_v6 }
 0x421   : > { %5873 = vmatmul.mubr.msk.bf16.gmra.mrb[80].mxu0 %vm583_vm4, %v2146_v30  ;;  %v6287_v30 = vld [vmem:[%s8443_s3 + $0xe8] sm:$0xff]  }
 0x422   : > { %2321 = vmatpush1.bf16.msra.mxu0 %v6947_v7  ;;  %5180 = vmatprep.mubr.msk.bf16.mxu0 %vm890_vm5, %v6254_v56  ;;  %v6255_v7 = vld [vmem:[%s8442_s2 + $0x164] ss:$8 sps:$4 sm:$0xff]   ;;  %v6288_v56 = vld [vmem:[%s8443_s3 + $0xf0] sm:$0xff]  }
 0x423   : > { %2322 = vmatprep.subr.bf16.mxu0 %v6538_v6 }
 0x426   : > { %2323 = vmatpush1.bf16.msra.mxu0 %v6956_v16  ;;  %v6283_v16 = vld [vmem:[%s8443_s3 + $0xc8] sm:$0xff]  }
 0x427   : > { %2324 = vmatprep.subr.bf16.mxu0 %v6538_v6 }
 0x42a   : > { %2325 = vmatpush1.bf16.msra.mxu0 %v6962_v40  ;;  %v6259_v40 = vld [vmem:[%s8442_s2 + $0x160] ss:$8 sps:$4 sm:$0xff]  }
 0x42b   : > { %2326 = vmatprep.subr.bf16.mxu0 %v6538_v6 }
 0x42e   : > { %2327 = vmatpush1.bf16.msra.mxu0 %v6967_v39  ;;  %v6261_v39 = vld [vmem:[%s8442_s2 + $0x174] ss:$8 sps:$4 sm:$0xff]  }
 0x42f   : > { %2328 = vmatprep.subr.bf16.mxu0 %v6538_v6 }
 0x432   : > { %2329 = vmatpush1.bf16.msra.mxu0 %v6972_v5  ;;  %v5171_v5 = vld [vmem:[%s8442_s2 + $0x180] sm:$0x11] }
 0x433   : > { %2330 = vmatprep.subr.bf16.mxu0 %v6538_v6 }
 0x436   : > { %2331 = vmatpush1.bf16.msra.mxu0 %v6982_v43  ;;  %v6265_v43 = vld [vmem:[%s8442_s2 + $0x170] ss:$8 sps:$4 sm:$0xff]  }
 0x437   : > { %2332 = vmatprep.subr.bf16.mxu0 %v6538_v6 }
 0x43a   : > { %2333 = vmatpush1.bf16.msra.mxu0 %v7002_v57  ;;  %v5179_v57 = vcombine.high %v5171_v5, %v5171_v5 }
 0x43b   : > { %2334 = vmatprep.subr.bf16.mxu0 %v6538_v6 }
 0x43e   : > { %2335 = vmatpush1.bf16.msra.mxu0 %v7010_v22  ;;  %v5178_v22 = vcombine.low %v5171_v5, %v5171_v5  ;;  %v6290_v5 = vld [vmem:[%s8443_s3 + $0x100] sm:$0xff]  }
 0x43f   : > { %2336 = vmatprep.subr.bf16.mxu0 %v6538_v6 }
 0x442   : > { %2337 = vmatpush1.bf16.msra.mxu0 %v7016_v50  ;;  %v6284_v50 = vld [vmem:[%s8443_s3 + $0xd0] sm:$0xff]  }
 0x443   : > { %2338 = vmatprep.subr.bf16.mxu0 %v6538_v6 }
 0x446   : > { %2339 = vmatpush1.bf16.msra.mxu0 %v7026_v52  ;;  %v6285_v52 = vld [vmem:[%s8443_s3 + $0xd8] sm:$0xff]  }
 0x447   : > { %2340 = vmatprep.subr.bf16.mxu0 %v6538_v6 }
 0x44a   : > { %2341 = vmatpush1.bf16.msra.mxu0 %v7032_v59  ;;  %v6286_v59 = vld [vmem:[%s8443_s3 + $0xe0] sm:$0xff]  }
 0x44b   : > { %2342 = vmatprep.subr.bf16.mxu0 %v6538_v6 }
 0x44e   : > { %2343 = vmatpush1.bf16.msra.mxu0 %v7034_v27  ;;  %v7707_v27 = vpop.f32.mrb[68].mxu1 }
 0x44f   : > { %2344 = vmatprep.subr.bf16.mxu0 %v6538_v6 }
 0x452   : > { %2345 = vmatpush1.bf16.msra.mxu0 %v7082_v29  ;;  %v2597_v29 = vpop.f32.mrb[69].mxu1 }
 0x453   : > { %5876 = vmatprep.subr.bf16.mxu0 %v6282_v60  ;;  %v7709_v2 = vpop.f32.mrb[70].mxu1  ;;  %v6302_v29 = vld [vmem:[%s8445_s5] ss:$8 sps:$4 sm:$0xff]  }
 0x454   : > { %v2600_v10 = vpop.f32.mrb[71].mxu1  ;;  %v2618_v11 = vpack.c.bf16 %v7709_v2, %v7707_v27  ;;  %v6304_v2 = vld [vmem:[%s8445_s5 + $0x4] ss:$8 sps:$4 sm:$0xff]  }
 0x455   : > { %2349 = vmatmul.mubr.bf16.vlgmr.msra.gmra.mrb[100].mxu0 %v6252_v3  ;;  %v7713_v13 = vpop.f32.mrb[72].mxu1  ;;  %3385 = vmatprep.subr.bf16.mxu1 %v6304_v2  ;;  %v6308_v10 = vld [vmem:[%s8445_s5 + $0x10] ss:$8 sps:$4 sm:$0xff]  }
 0x456   : > { %5181 = vmatprep.mubr.msk.bf16.mxu0 %vm890_vm5, %v6255_v7  ;;  %5877 = vmatpush3.bf16.msra.mxu0 %v6282_v60  ;;  %v2605_v35 = vpop.f32.mrb[73].mxu1 }
 0x457   : > { %5878 = vmatprep.subr.bf16.mxu0 %v6283_v16  ;;  %v7715_v21 = vpop.f32.mrb[74].mxu1  ;;  %3386 = vmatpush1.bf16.msra.mxu1 %v6302_v29  ;;  %v6316_v35 = vld [vmem:[%s8445_s5 + $0x24] ss:$8 sps:$4 sm:$0xff]  }
 0x458   : > { %v2608_v32 = vpop.f32.mrb[75].mxu1  ;;  %v2619_v33 = vpack.c.bf16 %v7715_v21, %v7713_v13  ;;  %v6314_v13 = vld [vmem:[%s8445_s5 + $0x20] ss:$8 sps:$4 sm:$0xff]   ;;  %v6320_v21 = vld [vmem:[%s8445_s5 + $0x30] ss:$8 sps:$4 sm:$0xff]  }
 0x459   : > { %v7719_v54 = vpop.f32.mrb[76].mxu1  ;;  %v6322_v32 = vld [vmem:[%s8445_s5 + $0x34] ss:$8 sps:$4 sm:$0xff]  }
 0x45a   : > { %5879 = vmatpush3.bf16.msra.mxu0 %v6283_v16  ;;  %v2613_v63 = vpop.f32.mrb[77].mxu1  ;;  %v2620_v34 = vpack.c.bf16 %v7719_v54, %v7719_v54  ;;  %v6328_v54 = vld [vmem:[%s8445_s5 + $0x44] ss:$8 sps:$4 sm:$0xff]  }
 0x45b   : > { %5880 = vmatprep.subr.bf16.mxu0 %v6284_v50  ;;  %v2614_v15 = vpop.f32.mrb[78].mxu1 }
 0x45c   : > { %v2615_v42 = vpop.f32.mrb[79].mxu1 }
 0x45d   : > { %2357 = vmatmul.mubr.bf16.gmra.mrb[104].mxu0 %v6259_v40  ;;  %v7721_v31 = vpop.f32.mrb[80].mxu1 }
 0x45e   : > { %5182 = vmatprep.mubr.msk.bf16.mxu0 %vm890_vm5, %v6261_v39  ;;  %5881 = vmatpush3.bf16.msra.mxu0 %v6284_v50  ;;  %v2826_v44 = vpop.f32.mrb[81].mxu1  ;;  %v6289_v39 = vld [vmem:[%s8443_s3 + $0xf8] sm:$0xff]  }
 0x45f   : > { %5882 = vmatprep.subr.bf16.mxu0 %v6285_v52  ;;  %v7723_v38 = vpop.f32.mrb[82].mxu1 }
 0x460   : > { %v2854_v62 = vpack.c.bf16 %v7723_v38, %v7721_v31  ;;  %v2829_v53 = vpop.f32.mrb[83].mxu1 }
 0x461   : > { %v7727_v14 = vpop.f32.mrb[84].mxu1 }
 0x462   : > { %5883 = vmatpush3.bf16.msra.mxu0 %v6285_v52  ;;  %v2834_v0 = vpop.f32.mrb[85].mxu1 }
 0x463   : > { %5892 = vmatprep.subr.bf16.mxu0 %v6286_v59  ;;  %v7729_v8 = vpop.f32.mrb[86].mxu1 }
 0x464   : > { %v2855_v18 = vpack.c.bf16 %v7729_v8, %v7727_v14  ;;  %v2837_v51 = vpop.f32.mrb[87].mxu1 }
 0x465   : > { %2365 = vmatmul.mubr.bf16.gmra.mrb[108].mxu0 %v6265_v43 }
 0x466   : > { %5183 = vmatprep.mubr.msk.bf16.mxu0 %vm890_vm5, %v5179_v57 }
 0x46d   : > { %2373 = vmatmul.mubr.bf16.gmra.mrb[112].mxu0 %v5178_v22 }
 0x4c5   : > { %v7733_v36 = vpop.f32.mrb[88].mxu1 }
 0x4c6   : > { %v2842_v25 = vpop.f32.mrb[89].mxu1 }
 0x4c7   : > { %v2843_v24 = vpop.f32.mrb[90].mxu1 }
 0x4c8   : > { %v2856_v55 = vpack.c.bf16 %v2843_v24, %v7733_v36  ;;  %v2845_v45 = vpop.f32.mrb[91].mxu1 }
 0x4cd   : > { %v2848_v58 = vpop.f32.mrb[92].mxu1 }
 0x4ce   : > { %v2850_v61 = vpop.f32.mrb[93].mxu1  ;;  %v2857_v27 = vpack.c.bf16 %v2848_v58, %v2848_v58 }
 0x4cf   : > { %v2851_v9 = vpop.f32.mrb[94].mxu1 }
 0x4d0   : > { %v2852_v12 = vpop.f32.mrb[95].mxu1 }
 0x528   : > { %v2350_v17 = vpop.f32.mrb[100].mxu0 }
 0x529   : > { %v2352_v26 = vpop.f32.mrb[101].mxu0 }
 0x52a   : > { %v2353_v19 = vpop.f32.mrb[102].mxu0 }
 0x52b   : > { %v2380_v49 = vpack.c.bf16 %v2353_v19, %v2350_v17  ;;  %v2355_v41 = vpop.f32.mrb[103].mxu0 }
 0x52d   : > { %5884 = vmatprep.mubr.msk.bf16.mxu0 %vm583_vm4, %v2380_v49 }
 0x530   : > { %v2358_v20 = vpop.f32.mrb[104].mxu0 }
 0x531   : > { %v2360_v46 = vpop.f32.mrb[105].mxu0 }
 0x532   : > { %v2361_v48 = vpop.f32.mrb[106].mxu0 }
 0x533   : > { %v2381_v37 = vpack.c.bf16 %v2361_v48, %v2358_v20  ;;  %v2363_v4 = vpop.f32.mrb[107].mxu0 }
 0x535   : > { %5885 = vmatmul.mubr.msk.bf16.vlgmr.msra.gmra.mrb[76].mxu0 %vm583_vm4, %v2381_v37 }
 0x536   : > { %5893 = vmatpush3.bf16.msra.mxu0 %v6286_v59  ;;  %v6291_v59 = vld [vmem:[%s8443_s3 + $0x108] sm:$0xff]  }
 0x537   : > { %5894 = vmatprep.subr.bf16.mxu0 %v6287_v30 }
 0x538   : > { %v2366_v60 = vpop.f32.mrb[108].mxu0 }
 0x539   : > { %v2368_v3 = vpop.f32.mrb[109].mxu0 }
 0x53a   : > { %v2369_v7 = vpop.f32.mrb[110].mxu0  ;;  %5895 = vmatpush3.bf16.msra.mxu0 %v6287_v30 }
 0x53b   : > { %v2382_v16 = vpack.c.bf16 %v2369_v7, %v2366_v60  ;;  %v2371_v40 = vpop.f32.mrb[111].mxu0  ;;  %5896 = vmatprep.subr.bf16.mxu0 %v6288_v56 }
 0x53d   : > { %5888 = vmatprep.mubr.msk.bf16.mxu0 %vm583_vm4, %v2382_v16 }
 0x53e   : > { %5897 = vmatpush3.bf16.msra.mxu0 %v6288_v56 }
 0x53f   : > { %5898 = vmatprep.subr.bf16.mxu0 %v6289_v39 }
 0x540   : > { %v2374_v43 = vpop.f32.mrb[112].mxu0 }
 0x541   : > { %v2383_v57 = vpack.c.bf16 %v2374_v43, %v2374_v43  ;;  %v2376_v22 = vpop.f32.mrb[113].mxu0 }
 0x542   : > { %5899 = vmatpush3.bf16.msra.mxu0 %v6289_v39  ;;  %v2377_v50 = vpop.f32.mrb[114].mxu0 }
 0x543   : > { %5889 = vmatmul.mubr.msk.bf16.gmra.mrb[80].mxu0 %vm583_vm4, %v2383_v57  ;;  %5908 = vmatprep.subr.bf16.mxu0 %v6290_v5  ;;  %v2378_v52 = vpop.f32.mrb[115].mxu0 }
 0x544   : > { %5900 = vmatprep.mubr.msk.bf16.mxu0 %vm583_vm4, %v2617_v47  ;;  %v6293_v47 = vld [vmem:[%s8443_s3 + $0x118] sm:$0xff]  }
 0x54b   : > { %5901 = vmatmul.mubr.msk.bf16.vlgmr.msra.gmra.mrb[76].mxu0 %vm583_vm4, %v2618_v11  ;;  %v6310_v11 = vld [vmem:[%s8445_s5 + $0x14] ss:$8 sps:$4 sm:$0xff]  }
 0x54c   : > { %5909 = vmatpush3.bf16.msra.mxu0 %v6290_v5  ;;  %5904 = vmatprep.mubr.msk.bf16.mxu0 %vm583_vm4, %v2619_v33  ;;  %v6326_v33 = vld [vmem:[%s8445_s5 + $0x40] ss:$8 sps:$4 sm:$0xff]  }
 0x54d   : > { %5910 = vmatprep.subr.bf16.mxu0 %v6291_v59  ;;  %3387 = vmatprep.subr.bf16.mxu1 %v6310_v11 }
 0x54e   : > { %3388 = vmatpush1.bf16.msra.mxu1 %v6308_v10 }
 0x54f   : > { %3389 = vmatprep.subr.bf16.mxu1 %v6316_v35 }
 0x550   : > { %5911 = vmatpush3.bf16.msra.mxu0 %v6291_v59 }
 0x551   : > { %5912 = vmatprep.subr.bf16.mxu0 %v6292_v23 }
 0x552   : > { %3390 = vmatpush1.bf16.msra.mxu1 %v6314_v13 }
 0x553   : > { %5905 = vmatmul.mubr.msk.bf16.gmra.mrb[80].mxu0 %vm583_vm4, %v2620_v34  ;;  %3391 = vmatprep.subr.bf16.mxu1 %v6322_v32 }
 0x554   : > { %5913 = vmatpush3.bf16.msra.mxu0 %v6292_v23  ;;  %5916 = vmatprep.mubr.msk.bf16.mxu0 %vm583_vm4, %v2854_v62 }
 0x555   : > { %5914 = vmatprep.subr.bf16.mxu0 %v6293_v47 }
 0x556   : > { %3392 = vmatpush1.bf16.msra.mxu1 %v6320_v21 }
 0x557   : > { %3393 = vmatprep.subr.bf16.mxu1 %v6328_v54 }
 0x558   : > { %5915 = vmatpush3.bf16.msra.mxu0 %v6293_v47 }
 0x559   : > { %5924 = vmatprep.subr.bf16.mxu0 %v6535_v1 }
 0x55a   : > { %3394 = vmatpush1.bf16.msra.mxu1 %v6326_v33 }
 0x55b   : > { %5917 = vmatmul.mubr.msk.bf16.vlgmr.msra.gmra.mrb[76].mxu0 %vm583_vm4, %v2855_v18 }
 0x55c   : > { %5920 = vmatprep.mubr.msk.bf16.mxu0 %vm583_vm4, %v2856_v55 }
 0x563   : > { %5921 = vmatmul.mubr.msk.bf16.gmra.mrb[80].mxu0 %vm583_vm4, %v2857_v27 }
 0x564   : > { %5932 = vmatprep.mubr.msk.bf16.mxu0 %vm6537_vm2, %v6535_v1 }
 0x62e   : > { %v5918_v63 = vpop.f32.mrb[76].mxu0 }
 0x62f   : > { %v2937_v15 = vpop.f32.mrb[77].mxu0  ;;  %v2991_v53 = vmul.f32 %v5918_v63, %v5918_v63 }
 0x630   : > { %v5919_v42 = vpop.f32.mrb[78].mxu0  ;;  %v2989_v44 = vmul.f32 %v2937_v15, %v2937_v15 }
 0x631   : > { %v2940_v31 = vpop.f32.mrb[79].mxu0  ;;  %v2992_v8 = vmul.f32 %v5919_v42, %v5919_v42 }
 0x632   : > { %v2974_v38 = vadd.f32 %v2940_v31, %v2937_v15  ;;  %v2990_v62 = vmul.f32 %v2940_v31, %v2940_v31 }
 0x634   : > { %v2975_v14 = vadd.f32 %v5918_v63, %v2974_v38  ;;  %v2996_v0 = vadd.f32 %v2990_v62, %v2989_v44 }
 0x636   : > { %v2997_v18 = vadd.f32 %v2996_v0, %v2991_v53  ;;  %v5922_v51 = vpop.f32.mrb[80].mxu0  ;;  %v2976_v36 = vadd.f32 %v5919_v42, %v2975_v14 }
 0x637   : > { %v2953_v25 = vpop.f32.mrb[81].mxu0  ;;  %v2995_v61 = vmul.f32 %v5922_v51, %v5922_v51  ;;  %v2979_v19 = vsel %vm903_vm7, %v5922_v51, 0.0 }
 0x638   : > { %v2977_v24 = vadd.f32 %v2976_v36, %v2953_v25  ;;  %v2993_v55 = vmul.f32 %v2953_v25, %v2953_v25  ;;  %v2998_v45 = vadd.f32 %v2997_v18, %v2992_v8  ;;  %v5923_v58 = vpop.f32.mrb[82].mxu0  ;;  %v6294_v36 = vld [vmem:[%s8444_s4] sm:$0x1f]  }
 0x639   : > { %v2956_v9 = vpop.f32.mrb[83].mxu0  ;;  %v3001_v20 = vsel %vm903_vm7, %v2995_v61, 0.0  ;;  %v6307_v58 = vld [vmem:[%s8445_s5 + $0xa4] ss:$8 sps:$4 sm:$0xff]   ;;  %v6305_v61 = vld [vmem:[%s8445_s5 + $0xa0] ss:$8 sps:$4 sm:$0xff]  }
 0x63a   : > { %v2999_v12 = vadd.f32 %v2998_v45, %v2993_v55  ;;  %v2978_v17 = vadd.f32 %v2977_v24, %v2956_v9  ;;  %v2994_v26 = vmul.f32 %v2956_v9, %v2956_v9  ;;  %v6296_v24 = vld [vmem:[%s8445_s5 + $0x80] ss:$8 sps:$4 sm:$0xff]   ;;  %v6301_v55 = vld [vmem:[%s8445_s5 + $0x94] ss:$8 sps:$4 sm:$0xff]   ;;  %v6299_v45 = vld [vmem:[%s8445_s5 + $0x90] ss:$8 sps:$4 sm:$0xff]  }
 0x63c   : > { %v2980_v49 = vadd.f32 %v2979_v19, %v2978_v17  ;;  %v3000_v41 = vadd.f32 %v2999_v12, %v2994_v26  ;;  %v6311_v12 = vld [vmem:[%s8445_s5 + $0xb0] ss:$8 sps:$4 sm:$0xff]   ;;  %v6319_v17 = vld [vmem:[%s8445_s5 + $0xc4] ss:$8 sps:$4 sm:$0xff]   ;;  %v6317_v26 = vld [vmem:[%s8445_s5 + $0xc0] ss:$8 sps:$4 sm:$0xff]  }
 0x63d   : > { %v6325_v19 = vld [vmem:[%s8445_s5 + $0xd4] ss:$8 sps:$4 sm:$0xff]  }
 0x63e   : > { %v2981_v46 = vrot.slane %v2980_v49, 4  ;;  %v3002_v48 = vadd.f32 %v3001_v20, %v3000_v41  ;;  %v6329_v41 = vld [vmem:[%s8445_s5 + $0xe0] ss:$8 sps:$4 sm:$0xff]   ;;  %v6331_v20 = vld [vmem:[%s8445_s5 + $0xe4] ss:$8 sps:$4 sm:$0xff]  }
 0x640   : > { %v2982_v37 = vadd.f32 %v2981_v46, %v2980_v49  ;;  %v3003_v4 = vrot.slane %v3002_v48, 4  ;;  %v6323_v49 = vld [vmem:[%s8445_s5 + $0xd0] ss:$8 sps:$4 sm:$0xff]  }
 0x641   : > { %v6332_v46 = vld [vmem:[%s8445_s5 + $0x50] ss:$8 sps:$4 sm:$0xff]  }
 0x642   : > { %v2983_v30 = vrot.slane %v2982_v37, 2  ;;  %v3004_v56 = vadd.f32 %v3003_v4, %v3002_v48  ;;  %v6334_v48 = vld [vmem:[%s8445_s5 + $0x54] ss:$8 sps:$4 sm:$0xff]   ;;  %v6338_v4 = vld [vmem:[%s8445_s5 + $0x60] ss:$8 sps:$4 sm:$0xff]  }
 0x643   : > { %3395 = vmatprep.subr.bf16.mxu1 %v6334_v48 }
 0x644   : > { %v2984_v60 = vadd.f32 %v2983_v30, %v2982_v37  ;;  %v3005_v3 = vrot.slane %v3004_v56, 2  ;;  %3396 = vmatpush1.bf16.msra.mxu1 %v6332_v46  ;;  %v6340_v37 = vld [vmem:[%s8445_s5 + $0x64] ss:$8 sps:$4 sm:$0xff]   ;;  %v6343_v30 = vld [vmem:[%s8445_s5 + $0x74] ss:$8 sps:$4 sm:$0xff]  }
 0x645   : > { %3397 = vmatprep.subr.bf16.mxu1 %v6340_v37  ;;  %v6392_v46 = vld [vmem:[%s8445_s5 + $0x1d4] ss:$8 sps:$4 sm:$0xff]  }
 0x646   : > { %v2985_v7 = vrot.slane %v2984_v60, 1  ;;  %v3006_v16 = vadd.f32 %v3005_v3, %v3004_v56  ;;  %v6341_v56 = vld [vmem:[%s8445_s5 + $0x70] ss:$8 sps:$4 sm:$0xff]   ;;  %v6337_v3 = vld [vmem:[%s8445_s5 + $0xf4] ss:$8 sps:$4 sm:$0xff]  }
 0x648   : > { %v2986_v40 = vadd.f32 %v2985_v7, %v2984_v60  ;;  %v3007_v39 = vrot.slane %v3006_v16, 1  ;;  %3398 = vmatpush1.bf16.msra.mxu1 %v6338_v4  ;;  %v6335_v60 = vld [vmem:[%s8445_s5 + $0xf0] ss:$8 sps:$4 sm:$0xff]  }
 0x649   : > { %3399 = vmatprep.subr.bf16.mxu1 %v6343_v30  ;;  %v6390_v4 = vld [vmem:[%s8445_s5 + $0x1d0] ss:$8 sps:$4 sm:$0xff]   ;;  %v6395_v30 = vld [vmem:[%s8445_s5 + $0x1e4] ss:$8 sps:$4 sm:$0xff]  }
 0x64a   : > { %v2988_v5 = vmul.f32 0.020408163, %v2986_v40  ;;  %v3008_v43 = vadd.f32 %v3007_v39, %v3006_v16  ;;  %v6350_v39 = vld [vmem:[%s8445_s5 + $0x100] ss:$8 sps:$4 sm:$0xff]  }
 0x64c   : > { %v3009_v57 = vmul.f32 0.020408163, %v3008_v43  ;;  %v3010_v22 = vmul.f32 %v2988_v5, %v2988_v5  ;;  %v3013_v50 = vsub.f32 %v2937_v15, %v2988_v5  ;;  %v3014_v52 = vsub.f32 %v2940_v31, %v2988_v5  ;;  %3400 = vmatpush1.bf16.msra.mxu1 %v6341_v56  ;;  %v6393_v56 = vld [vmem:[%s8445_s5 + $0x1e0] ss:$8 sps:$4 sm:$0xff]  }
 0x64d   : > { %v3015_v59 = vsub.f32 %v5918_v63, %v2988_v5  ;;  %v3016_v23 = vsub.f32 %v5919_v42, %v2988_v5  ;;  %v3017_v34 = vsub.f32 %v2953_v25, %v2988_v5  ;;  %v3018_v47 = vsub.f32 %v2956_v9, %v2988_v5  ;;  %v6295_v25 = vld [vmem:[%s8444_s4 + $0x8] sm:$0x1f]   ;;  %v6313_v9 = vld [vmem:[%s8445_s5 + $0xb4] ss:$8 sps:$4 sm:$0xff]  }
 0x64e   : > { %v3011_v27 = vsub.f32 %v3009_v57, %v3010_v22  ;;  %v3019_v29 = vsub.f32 %v5922_v51, %v2988_v5  ;;  %v6352_v5 = vld [vmem:[%s8445_s5 + $0x104] ss:$8 sps:$4 sm:$0xff]   ;;  %v6355_v22 = vld [vmem:[%s8445_s5 + $0x114] ss:$8 sps:$4 sm:$0xff]  }
 0x64f   : > { %3578 = vmatprep.subr.bf16.mxu1 %v6352_v5 }
 0x650   : > { %v3012_v2 = vmax.f32 %v3011_v27, 0.0 }
 0x652   : > { %v3020_v10 = vadd.f32 1e-05, %v3012_v2 }
 0x654   : > { %6521 = vrsqrt.f32 %v3020_v10 }
 0x65e   : > { %v6522_v11 = vpop.eup %6521 }
 0x65f   : > { %v3026_v13 = vmul.f32 %v6522_v11, %v3017_v34  ;;  %v3027_v35 = vmul.f32 %v6522_v11, %v3018_v47  ;;  %v3022_v21 = vmul.f32 %v6522_v11, %v3013_v50  ;;  %v3023_v32 = vmul.f32 %v6522_v11, %v3014_v52  ;;  %v6353_v50 = vld [vmem:[%s8445_s5 + $0x110] ss:$8 sps:$4 sm:$0xff]   ;;  %v6358_v52 = vld [vmem:[%s8445_s5 + $0x124] ss:$8 sps:$4 sm:$0xff]  }
 0x660   : > { %v3024_v33 = vmul.f32 %v6522_v11, %v3015_v59  ;;  %v3025_v54 = vmul.f32 %v6522_v11, %v3016_v23  ;;  %v3028_v44 = vmul.f32 %v6522_v11, %v3019_v29  ;;  %v6356_v59 = vld [vmem:[%s8445_s5 + $0x120] ss:$8 sps:$4 sm:$0xff]   ;;  %v6362_v23 = vld [vmem:[%s8445_s5 + $0x134] ss:$8 sps:$4 sm:$0xff]   ;;  %v6360_v34 = vld [vmem:[%s8445_s5 + $0x130] ss:$8 sps:$4 sm:$0xff]  }
 0x661   : > { %v3033_v38 = vmax.f32 %v3026_v13, 0.0  ;;  %v3034_v15 = vmax.f32 %v3027_v35, 0.0  ;;  %v3029_v31 = vmax.f32 %v3022_v21, 0.0  ;;  %v3030_v63 = vmax.f32 %v3023_v32, 0.0  ;;  %v6365_v47 = vld [vmem:[%s8445_s5 + $0x144] ss:$8 sps:$4 sm:$0xff]  }
 0x662   : > { %v3031_v42 = vmax.f32 %v3024_v33, 0.0  ;;  %v3032_v62 = vmax.f32 %v3025_v54, 0.0  ;;  %v3035_v8 = vmax.f32 %v3028_v44, 0.0  ;;  %v6363_v13 = vld [vmem:[%s8445_s5 + $0x140] ss:$8 sps:$4 sm:$0xff]  }
 0x663   : > { %v7821_v53 = vpack.c.bf16 %v3034_v15, %v3033_v38  ;;  %v7823_v14 = vpack.c.bf16 %v3030_v63, %v3029_v31  ;;  %v6368_v35 = vld [vmem:[%s8445_s5 + $0x154] ss:$8 sps:$4 sm:$0xff]   ;;  %v6366_v21 = vld [vmem:[%s8445_s5 + $0x150] ss:$8 sps:$4 sm:$0xff]   ;;  %v6346_v54 = vld [vmem:[%s8444_s4 + $0x20] sm:$0x1f]  }
 0x664   : > { %v7825_v0 = vpack.c.bf16 %v3032_v62, %v3031_v42  ;;  %v3039_v18 = vpack.c.bf16 %v3035_v8, %v3035_v8  ;;  %v6344_v32 = vld [vmem:[%s8444_s4 + $0x10] sm:$0x1f]   ;;  %v6345_v33 = vld [vmem:[%s8444_s4 + $0x18] sm:$0x1f]   ;;  %v6347_v44 = vld [vmem:[%s8444_s4 + $0x28] sm:$0x1f]  }
 0x665   : > { %5925 = vmatpush3.bf16.msra.mxu0 %v7823_v14  ;;  %v6348_v38 = vld [vmem:[%s8444_s4 + $0x30] sm:$0x1f]   ;;  %v6369_v15 = vld [vmem:[%s8445_s5 + $0x160] ss:$8 sps:$4 sm:$0xff]   ;;  %v6371_v31 = vld [vmem:[%s8445_s5 + $0x164] ss:$8 sps:$4 sm:$0xff]  }
 0x666   : > { %5926 = vmatprep.subr.bf16.mxu0 %v6535_v1  ;;  %v7834_v51 = vand.u32 %v3039_v18, %v7075_v28  ;;  %v6298_v28 = vld [vmem:[%s8445_s5 + $0x84] ss:$8 sps:$4 sm:$0xff]   ;;  %v6349_v63 = vld [vmem:[%s8444_s4 + $0x38] sm:$0x1f]  }
 0x667   : > { %v6372_v42 = vld [vmem:[%s8445_s5 + $0x170] ss:$8 sps:$4 sm:$0xff]   ;;  %v6374_v62 = vld [vmem:[%s8445_s5 + $0x174] ss:$8 sps:$4 sm:$0xff]   ;;  %v6359_v8 = vld [vmem:[%s8444_s4 + $0x40] sm:$0x1f]  }
 0x669   : > { %5927 = vmatpush3.bf16.msra.mxu0 %v7825_v0 }
 0x66a   : > { %5928 = vmatprep.subr.bf16.mxu0 %v6535_v1 }
 0x66d   : > { %5929 = vmatpush3.bf16.msra.mxu0 %v7821_v53 }
 0x66e   : > { %5930 = vmatprep.subr.bf16.mxu0 %v6535_v1 }
 0x671   : > { %5931 = vmatpush3.bf16.msra.mxu0 %v7834_v51 }
 0x672   : > { %5936 = vmatprep.subr.bf16.mxu0 %v6535_v1 }
 0x674   : > { %5933 = vmatmul.mubr.msk.bf16.vlgmr.msra.gmra.mrb[116].mxu0 %vm3047_vm8, %v6294_v36 }
 0x675   : > { %5937 = vmatpush3.bf16.msra.mxu0 %v7823_v14  ;;  %5944 = vmatprep.mubr.msk.bf16.mxu0 %vm6537_vm2, %v6535_v1 }
 0x676   : > { %5938 = vmatprep.subr.bf16.mxu0 %v6535_v1 }
 0x679   : > { %5939 = vmatpush3.bf16.msra.mxu0 %v7825_v0 }
 0x67a   : > { %5940 = vmatprep.subr.bf16.mxu0 %v6535_v1 }
 0x67d   : > { %5941 = vmatpush3.bf16.msra.mxu0 %v7821_v53 }
 0x67e   : > { %5942 = vmatprep.subr.bf16.mxu0 %v6535_v1 }
 0x681   : > { %5943 = vmatpush3.bf16.msra.mxu0 %v7834_v51 }
 0x682   : > { %3262 = vmatprep.subr.bf16.mxu0 %v6298_v28 }
 0x684   : > { %5945 = vmatmul.mubr.msk.bf16.vlgmr.msra.gmra.mrb[120].mxu0 %vm3047_vm8, %v6295_v25 }
 0x685   : > { %3263 = vmatpush1.bf16.msra.mxu0 %v6296_v24  ;;  %3294 = vmatprep.mubr.bf16.mxu0 %v6538_v6 }
 0x686   : > { %3264 = vmatprep.subr.bf16.mxu0 %v6301_v55 }
 0x689   : > { %3265 = vmatpush1.bf16.msra.mxu0 %v6299_v45 }
 0x68a   : > { %3266 = vmatprep.subr.bf16.mxu0 %v6307_v58  ;;  %v6378_v58 = vld [vmem:[%s8445_s5 + $0x190] ss:$8 sps:$4 sm:$0xff]  }
 0x68d   : > { %3267 = vmatpush1.bf16.msra.mxu0 %v6305_v61  ;;  %v6383_v61 = vld [vmem:[%s8445_s5 + $0x1a4] ss:$8 sps:$4 sm:$0xff]  }
 0x68e   : > { %3268 = vmatprep.subr.bf16.mxu0 %v6313_v9  ;;  %v6381_v9 = vld [vmem:[%s8445_s5 + $0x1a0] ss:$8 sps:$4 sm:$0xff]  }
 0x691   : > { %3269 = vmatpush1.bf16.msra.mxu0 %v6311_v12  ;;  %v6386_v12 = vld [vmem:[%s8445_s5 + $0x1b4] ss:$8 sps:$4 sm:$0xff]  }
 0x692   : > { %3270 = vmatprep.subr.bf16.mxu0 %v6319_v17  ;;  %v6384_v17 = vld [vmem:[%s8445_s5 + $0x1b0] ss:$8 sps:$4 sm:$0xff]  }
 0x695   : > { %3271 = vmatpush1.bf16.msra.mxu0 %v6317_v26  ;;  %v6389_v26 = vld [vmem:[%s8445_s5 + $0x1c4] ss:$8 sps:$4 sm:$0xff]  }
 0x696   : > { %3272 = vmatprep.subr.bf16.mxu0 %v6325_v19 }
 0x699   : > { %3273 = vmatpush1.bf16.msra.mxu0 %v6323_v49 }
 0x69a   : > { %3274 = vmatprep.subr.bf16.mxu0 %v6331_v20 }
 0x69d   : > { %3275 = vmatpush1.bf16.msra.mxu0 %v6329_v41  ;;  %v6387_v41 = vld [vmem:[%s8445_s5 + $0x1c0] ss:$8 sps:$4 sm:$0xff]  }
 0x69e   : > { %3276 = vmatprep.subr.bf16.mxu0 %v6337_v3  ;;  %v6396_v3 = vld [vmem:[%s8445_s5 + $0x1f0] ss:$8 sps:$4 sm:$0xff]  }
 0x6a1   : > { %3277 = vmatpush1.bf16.msra.mxu0 %v6335_v60  ;;  %v6398_v60 = vld [vmem:[%s8445_s5 + $0x1f4] ss:$8 sps:$4 sm:$0xff]  }
 0x6a2   : > { %5948 = vmatprep.subr.bf16.mxu0 %v6535_v1 }
 0x747   : > { %v3088_v7 = vpop.f32.mrb[116].mxu0 }
 0x748   : > { %v5934_v16 = vpop.f32.mrb[117].mxu0 }
 0x749   : > { %v3091_v40 = vpop.f32.mrb[118].mxu0 }
 0x74a   : > { %v3095_v43 = vpack.c.bf16 %v3091_v40, %v3088_v7  ;;  %v5935_v57 = vpop.f32.mrb[119].mxu0  ;;  %v6401_v7 = vld [vmem:[%s8445_s5 + $0x204] ss:$8 sps:$4 sm:$0xff]  }
 0x74c   : > { %3418 = vmatmul.mubr.bf16.vlgmr.msra.gmra.mrb[96].mxu1 %v3095_v43  ;;  %v6404_v43 = vld [vmem:[%s8445_s5 + $0x214] ss:$8 sps:$4 sm:$0xff]  }
 0x74d   : > { %3579 = vmatpush1.bf16.msra.mxu1 %v6350_v39  ;;  %3610 = vmatprep.mubr.bf16.mxu1 %v6538_v6  ;;  %v6399_v39 = vld [vmem:[%s8445_s5 + $0x200] ss:$8 sps:$4 sm:$0xff]  }
 0x74e   : > { %3580 = vmatprep.subr.bf16.mxu1 %v6355_v22 }
 0x751   : > { %3581 = vmatpush1.bf16.msra.mxu1 %v6353_v50  ;;  %v6402_v50 = vld [vmem:[%s8445_s5 + $0x210] ss:$8 sps:$4 sm:$0xff]  }
 0x752   : > { %3582 = vmatprep.subr.bf16.mxu1 %v6358_v52  ;;  %v6407_v52 = vld [vmem:[%s8445_s5 + $0x224] ss:$8 sps:$4 sm:$0xff]  }
 0x755   : > { %3583 = vmatpush1.bf16.msra.mxu1 %v6356_v59  ;;  %v6405_v59 = vld [vmem:[%s8445_s5 + $0x220] ss:$8 sps:$4 sm:$0xff]  }
 0x756   : > { %3584 = vmatprep.subr.bf16.mxu1 %v6362_v23  ;;  %v6410_v23 = vld [vmem:[%s8445_s5 + $0x234] ss:$8 sps:$4 sm:$0xff]  }
 0x757   : > { %v3157_v27 = vpop.f32.mrb[120].mxu0 }
 0x758   : > { %v5946_v29 = vpop.f32.mrb[121].mxu0 }
 0x759   : > { %v3160_v2 = vpop.f32.mrb[122].mxu0  ;;  %3585 = vmatpush1.bf16.msra.mxu1 %v6360_v34  ;;  %v6408_v34 = vld [vmem:[%s8445_s5 + $0x230] ss:$8 sps:$4 sm:$0xff]  }
 0x75a   : > { %v3164_v10 = vpack.c.bf16 %v3160_v2, %v3157_v27  ;;  %v5947_v11 = vpop.f32.mrb[123].mxu0  ;;  %3586 = vmatprep.subr.bf16.mxu1 %v6365_v47  ;;  %v6413_v47 = vld [vmem:[%s8445_s5 + $0x244] ss:$8 sps:$4 sm:$0xff]   ;;  %v6411_v2 = vld [vmem:[%s8445_s5 + $0x240] ss:$8 sps:$4 sm:$0xff]  }
 0x75b   : > { %v6416_v11 = vld [vmem:[%s8445_s5 + $0x254] ss:$8 sps:$4 sm:$0xff]  }
 0x75c   : > { %3295 = vmatmul.mubr.bf16.vlgmr.msra.gmra.mrb[124].mxu0 %v3164_v10 }
 0x75d   : > { %5949 = vmatpush3.bf16.msra.mxu0 %v7823_v14  ;;  %5956 = vmatprep.mubr.msk.bf16.mxu0 %vm6537_vm2, %v6535_v1 }
 0x75e   : > { %5950 = vmatprep.subr.bf16.mxu0 %v6535_v1  ;;  %3587 = vmatpush1.bf16.msra.mxu1 %v6363_v13 }
 0x75f   : > { %3588 = vmatprep.subr.bf16.mxu1 %v6368_v35 }
 0x761   : > { %5951 = vmatpush3.bf16.msra.mxu0 %v7825_v0 }
 0x762   : > { %5952 = vmatprep.subr.bf16.mxu0 %v6535_v1  ;;  %3589 = vmatpush1.bf16.msra.mxu1 %v6366_v21  ;;  %v6414_v21 = vld [vmem:[%s8445_s5 + $0x250] ss:$8 sps:$4 sm:$0xff]  }
 0x763   : > { %3590 = vmatprep.subr.bf16.mxu1 %v6371_v31 }
 0x765   : > { %5953 = vmatpush3.bf16.msra.mxu0 %v7821_v53 }
 0x766   : > { %5954 = vmatprep.subr.bf16.mxu0 %v6535_v1  ;;  %3591 = vmatpush1.bf16.msra.mxu1 %v6369_v15 }
 0x767   : > { %3592 = vmatprep.subr.bf16.mxu1 %v6374_v62  ;;  %v6428_v62 = vld [vmem:[%s8445_s5 + $0x294] ss:$8 sps:$4 sm:$0xff]  }
 0x769   : > { %5955 = vmatpush3.bf16.msra.mxu0 %v7834_v51 }
 0x76a   : > { %5960 = vmatprep.subr.bf16.mxu0 %v6535_v1  ;;  %3593 = vmatpush1.bf16.msra.mxu1 %v6372_v42 }
 0x76c   : > { %5957 = vmatmul.mubr.msk.bf16.vlgmr.msra.gmra.mrb[128].mxu0 %vm3047_vm8, %v6344_v32  ;;  %v6419_v32 = vld [vmem:[%s8445_s5 + $0x264] ss:$8 sps:$4 sm:$0xff]  }
 0x76d   : > { %5961 = vmatpush3.bf16.msra.mxu0 %v7823_v14  ;;  %5968 = vmatprep.mubr.msk.bf16.mxu0 %vm6537_vm2, %v6535_v1 }
 0x76e   : > { %5962 = vmatprep.subr.bf16.mxu0 %v6535_v1 }
 0x771   : > { %5963 = vmatpush3.bf16.msra.mxu0 %v7825_v0 }
 0x772   : > { %5964 = vmatprep.subr.bf16.mxu0 %v6535_v1 }
 0x775   : > { %5965 = vmatpush3.bf16.msra.mxu0 %v7821_v53 }
 0x776   : > { %5966 = vmatprep.subr.bf16.mxu0 %v6535_v1 }
 0x779   : > { %5967 = vmatpush3.bf16.msra.mxu0 %v7834_v51 }
 0x77a   : > { %5972 = vmatprep.subr.bf16.mxu0 %v6535_v1 }
 0x77c   : > { %5969 = vmatmul.mubr.msk.bf16.vlgmr.msra.gmra.mrb[132].mxu0 %vm3047_vm8, %v6345_v33  ;;  %v6417_v33 = vld [vmem:[%s8445_s5 + $0x260] ss:$8 sps:$4 sm:$0xff]  }
 0x77d   : > { %5973 = vmatpush3.bf16.msra.mxu0 %v7823_v14  ;;  %5980 = vmatprep.mubr.msk.bf16.mxu0 %vm6537_vm2, %v6535_v1 }
 0x77e   : > { %5974 = vmatprep.subr.bf16.mxu0 %v6535_v1 }
 0x781   : > { %5975 = vmatpush3.bf16.msra.mxu0 %v7825_v0 }
 0x782   : > { %5976 = vmatprep.subr.bf16.mxu0 %v6535_v1 }
 0x785   : > { %5977 = vmatpush3.bf16.msra.mxu0 %v7821_v53 }
 0x786   : > { %5978 = vmatprep.subr.bf16.mxu0 %v6535_v1 }
 0x789   : > { %5979 = vmatpush3.bf16.msra.mxu0 %v7834_v51 }
 0x78a   : > { %5984 = vmatprep.subr.bf16.mxu0 %v6535_v1 }
 0x78c   : > { %5981 = vmatmul.mubr.msk.bf16.vlgmr.msra.gmra.mrb[136].mxu0 %vm3047_vm8, %v6346_v54  ;;  %v6422_v54 = vld [vmem:[%s8445_s5 + $0x274] ss:$8 sps:$4 sm:$0xff]  }
 0x78d   : > { %5985 = vmatpush3.bf16.msra.mxu0 %v7823_v14  ;;  %5992 = vmatprep.mubr.msk.bf16.mxu0 %vm6537_vm2, %v6535_v1 }
 0x78e   : > { %5986 = vmatprep.subr.bf16.mxu0 %v6535_v1 }
 0x791   : > { %5987 = vmatpush3.bf16.msra.mxu0 %v7825_v0 }
 0x792   : > { %5988 = vmatprep.subr.bf16.mxu0 %v6535_v1 }
 0x795   : > { %5989 = vmatpush3.bf16.msra.mxu0 %v7821_v53 }
 0x796   : > { %5990 = vmatprep.subr.bf16.mxu0 %v6535_v1 }
 0x799   : > { %5991 = vmatpush3.bf16.msra.mxu0 %v7834_v51 }
 0x79a   : > { %5996 = vmatprep.subr.bf16.mxu0 %v6535_v1 }
 0x79c   : > { %5993 = vmatmul.mubr.msk.bf16.vlgmr.msra.gmra.mrb[140].mxu0 %vm3047_vm8, %v6347_v44  ;;  %v6420_v44 = vld [vmem:[%s8445_s5 + $0x270] ss:$8 sps:$4 sm:$0xff]  }
 0x79d   : > { %5997 = vmatpush3.bf16.msra.mxu0 %v7823_v14  ;;  %6004 = vmatprep.mubr.msk.bf16.mxu0 %vm6537_vm2, %v6535_v1 }
 0x79e   : > { %5998 = vmatprep.subr.bf16.mxu0 %v6535_v1 }
 0x7a1   : > { %5999 = vmatpush3.bf16.msra.mxu0 %v7825_v0 }
 0x7a2   : > { %6000 = vmatprep.subr.bf16.mxu0 %v6535_v1 }
 0x7a5   : > { %6001 = vmatpush3.bf16.msra.mxu0 %v7821_v53 }
 0x7a6   : > { %6002 = vmatprep.subr.bf16.mxu0 %v6535_v1 }
 0x7a9   : > { %6003 = vmatpush3.bf16.msra.mxu0 %v7834_v51 }
 0x7aa   : > { %6008 = vmatprep.subr.bf16.mxu0 %v6535_v1 }
 0x7ac   : > { %6005 = vmatmul.mubr.msk.bf16.vlgmr.msra.gmra.mrb[144].mxu0 %vm3047_vm8, %v6348_v38  ;;  %v6425_v38 = vld [vmem:[%s8445_s5 + $0x284] ss:$8 sps:$4 sm:$0xff]  }
 0x7ad   : > { %6009 = vmatpush3.bf16.msra.mxu0 %v7823_v14  ;;  %6016 = vmatprep.mubr.msk.bf16.mxu0 %vm6537_vm2, %v6535_v1 }
 0x7ae   : > { %6010 = vmatprep.subr.bf16.mxu0 %v6535_v1 }
 0x7b1   : > { %6011 = vmatpush3.bf16.msra.mxu0 %v7825_v0 }
 0x7b2   : > { %6012 = vmatprep.subr.bf16.mxu0 %v6535_v1 }
 0x7b5   : > { %6013 = vmatpush3.bf16.msra.mxu0 %v7821_v53 }
 0x7b6   : > { %6014 = vmatprep.subr.bf16.mxu0 %v6535_v1 }
 0x7b9   : > { %6015 = vmatpush3.bf16.msra.mxu0 %v7834_v51 }
 0x7ba   : > { %6020 = vmatprep.subr.bf16.mxu0 %v6535_v1 }
 0x7bc   : > { %6017 = vmatmul.mubr.msk.bf16.vlgmr.msra.gmra.mrb[148].mxu0 %vm3047_vm8, %v6349_v63  ;;  %v6423_v63 = vld [vmem:[%s8445_s5 + $0x280] ss:$8 sps:$4 sm:$0xff]  }
 0x7bd   : > { %6021 = vmatpush3.bf16.msra.mxu0 %v7823_v14  ;;  %6028 = vmatprep.mubr.msk.bf16.mxu0 %vm6537_vm2, %v6535_v1  ;;  %v6377_v14 = vld [vmem:[%s8445_s5 + $0x184] ss:$8 sps:$4 sm:$0xff]  }
 0x7be   : > { %6022 = vmatprep.subr.bf16.mxu0 %v6535_v1  ;;  %3775 = vmatprep.subr.bf16.mxu1 %v6377_v14 }
 0x7c1   : > { %6023 = vmatpush3.bf16.msra.mxu0 %v7825_v0 }
 0x7c2   : > { %6024 = vmatprep.subr.bf16.mxu0 %v6535_v1 }
 0x7c5   : > { %6025 = vmatpush3.bf16.msra.mxu0 %v7821_v53 }
 0x7c6   : > { %6026 = vmatprep.subr.bf16.mxu0 %v6535_v1  ;;  %v6375_v1 = vld [vmem:[%s8445_s5 + $0x180] ss:$8 sps:$4 sm:$0xff]  }
 0x7c9   : > { %6027 = vmatpush3.bf16.msra.mxu0 %v7834_v51  ;;  %v6380_v51 = vld [vmem:[%s8445_s5 + $0x194] ss:$8 sps:$4 sm:$0xff]  }
 0x7cc   : > { %6029 = vmatmul.mubr.msk.bf16.vlgmr.msra.gmra.mrb[152].mxu0 %vm3047_vm8, %v6359_v8 }
 0x82f   : > { %v8072_v0 = vpop.f32.mrb[124].mxu0 }
 0x830   : > { %v8074_v18 = vpop.f32.mrb[125].mxu0 }
 0x831   : > { %v8076_v36 = vpop.f32.mrb[126].mxu0 }
 0x832   : > { %v8078_v28 = vpop.f32.mrb[127].mxu0 }
 0x83f   : > { %v3473_v25 = vpop.f32.mrb[128].mxu0 }
 0x840   : > { %v5958_v53 = vpop.f32.mrb[129].mxu0 }
 0x841   : > { %v3476_v24 = vpop.f32.mrb[130].mxu0  ;;  %v6431_v53 = vld [vmem:[%s8445_s5 + $0x2a4] ss:$8 sps:$4 sm:$0xff]  }
 0x842   : > { %v3480_v55 = vpack.c.bf16 %v3476_v24, %v3473_v25  ;;  %v5959_v45 = vpop.f32.mrb[131].mxu0  ;;  %v6426_v25 = vld [vmem:[%s8445_s5 + $0x290] ss:$8 sps:$4 sm:$0xff]   ;;  %v6429_v24 = vld [vmem:[%s8445_s5 + $0x2a0] ss:$8 sps:$4 sm:$0xff]  }
 0x844   : > { %3611 = vmatmul.mubr.bf16.vlgmr.msra.gmra.mrb[96].mxu1 %v3480_v55  ;;  %v6432_v55 = vld [vmem:[%s8445_s5 + $0x2b0] ss:$8 sps:$4 sm:$0xff]  }
 0x845   : > { %3776 = vmatpush1.bf16.msra.mxu1 %v6375_v1  ;;  %3807 = vmatprep.mubr.bf16.mxu1 %v6538_v6  ;;  %v6434_v1 = vld [vmem:[%s8445_s5 + $0x2b4] ss:$8 sps:$4 sm:$0xff]  }
 0x846   : > { %3777 = vmatprep.subr.bf16.mxu1 %v6380_v51  ;;  %v6437_v51 = vld [vmem:[%s8445_s5 + $0x2c4] ss:$8 sps:$4 sm:$0xff]  }
 0x849   : > { %3778 = vmatpush1.bf16.msra.mxu1 %v6378_v58 }
 0x84a   : > { %3779 = vmatprep.subr.bf16.mxu1 %v6383_v61  ;;  %v6435_v61 = vld [vmem:[%s8445_s5 + $0x2c0] ss:$8 sps:$4 sm:$0xff]  }
 0x84d   : > { %3780 = vmatpush1.bf16.msra.mxu1 %v6381_v9 }
 0x84e   : > { %3781 = vmatprep.subr.bf16.mxu1 %v6386_v12  ;;  %v6440_v12 = vld [vmem:[%s8445_s5 + $0x2d4] ss:$8 sps:$4 sm:$0xff]  }
 0x84f   : > { %v3670_v19 = vpop.f32.mrb[132].mxu0 }
 0x850   : > { %v5970_v49 = vpop.f32.mrb[133].mxu0 }
 0x851   : > { %3782 = vmatpush1.bf16.msra.mxu1 %v6384_v17  ;;  %v3673_v20 = vpop.f32.mrb[134].mxu0  ;;  %v6443_v49 = vld [vmem:[%s8445_s5 + $0x2e4] ss:$8 sps:$4 sm:$0xff]  }
 0x852   : > { %3783 = vmatprep.subr.bf16.mxu1 %v6389_v26  ;;  %v3677_v48 = vpack.c.bf16 %v3673_v20, %v3670_v19  ;;  %v5971_v37 = vpop.f32.mrb[135].mxu0  ;;  %v6438_v19 = vld [vmem:[%s8445_s5 + $0x2d0] ss:$8 sps:$4 sm:$0xff]   ;;  %v6446_v20 = vld [vmem:[%s8445_s5 + $0x2f4] ss:$8 sps:$4 sm:$0xff]  }
 0x855   : > { %3784 = vmatpush1.bf16.msra.mxu1 %v6387_v41  ;;  %v6441_v41 = vld [vmem:[%s8445_s5 + $0x2e0] ss:$8 sps:$4 sm:$0xff]  }
 0x856   : > { %3785 = vmatprep.subr.bf16.mxu1 %v6392_v46  ;;  %v6444_v46 = vld [vmem:[%s8445_s5 + $0x2f0] ss:$8 sps:$4 sm:$0xff]  }
 0x859   : > { %3786 = vmatpush1.bf16.msra.mxu1 %v6390_v4 }
 0x85a   : > { %3787 = vmatprep.subr.bf16.mxu1 %v6395_v30  ;;  %v6447_v30 = vld [vmem:[%s8445_s5 + $0x300] ss:$8 sps:$4 sm:$0xff]  }
 0x85d   : > { %3788 = vmatpush1.bf16.msra.mxu1 %v6393_v56 }
 0x85e   : > { %3789 = vmatprep.subr.bf16.mxu1 %v6398_v60  ;;  %v6452_v60 = vld [vmem:[%s8445_s5 + $0x314] ss:$8 sps:$4 sm:$0xff]  }
 0x85f   : > { %v3867_v16 = vpop.f32.mrb[136].mxu0 }
 0x860   : > { %v5982_v40 = vpop.f32.mrb[137].mxu0 }
 0x861   : > { %3790 = vmatpush1.bf16.msra.mxu1 %v6396_v3  ;;  %v3870_v5 = vpop.f32.mrb[138].mxu0  ;;  %v6455_v40 = vld [vmem:[%s8445_s5 + $0x324] ss:$8 sps:$4 sm:$0xff]  }
 0x862   : > { %3972 = vmatprep.subr.bf16.mxu1 %v6401_v7  ;;  %v3874_v57 = vpack.c.bf16 %v3870_v5, %v3867_v16  ;;  %v5983_v22 = vpop.f32.mrb[139].mxu0  ;;  %v6450_v16 = vld [vmem:[%s8445_s5 + $0x310] ss:$8 sps:$4 sm:$0xff]   ;;  %v6458_v5 = vld [vmem:[%s8445_s5 + $0x334] ss:$8 sps:$4 sm:$0xff]  }
 0x863   : > { %v6459_v22 = vld [vmem:[%s8445_s5 + $0x340] ss:$8 sps:$4 sm:$0xff]  }
 0x864   : > { %3808 = vmatmul.mubr.bf16.vlgmr.msra.gmra.mrb[96].mxu1 %v3677_v48  ;;  %v6449_v48 = vld [vmem:[%s8445_s5 + $0x304] ss:$8 sps:$4 sm:$0xff]  }
 0x865   : > { %3973 = vmatpush1.bf16.msra.mxu1 %v6399_v39  ;;  %4004 = vmatprep.mubr.bf16.mxu1 %v6538_v6  ;;  %v6453_v39 = vld [vmem:[%s8445_s5 + $0x320] ss:$8 sps:$4 sm:$0xff]  }
 0x866   : > { %3974 = vmatprep.subr.bf16.mxu1 %v6404_v43  ;;  %v6456_v43 = vld [vmem:[%s8445_s5 + $0x330] ss:$8 sps:$4 sm:$0xff]  }
 0x869   : > { %3975 = vmatpush1.bf16.msra.mxu1 %v6402_v50  ;;  %v6464_v50 = vld [vmem:[%s8445_s5 + $0x354] ss:$8 sps:$4 sm:$0xff]  }
 0x86a   : > { %3976 = vmatprep.subr.bf16.mxu1 %v6407_v52  ;;  %v6462_v52 = vld [vmem:[%s8445_s5 + $0x350] ss:$8 sps:$4 sm:$0xff]  }
 0x86d   : > { %3977 = vmatpush1.bf16.msra.mxu1 %v6405_v59  ;;  %v6467_v59 = vld [vmem:[%s8445_s5 + $0x364] ss:$8 sps:$4 sm:$0xff]  }
 0x86e   : > { %3978 = vmatprep.subr.bf16.mxu1 %v6410_v23  ;;  %v6465_v23 = vld [vmem:[%s8445_s5 + $0x360] ss:$8 sps:$4 sm:$0xff]  }
 0x86f   : > { %v8154_v27 = vpop.f32.mrb[140].mxu0 }
 0x870   : > { %v5994_v29 = vpop.f32.mrb[141].mxu0 }
 0x871   : > { %3979 = vmatpush1.bf16.msra.mxu1 %v6408_v34  ;;  %v8159_v10 = vpop.f32.mrb[142].mxu0  ;;  %v6470_v34 = vld [vmem:[%s8445_s5 + $0x374] ss:$8 sps:$4 sm:$0xff]   ;;  %v6471_v29 = vld [vmem:[%s8445_s5 + $0x380] ss:$8 sps:$4 sm:$0xff]  }
 0x872   : > { %3980 = vmatprep.subr.bf16.mxu1 %v6413_v47  ;;  %v4071_v13 = vpack.c.bf16 %v8159_v10, %v8154_v27  ;;  %v5995_v35 = vpop.f32.mrb[143].mxu0  ;;  %v6468_v47 = vld [vmem:[%s8445_s5 + $0x370] ss:$8 sps:$4 sm:$0xff]   ;;  %v6473_v27 = vld [vmem:[%s8445_s5 + $0x384] ss:$8 sps:$4 sm:$0xff]  }
 0x873   : > { %v6474_v10 = vld [vmem:[%s8445_s5 + $0x390] ss:$8 sps:$4 sm:$0xff]   ;;  %v6482_v35 = vld [vmem:[%s8445_s5 + $0x3b4] ss:$8 sps:$4 sm:$0xff]  }
 0x875   : > { %3981 = vmatpush1.bf16.msra.mxu1 %v6411_v2  ;;  %v6476_v2 = vld [vmem:[%s8445_s5 + $0x394] ss:$8 sps:$4 sm:$0xff]  }
 0x876   : > { %3982 = vmatprep.subr.bf16.mxu1 %v6416_v11  ;;  %v6479_v11 = vld [vmem:[%s8445_s5 + $0x3a4] ss:$8 sps:$4 sm:$0xff]  }
 0x879   : > { %3983 = vmatpush1.bf16.msra.mxu1 %v6414_v21  ;;  %v6480_v21 = vld [vmem:[%s8445_s5 + $0x3b0] ss:$8 sps:$4 sm:$0xff]  }
 0x87a   : > { %3984 = vmatprep.subr.bf16.mxu1 %v6419_v32  ;;  %v6485_v32 = vld [vmem:[%s8445_s5 + $0x3c4] ss:$8 sps:$4 sm:$0xff]  }
 0x87d   : > { %3985 = vmatpush1.bf16.msra.mxu1 %v6417_v33  ;;  %v6483_v33 = vld [vmem:[%s8445_s5 + $0x3c0] ss:$8 sps:$4 sm:$0xff]  }
 0x87e   : > { %3986 = vmatprep.subr.bf16.mxu1 %v6422_v54  ;;  %v6488_v54 = vld [vmem:[%s8445_s5 + $0x3d4] ss:$8 sps:$4 sm:$0xff]  }
 0x87f   : > { %v8184_v15 = vpop.f32.mrb[144].mxu0 }
 0x880   : > { %v6006_v31 = vpop.f32.mrb[145].mxu0 }
 0x881   : > { %3987 = vmatpush1.bf16.msra.mxu1 %v6420_v44  ;;  %v8189_v42 = vpop.f32.mrb[146].mxu0  ;;  %v6486_v44 = vld [vmem:[%s8445_s5 + $0x3d0] ss:$8 sps:$4 sm:$0xff]   ;;  %v6494_v31 = vld [vmem:[%s8445_s5 + $0x3f4] ss:$8 sps:$4 sm:$0xff]  }
 0x882   : > { %4169 = vmatprep.subr.bf16.mxu1 %v6425_v38  ;;  %v4268_v14 = vpack.c.bf16 %v8189_v42, %v8184_v15  ;;  %v6007_v8 = vpop.f32.mrb[147].mxu0  ;;  %v6491_v38 = vld [vmem:[%s8445_s5 + $0x3e4] ss:$8 sps:$4 sm:$0xff]   ;;  %v6489_v15 = vld [vmem:[%s8445_s5 + $0x3e0] ss:$8 sps:$4 sm:$0xff]  }
 0x883   : > { %v6497_v42 = vld [vmem:[%s8445_s5 + $0x404] ss:$8 sps:$4 sm:$0xff]   ;;  %v6498_v8 = vld [vmem:[%s8445_s5 + $0x410] ss:$8 sps:$4 sm:$0xff]  }
 0x884   : > { %4005 = vmatmul.mubr.bf16.vlgmr.msra.gmra.mrb[96].mxu1 %v3874_v57  ;;  %v6461_v57 = vld [vmem:[%s8445_s5 + $0x344] ss:$8 sps:$4 sm:$0xff]  }
 0x885   : > { %4170 = vmatpush1.bf16.msra.mxu1 %v6423_v63  ;;  %4201 = vmatprep.mubr.bf16.mxu1 %v6538_v6  ;;  %v6492_v63 = vld [vmem:[%s8445_s5 + $0x3f0] ss:$8 sps:$4 sm:$0xff]  }
 0x886   : > { %4171 = vmatprep.subr.bf16.mxu1 %v6428_v62  ;;  %v6495_v62 = vld [vmem:[%s8445_s5 + $0x400] ss:$8 sps:$4 sm:$0xff]  }
 0x889   : > { %4172 = vmatpush1.bf16.msra.mxu1 %v6426_v25  ;;  %v6503_v25 = vld [vmem:[%s8445_s5 + $0x424] ss:$8 sps:$4 sm:$0xff]  }
 0x88a   : > { %4173 = vmatprep.subr.bf16.mxu1 %v6431_v53  ;;  %v6501_v53 = vld [vmem:[%s8445_s5 + $0x420] ss:$8 sps:$4 sm:$0xff]  }
 0x88d   : > { %4174 = vmatpush1.bf16.msra.mxu1 %v6429_v24  ;;  %v6506_v24 = vld [vmem:[%s8445_s5 + $0x434] ss:$8 sps:$4 sm:$0xff]  }
 0x88e   : > { %4175 = vmatprep.subr.bf16.mxu1 %v6434_v1  ;;  %v6509_v1 = vld [vmem:[%s8445_s5 + $0x444] ss:$8 sps:$4 sm:$0xff]  }
 0x88f   : > { %v8215_v45 = vpop.f32.mrb[148].mxu0 }
 0x890   : > { %v6018_v58 = vpop.f32.mrb[149].mxu0 }
 0x891   : > { %4176 = vmatpush1.bf16.msra.mxu1 %v6432_v55  ;;  %v8220_v9 = vpop.f32.mrb[150].mxu0  ;;  %v6507_v55 = vld [vmem:[%s8445_s5 + $0x440] ss:$8 sps:$4 sm:$0xff]   ;;  %v6515_v58 = vld [vmem:[%s8445_s5 + $0x464] ss:$8 sps:$4 sm:$0xff]  }
 0x892   : > { %4177 = vmatprep.subr.bf16.mxu1 %v6437_v51  ;;  %v4465_v17 = vpack.c.bf16 %v8220_v9, %v8215_v45  ;;  %v6019_v26 = vpop.f32.mrb[151].mxu0  ;;  %v6512_v51 = vld [vmem:[%s8445_s5 + $0x454] ss:$8 sps:$4 sm:$0xff]   ;;  %v6510_v45 = vld [vmem:[%s8445_s5 + $0x450] ss:$8 sps:$4 sm:$0xff]  }
 0x893   : > { %v6518_v9 = vld [vmem:[%s8445_s5 + $0x474] ss:$8 sps:$4 sm:$0xff]  }
 0x895   : > { %4178 = vmatpush1.bf16.msra.mxu1 %v6435_v61  ;;  %v6513_v61 = vld [vmem:[%s8445_s5 + $0x460] ss:$8 sps:$4 sm:$0xff]  }
 0x896   : > { %4179 = vmatprep.subr.bf16.mxu1 %v6440_v12  ;;  %v6516_v12 = vld [vmem:[%s8445_s5 + $0x470] ss:$8 sps:$4 sm:$0xff]  }
 0x899   : > { %4180 = vmatpush1.bf16.msra.mxu1 %v6438_v19 }
 0x89a   : > { %4181 = vmatprep.subr.bf16.mxu1 %v6443_v49 }
 0x89d   : > { %4182 = vmatpush1.bf16.msra.mxu1 %v6441_v41 }
 0x89e   : > { %4183 = vmatprep.subr.bf16.mxu1 %v6446_v20 }
 0x89f   : > { %v8245_v37 = vpop.f32.mrb[152].mxu0 }
 0x8a0   : > { %v6030_v4 = vpop.f32.mrb[153].mxu0 }
 0x8a1   : > { %4184 = vmatpush1.bf16.msra.mxu1 %v6444_v46  ;;  %v8250_v56 = vpop.f32.mrb[154].mxu0 }
 0x8a2   : > { %4366 = vmatprep.subr.bf16.mxu1 %v6449_v48  ;;  %v4662_v3 = vpack.c.bf16 %v8250_v56, %v8245_v37  ;;  %v6031_v7 = vpop.f32.mrb[155].mxu0 }
 0x8a4   : > { %4202 = vmatmul.mubr.bf16.vlgmr.msra.gmra.mrb[96].mxu1 %v4071_v13  ;;  %v6477_v13 = vld [vmem:[%s8445_s5 + $0x3a0] ss:$8 sps:$4 sm:$0xff]  }
 0x8a5   : > { %4367 = vmatpush1.bf16.msra.mxu1 %v6447_v30  ;;  %4398 = vmatprep.mubr.bf16.mxu1 %v6538_v6 }
 0x8a6   : > { %4368 = vmatprep.subr.bf16.mxu1 %v6452_v60 }
 0x8a9   : > { %4369 = vmatpush1.bf16.msra.mxu1 %v6450_v16 }
 0x8aa   : > { %4370 = vmatprep.subr.bf16.mxu1 %v6455_v40 }
 0x8ad   : > { %4371 = vmatpush1.bf16.msra.mxu1 %v6453_v39 }
 0x8ae   : > { %4372 = vmatprep.subr.bf16.mxu1 %v6458_v5 }
 0x8b1   : > { %4373 = vmatpush1.bf16.msra.mxu1 %v6456_v43 }
 0x8b2   : > { %4374 = vmatprep.subr.bf16.mxu1 %v6461_v57 }
 0x8b5   : > { %4375 = vmatpush1.bf16.msra.mxu1 %v6459_v22 }
 0x8b6   : > { %4376 = vmatprep.subr.bf16.mxu1 %v6464_v50 }
 0x8b9   : > { %4377 = vmatpush1.bf16.msra.mxu1 %v6462_v52 }
 0x8ba   : > { %4378 = vmatprep.subr.bf16.mxu1 %v6467_v59 }
 0x8bd   : > { %4379 = vmatpush1.bf16.msra.mxu1 %v6465_v23 }
 0x8be   : > { %4380 = vmatprep.subr.bf16.mxu1 %v6470_v34 }
 0x8c1   : > { %4381 = vmatpush1.bf16.msra.mxu1 %v6468_v47 }
 0x8c2   : > { %4563 = vmatprep.subr.bf16.mxu1 %v6473_v27 }
 0x8c4   : > { %4399 = vmatmul.mubr.bf16.vlgmr.msra.gmra.mrb[96].mxu1 %v4268_v14  ;;  %v6500_v14 = vld [vmem:[%s8445_s5 + $0x414] ss:$8 sps:$4 sm:$0xff]  }
 0x8c5   : > { %4564 = vmatpush1.bf16.msra.mxu1 %v6471_v29  ;;  %4595 = vmatprep.mubr.bf16.mxu1 %v6538_v6 }
 0x8c6   : > { %4565 = vmatprep.subr.bf16.mxu1 %v6476_v2 }
 0x8c9   : > { %4566 = vmatpush1.bf16.msra.mxu1 %v6474_v10 }
 0x8ca   : > { %4567 = vmatprep.subr.bf16.mxu1 %v6479_v11 }
 0x8cd   : > { %4568 = vmatpush1.bf16.msra.mxu1 %v6477_v13 }
 0x8ce   : > { %4569 = vmatprep.subr.bf16.mxu1 %v6482_v35 }
 0x8d1   : > { %4570 = vmatpush1.bf16.msra.mxu1 %v6480_v21 }
 0x8d2   : > { %4571 = vmatprep.subr.bf16.mxu1 %v6485_v32 }
 0x8d5   : > { %4572 = vmatpush1.bf16.msra.mxu1 %v6483_v33 }
 0x8d6   : > { %4573 = vmatprep.subr.bf16.mxu1 %v6488_v54 }
 0x8d9   : > { %4574 = vmatpush1.bf16.msra.mxu1 %v6486_v44 }
 0x8da   : > { %4575 = vmatprep.subr.bf16.mxu1 %v6491_v38 }
 0x8dd   : > { %4576 = vmatpush1.bf16.msra.mxu1 %v6489_v15 }
 0x8de   : > { %4577 = vmatprep.subr.bf16.mxu1 %v6494_v31 }
 0x8e1   : > { %4578 = vmatpush1.bf16.msra.mxu1 %v6492_v63 }
 0x8e2   : > { %4760 = vmatprep.subr.bf16.mxu1 %v6497_v42 }
 0x8e4   : > { %4596 = vmatmul.mubr.bf16.vlgmr.msra.gmra.mrb[96].mxu1 %v4465_v17 }
 0x8e5   : > { %4761 = vmatpush1.bf16.msra.mxu1 %v6495_v62  ;;  %4792 = vmatprep.mubr.bf16.mxu1 %v6538_v6  ;;  %v6504_v6 = vld [vmem:[%s8445_s5 + $0x430] ss:$8 sps:$4 sm:$0xff]  }
 0x8e6   : > { %4762 = vmatprep.subr.bf16.mxu1 %v6500_v14 }
 0x8e9   : > { %4763 = vmatpush1.bf16.msra.mxu1 %v6498_v8 }
 0x8ea   : > { %4764 = vmatprep.subr.bf16.mxu1 %v6503_v25 }
 0x8ed   : > { %4765 = vmatpush1.bf16.msra.mxu1 %v6501_v53 }
 0x8ee   : > { %4766 = vmatprep.subr.bf16.mxu1 %v6506_v24 }
 0x8f1   : > { %4767 = vmatpush1.bf16.msra.mxu1 %v6504_v6 }
 0x8f2   : > { %4768 = vmatprep.subr.bf16.mxu1 %v6509_v1 }
 0x8f5   : > { %4769 = vmatpush1.bf16.msra.mxu1 %v6507_v55 }
 0x8f6   : > { %4770 = vmatprep.subr.bf16.mxu1 %v6512_v51 }
 0x8f9   : > { %4771 = vmatpush1.bf16.msra.mxu1 %v6510_v45 }
 0x8fa   : > { %4772 = vmatprep.subr.bf16.mxu1 %v6515_v58 }
 0x8fd   : > { %4773 = vmatpush1.bf16.msra.mxu1 %v6513_v61 }
 0x8fe   : > { %4774 = vmatprep.subr.bf16.mxu1 %v6518_v9 }
 0x901   : > { %4775 = vmatpush1.bf16.msra.mxu1 %v6516_v12 }
 0x904   : > { %4793 = vmatmul.mubr.bf16.vlgmr.msra.gmra.mrb[96].mxu1 %v4662_v3 }
 0x9d7   : > { %v4794_v17 = vpop.f32.mrb[96].mxu1 }
 0x9d8   : > { %v8408_v26 = vadd.f32 %v4794_v17, %v8072_v0  ;;  %v4796_v19 = vpop.f32.mrb[97].mxu1 }
 0x9d9   : > { %v8411_v49 = vadd.f32 %v4796_v19, %v8074_v18  ;;  %v4798_v41 = vpop.f32.mrb[98].mxu1 }
 0x9da   : > { %v6034_v20 = vadd.f32 %v4798_v41, %v8076_v36  ;;  %v4800_v46 = vpop.f32.mrb[99].mxu1  ;;  %v4826_v37 = vmul.f32 %v8408_v26, %v8408_v26 }
 0x9db   : > { %v8415_v48 = vadd.f32 %v4800_v46, %v8078_v28  ;;  %v4827_v36 = vmul.f32 %v8411_v49, %v8411_v49 }
 0x9dc   : > { %v4807_v4 = vsel %vm903_vm7, %v6034_v20, 0.0  ;;  %v4828_v30 = vmul.f32 %v6034_v20, %v6034_v20 }
 0x9dd   : > { %v4808_v0 = vadd.f32 %v8408_v26, %v4807_v4  ;;  %v4815_v56 = vsel %vm903_vm7, %v8415_v48, 0.0  ;;  %v4829_v18 = vmul.f32 %v8415_v48, %v8415_v48 }
 0x9de   : > { %v4830_v28 = vsel %vm903_vm7, %v4828_v30, 0.0  ;;  %v4816_v60 = vadd.f32 %v8411_v49, %v4815_v56 }
 0x9df   : > { %v4809_v3 = vrot.slane %v4808_v0, 4  ;;  %v4831_v7 = vadd.f32 %v4830_v28, %v4826_v37  ;;  %v4838_v16 = vsel %vm903_vm7, %v4829_v18, 0.0 }
 0x9e0   : > { %v4817_v40 = vrot.slane %v4816_v60, 4  ;;  %v4839_v39 = vadd.f32 %v4838_v16, %v4827_v36 }
 0x9e1   : > { %v4810_v5 = vadd.f32 %v4809_v3, %v4808_v0  ;;  %v4832_v43 = vrot.slane %v4831_v7, 4 }
 0x9e2   : > { %v4818_v57 = vadd.f32 %v4817_v40, %v4816_v60  ;;  %v4840_v22 = vrot.slane %v4839_v39, 4 }
 0x9e3   : > { %v4811_v50 = vrot.slane %v4810_v5, 2  ;;  %v4833_v52 = vadd.f32 %v4832_v43, %v4831_v7 }
 0x9e4   : > { %v4819_v59 = vrot.slane %v4818_v57, 2  ;;  %v4841_v23 = vadd.f32 %v4840_v22, %v4839_v39 }
 0x9e5   : > { %v4812_v34 = vadd.f32 %v4811_v50, %v4810_v5  ;;  %v4834_v47 = vrot.slane %v4833_v52, 2 }
 0x9e6   : > { %v4820_v27 = vadd.f32 %v4819_v59, %v4818_v57  ;;  %v4842_v29 = vrot.slane %v4841_v23, 2 }
 0x9e7   : > { %v4813_v2 = vrot.slane %v4812_v34, 1  ;;  %v4835_v10 = vadd.f32 %v4834_v47, %v4833_v52 }
 0x9e8   : > { %v4821_v11 = vrot.slane %v4820_v27, 1  ;;  %v4843_v13 = vadd.f32 %v4842_v29, %v4841_v23 }
 0x9e9   : > { %v4814_v35 = vadd.f32 %v4813_v2, %v4812_v34  ;;  %v4836_v21 = vrot.slane %v4835_v10, 1 }
 0x9ea   : > { %v4822_v32 = vadd.f32 %v4821_v11, %v4820_v27  ;;  %v4844_v33 = vrot.slane %v4843_v13, 1 }
 0x9eb   : > { %v4824_v54 = vmul.f32 0.11111111, %v4814_v35  ;;  %v4837_v44 = vadd.f32 %v4836_v21, %v4835_v10 }
 0x9ec   : > { %v4825_v38 = vmul.f32 0.11111111, %v4822_v32  ;;  %v4845_v15 = vadd.f32 %v4844_v33, %v4843_v13 }
 0x9ed   : > { %v4846_v31 = vmul.f32 0.11111111, %v4837_v44  ;;  %v4848_v63 = vmul.f32 %v4824_v54, %v4824_v54  ;;  %v4854_v42 = vsub.f32 %v8408_v26, %v4824_v54  ;;  %v4856_v62 = vsub.f32 %v6034_v20, %v4824_v54 }
 0x9ee   : > { %v4847_v14 = vmul.f32 0.11111111, %v4845_v15  ;;  %v4849_v8 = vmul.f32 %v4825_v38, %v4825_v38  ;;  %v4855_v25 = vsub.f32 %v8411_v49, %v4825_v38  ;;  %v4857_v53 = vsub.f32 %v8415_v48, %v4825_v38 }
 0x9ef   : > { %v4850_v24 = vsub.f32 %v4846_v31, %v4848_v63 }
 0x9f0   : > { %v4851_v6 = vsub.f32 %v4847_v14, %v4849_v8 }
 0x9f1   : > { %v4852_v1 = vmax.f32 %v4850_v24, 0.0 }
 0x9f2   : > { %v4853_v55 = vmax.f32 %v4851_v6, 0.0 }
 0x9f3   : > { %v4858_v51 = vadd.f32 1e-05, %v4852_v1 }
 0x9f4   : > { %v4859_v45 = vadd.f32 1e-05, %v4853_v55 }
 0x9f5   : > { %6523 = vrsqrt.f32 %v4858_v51 }
 0x9f6   : > { %6525 = vrsqrt.f32 %v4859_v45 }
 0x9ff   : > { %v6524_v58 = vpop.eup %6523 }
 0xa00   : > { %v6526_v61 = vpop.eup %6525  ;;  %v4862_v9 = vmul.f32 %v6524_v58, %v4854_v42  ;;  %v4864_v12 = vmul.f32 %v6524_v58, %v4856_v62 }
 0xa01   : > { %v4863_v17 = vmul.f32 %v6526_v61, %v4855_v25  ;;  %v4865_v26 = vmul.f32 %v6526_v61, %v4857_v53 }
 0xa02   : > { %v4866_v19 = vmax.f32 %v4862_v9, 0.0  ;;  %v4868_v49 = vmax.f32 %v4864_v12, 0.0 }
 0xa03   : > { %v4867_v41 = vmax.f32 %v4863_v17, 0.0  ;;  %v4869_v20 = vmax.f32 %v4865_v26, 0.0 }
 0xa04   : > { %4870 = vst [vmem:[%s251_s10] sm:$0xff] %v4866_v19  ;;  %4872 = vst [vmem:[%s251_s10 + $0x10] sm:$0x1] %v4868_v49 }
 0xa05   : > { %4871 = vst [vmem:[%s251_s10 + $0x8] sm:$0xff] %v4867_v41  ;;  %4873 = vst [vmem:[%s251_s10 + $0x18] sm:$0x1] %v4869_v20 }
 0xa06 PF: > { %s16_s21 = sadd.s32 1, %s6533_s21  }
 0xa07   : > { %p13_p4 = scmp.ge.s32.totalorder %s16_s21, 4  }
 0xa09   :  { %15 = sbr.rel (!%p13_p4) target bundleno = 1 (0x1), region = 106 }

</bundles_post_ra>
